<compile_context>
chip_gen: v7x
topology: tpu7x:2x2x1
jax: 0.10.0
libtpu: 0.0.40
codegen_flags: <defaults>
</compile_context>

<pallas_src>
import functools

import jax
import jax.numpy as jnp
import numpy as np
from jax.experimental import pallas as pl
from jax.experimental.pallas import tpu as pltpu

_MAX_TILE = 2048                    # N-tile: multiple of 256 (MXU result tile) and 128 (lanes)
_VMEM_LIMIT = 48 * 1024 * 1024      # explicit scoped-VMEM limit (v7x-safe, > v5e 16 MiB default)


# ----------------------------------------------------------------------------
# Shared helper: lane-wise running max of z over the N grid axis (axis 1)
# ----------------------------------------------------------------------------
def _acc_lane_max(z, out_ref, acc_ref, *, n_total, tn):
    """Accumulate max over points of z (1024, tn) into out_ref (1024, 1).

    Interior tiles: one elementwise VPU max into acc_ref, nothing else.
    Last tile: (static, only if a ragged tail exists) -inf mask, then the single
    cross-lane XLU reduce and the single narrow output store.
    """
    n_tiles = (n_total + tn - 1) // tn          # static Python int
    has_tail = (n_total % tn) != 0              # static Python bool
    n_idx = pl.program_id(1)

    def _mask_tail(v):
        col = jax.lax.broadcasted_iota(jnp.int32, (1, tn), 1) + n_idx * tn
        return jnp.where(col < n_total, v, -jnp.inf)

    if n_tiles == 1:
        zm = _mask_tail(z) if has_tail else z
        out_ref[...] = jnp.max(zm, axis=-1, keepdims=True)
        return

    is_first = n_idx == 0
    is_last = n_idx == n_tiles - 1

    @pl.when(is_first)                          # first tile (never the tail when n_tiles > 1)
    def _():
        acc_ref[...] = z

    @pl.when(jnp.logical_and(n_idx > 0, n_idx < n_tiles - 1))
    def _():                                    # interior fast path: single VPU max
        acc_ref[...] = jnp.maximum(acc_ref[...], z)

    @pl.when(is_last)
    def _():                                    # finalize: mask tail, reduce once, store once
        zm = _mask_tail(z) if has_tail else z
        out_ref[...] = jnp.max(jnp.maximum(acc_ref[...], zm), axis=-1, keepdims=True)


# ----------------------------------------------------------------------------
# Pallas kernels
# ----------------------------------------------------------------------------
def _stn_conv_kernel(x_ref, w1_ref, b1_ref, w2_ref, b2_ref, w3_ref,
                     out_ref, acc_ref, *, n_total, tn):
    # x_ref: (3, tn) NCW slice; out_ref: (1024, 1) resident max (pre bn3-bias, pre ReLU).
    x = x_ref[...]                                                      # (3, tn) f32
    h = jnp.maximum(
        jnp.dot(w1_ref[...], x, preferred_element_type=jnp.float32) + b1_ref[...], 0.0)
    h = jnp.maximum(
        jnp.dot(w2_ref[...], h.astype(jnp.bfloat16),
                preferred_element_type=jnp.float32) + b2_ref[...], 0.0)
    z = jnp.dot(w3_ref[...], h.astype(jnp.bfloat16),
                preferred_element_type=jnp.float32)                     # (1024, tn), no bias/ReLU
    _acc_lane_max(z, out_ref, acc_ref, n_total=n_total, tn=tn)


def _feat_conv_kernel(x_ref, transT_ref, w1p_ref, b1_ref, w2_ref, b2_ref, w3_ref,
                      xt_ref, glob_ref, acc_ref, *, n_total, tn):
    # x_ref: (3, tn); transT_ref: (3, 3) = trans^T; w1p_ref: (64, 3) = W1_bn @ trans^T.
    x = x_ref[...]                                                      # (3, tn) f32

    # trans_in = trans^T @ x -> lane-dense (3, tn) store (module's 2nd output).
    xt_ref[...] = jnp.dot(transT_ref[...], x, preferred_element_type=jnp.float32)

    # conv1/bn1/relu with the 3x3 transform folded into the weight.
    h = jnp.maximum(
        jnp.dot(w1p_ref[...], x, preferred_element_type=jnp.float32) + b1_ref[...], 0.0)
    h = jnp.maximum(
        jnp.dot(w2_ref[...], h.astype(jnp.bfloat16),
                preferred_element_type=jnp.float32) + b2_ref[...], 0.0)
    z = jnp.dot(w3_ref[...], h.astype(jnp.bfloat16),
                preferred_element_type=jnp.float32)                     # (1024, tn), bias deferred
    _acc_lane_max(z, glob_ref, acc_ref, n_total=n_total, tn=tn)


# ----------------------------------------------------------------------------
# pallas_call wrappers
# ----------------------------------------------------------------------------
def _w_spec(arr):
    # Whole-array block, same block every grid step (weights / biases stay resident).
    return pl.BlockSpec(arr.shape, lambda *args, _nd=arr.ndim: (0,) * _nd)


def _acc_scratch(n_tiles, tn):
    # Only multi-tile runs need the running-max scratch; keep it tiny otherwise.
    return pltpu.VMEM((1024, tn) if n_tiles > 1 else (8, 128), jnp.float32)


def _stn_conv_call(x, p, tn, n_tiles):
    B, _, N = x.shape
    weights = [p['w1'], p['b1'], p['w2'], p['b2'], p['w3']]
    kernel = functools.partial(_stn_conv_kernel, n_total=N, tn=tn)
    return pl.pallas_call(
        kernel,
        out_shape=jax.ShapeDtypeStruct((B, 1024, 1), jnp.float32),
        grid=(B, n_tiles),
        in_specs=[pl.BlockSpec((None, 3, tn), lambda b, n: (b, 0, n))]
                 + [_w_spec(w) for w in weights],
        out_specs=pl.BlockSpec((None, 1024, 1), lambda b, n: (b, 0, 0)),
        scratch_shapes=[_acc_scratch(n_tiles, tn)],
        compiler_params=pltpu.CompilerParams(
            dimension_semantics=("parallel", "arbitrary"),
            vmem_limit_bytes=_VMEM_LIMIT),
    )(x, *weights)


def _feat_conv_call(x, transT, w1p, p, tn, n_tiles):
    B, _, N = x.shape
    weights = [p['b1'], p['w2'], p['b2'], p['w3']]
    kernel = functools.partial(_feat_conv_kernel, n_total=N, tn=tn)
    return pl.pallas_call(
        kernel,
        out_shape=(jax.ShapeDtypeStruct((B, 3, N), jnp.float32),      # trans_in (lane-dense)
                   jax.ShapeDtypeStruct((B, 1024, 1), jnp.float32)),  # global max (pre bn3-bias)
        grid=(B, n_tiles),
        in_specs=[pl.BlockSpec((None, 3, tn), lambda b, n: (b, 0, n)),
                  pl.BlockSpec((None, 3, 3), lambda b, n: (b, 0, 0)),
                  pl.BlockSpec((None, 64, 3), lambda b, n: (b, 0, 0))]
                 + [_w_spec(w) for w in weights],
        out_specs=(pl.BlockSpec((None, 3, tn), lambda b, n: (b, 0, n)),
                   pl.BlockSpec((None, 1024, 1), lambda b, n: (b, 0, 0))),
        scratch_shapes=[_acc_scratch(n_tiles, tn)],
        compiler_params=pltpu.CompilerParams(
            dimension_semantics=("parallel", "arbitrary"),
            vmem_limit_bytes=_VMEM_LIMIT),
    )(x, transT, w1p, *weights)


def pointnetfeat_forward(x, params, *, tn=None):
    """x: (B, 3, N) float32 (native PyTorch NCW).  Returns (global_feat, trans_in, trans_feat)."""
    B, C, N = x.shape
    assert C == 3
    if tn is None:
        tn = N if N <= _MAX_TILE else _MAX_TILE
    n_tiles = pl.cdiv(N, tn)
    s, f = params['stn'], params['feat']

    # STN conv stack + max over points (Pallas, tiled over N); bn3 bias + ReLU
    # are applied here, after the max (exact: bias is per-channel, ReLU monotone).
    g = _stn_conv_call(x, s, tn, n_tiles).reshape(B, 1024)
    g = jax.nn.relu(g + s['b3'].reshape(1, 1024))

    # STN FC stack batched over B (plain XLA: M=B matmuls instead of B matvecs).
    g = jax.nn.relu(g @ s['wf1'] + s['bf1'])
    g = jax.nn.relu(g @ s['wf2'] + s['bf2'])
    t = g @ s['wf3'] + s['bf3'] + s['iden']                   # (B, 9), + identity
    trans = t.reshape(B, 3, 3)
    transT = jnp.swapaxes(trans, 1, 2)                        # (B, 3, 3) = trans^T

    # Fold the input transform into feat-conv1's (BN-folded) weight: (B, 64, 3).
    w1p = jnp.einsum('oc,bcd->bod', f['w1'], transT)

    trans_in, glob = _feat_conv_call(x, transT, w1p, f, tn, n_tiles)   # (B,3,N), (B,1024,1)
    glob = glob.reshape(B, 1024) + f['b3'].reshape(1, 1024)            # bn3 bias, no ReLU
    return glob, trans_in, None                               # trans_feat is None (default config)


# ----------------------------------------------------------------------------
# Deterministic parameter setup (BN folded, eval mode)
# ----------------------------------------------------------------------------
def _conv_bn_params(key, cin, cout, *, w_dtype=jnp.float32, eps=1e-5):
    k1, k2, k3, k4, k5, k6 = jax.random.split(key, 6)
    w = 0.1 * jax.random.normal(k1, (cout, cin), jnp.float32)     # PyTorch Conv1d layout (Cout, Cin)
    b = 0.1 * jax.random.normal(k2, (cout,), jnp.float32)
    gamma = 1.0 + 0.1 * jax.random.normal(k3, (cout,), jnp.float32)
    beta = 0.1 * jax.random.normal(k4, (cout,), jnp.float32)
    mean = 0.1 * jax.random.normal(k5, (cout,), jnp.float32)
    var = 1.0 + 0.1 * jnp.abs(jax.random.normal(k6, (cout,), jnp.float32))
    scale = gamma / jnp.sqrt(var + eps)
    w_folded = (w * scale[:, None]).astype(w_dtype)
    b_folded = ((b - mean) * scale + beta).reshape(cout, 1)      # bias kept f32, (Cout, 1)
    return w_folded, b_folded


def _fc_bn_params(key, cin, cout, eps=1e-5):
    k1, k2, k3, k4, k5, k6 = jax.random.split(key, 6)
    w = 0.1 * jax.random.normal(k1, (cin, cout), jnp.float32)
    b = 0.1 * jax.random.normal(k2, (cout,), jnp.float32)
    gamma = 1.0 + 0.1 * jax.random.normal(k3, (cout,), jnp.float32)
    beta = 0.1 * jax.random.normal(k4, (cout,), jnp.float32)
    mean = 0.1 * jax.random.normal(k5, (cout,), jnp.float32)
    var = 1.0 + 0.1 * jnp.abs(jax.random.normal(k6, (cout,), jnp.float32))
    scale = gamma / jnp.sqrt(var + eps)
    return w * scale[None, :], ((b - mean) * scale + beta).reshape(1, cout)


def _fc_params(key, cin, cout):
    k1, k2 = jax.random.split(key)
    return (0.1 * jax.random.normal(k1, (cin, cout), jnp.float32),
            0.1 * jax.random.normal(k2, (cout,), jnp.float32).reshape(1, cout))


def make_params(key):
    ks = jax.random.split(key, 9)
    stn = {}
    stn['w1'], stn['b1'] = _conv_bn_params(ks[0], 3, 64)                          # f32 (K=3, tiny)
    stn['w2'], stn['b2'] = _conv_bn_params(ks[1], 64, 128, w_dtype=jnp.bfloat16)  # bf16 MXU operand
    stn['w3'], stn['b3'] = _conv_bn_params(ks[2], 128, 1024, w_dtype=jnp.bfloat16)
    stn['wf1'], stn['bf1'] = _fc_bn_params(ks[3], 1024, 512)   # fc1 + bn4 (f32, batched in XLA)
    stn['wf2'], stn['bf2'] = _fc_bn_params(ks[4], 512, 256)    # fc2 + bn5
    stn['wf3'], stn['bf3'] = _fc_params(ks[5], 256, 9)         # fc3 (no bn)
    stn['iden'] = jnp.eye(3, dtype=jnp.float32).reshape(1, 9)
    feat = {}
    feat['w1'], feat['b1'] = _conv_bn_params(ks[6], 3, 64)                        # f32 (folded w/ trans)
    feat['w2'], feat['b2'] = _conv_bn_params(ks[7], 64, 128, w_dtype=jnp.bfloat16)
    feat['w3'], feat['b3'] = _conv_bn_params(ks[8], 128, 1024, w_dtype=jnp.bfloat16)
    return {'stn': stn, 'feat': feat}


# ----------------------------------------------------------------------------
# Pure-JAX reference (for a sanity check)
# ----------------------------------------------------------------------------
def _conv_ref(h, w, b, relu=True):
    y = jnp.einsum('oc,bcn->bon', w, h.astype(w.dtype),
                   preferred_element_type=jnp.float32) + b
    return jax.nn.relu(y) if relu else y


def _ref_forward(x, P):
    B = x.shape[0]
    s, f = P['stn'], P['feat']
    h = _conv_ref(x, s['w1'], s['b1'])
    h = _conv_ref(h, s['w2'], s['b2'])
    h = _conv_ref(h, s['w3'], s['b3'])
    g = jnp.max(h, axis=-1)                                   # (B, 1024)
    g = jax.nn.relu(g @ s['wf1'] + s['bf1'])
    g = jax.nn.relu(g @ s['wf2'] + s['bf2'])
    t = g @ s['wf3'] + s['bf3'] + s['iden']
    trans = t.reshape(B, 3, 3)
    trans_in = jnp.einsum('bdc,bdn->bcn', trans, x)           # trans^T @ x  -> (B, 3, N)
    h = _conv_ref(trans_in, f['w1'], f['b1'])
    h = _conv_ref(h, f['w2'], f['b2'])
    h = _conv_ref(h, f['w3'], f['b3'], relu=False)
    return jnp.max(h, axis=-1), trans_in


if __name__ == "__main__":
    key = jax.random.PRNGKey(0)
    kp, kx1, kx2 = jax.random.split(key, 3)
    params = make_params(kp)

    # Case 1: small shapes, single N-tile path.
    B, N = 2, 16
    x = jax.random.normal(kx1, (B, 3, N), jnp.float32)        # native PyTorch NCW layout
    fwd = jax.jit(functools.partial(pointnetfeat_forward, params=params))
    glob, trans_in, trans_feat = fwd(x)
    jax.block_until_ready((glob, trans_in))
    ref_glob, ref_trans_in = _ref_forward(x, params)
    np.testing.assert_allclose(np.asarray(glob), np.asarray(ref_glob), rtol=1e-2, atol=1e-2)
    np.testing.assert_allclose(np.asarray(trans_in), np.asarray(ref_trans_in), rtol=1e-2, atol=1e-2)
    assert glob.shape == (B, 1024) and trans_in.shape == (B, 3, N) and trans_feat is None

    # Case 2: multi-tile path with a ragged tail (N=320, tn=128 -> 3 tiles, tail of 64).
    B2, N2, TN2 = 2, 320, 128
    x2 = jax.random.normal(kx2, (B2, 3, N2), jnp.float32)
    fwd2 = jax.jit(functools.partial(pointnetfeat_forward, params=params, tn=TN2))
    glob2, trans_in2, _ = fwd2(x2)
    jax.block_until_ready((glob2, trans_in2))
    ref_glob2, ref_trans_in2 = _ref_forward(x2, params)
    np.testing.assert_allclose(np.asarray(glob2), np.asarray(ref_glob2), rtol=1e-2, atol=1e-2)
    np.testing.assert_allclose(np.asarray(trans_in2), np.asarray(ref_trans_in2), rtol=1e-2, atol=1e-2)

    print("KERNEL_OK")
</pallas_src>

<mosaic_0001>
module attributes {stable_mosaic.version = 11 : i64} {
  func.func @_stn_conv_kernel(%arg0: i32, %arg1: i32, %arg2: memref<1x3x16xf32, #tpu.memory_space<vmem>>, %arg3: memref<64x3xf32, #tpu.memory_space<vmem>>, %arg4: memref<64x1xf32, #tpu.memory_space<vmem>>, %arg5: memref<128x64xbf16, #tpu.memory_space<vmem>>, %arg6: memref<128x1xf32, #tpu.memory_space<vmem>>, %arg7: memref<1024x128xbf16, #tpu.memory_space<vmem>>, %arg8: memref<1x1024x1xf32, #tpu.memory_space<vmem>>, %arg9: memref<8x128xf32, #tpu.memory_space<vmem>>) attributes {dimension_semantics = [#tpu.dimension_semantics<parallel>, #tpu.dimension_semantics<arbitrary>], iteration_bounds = array<i64: 2, 1>, scalar_prefetch = 0 : i64, scratch_operands = 1 : i64, tpu.core_type = #tpu.core_type<tc>, window_params = [{transform_indices = @transform_0, window_bounds = array<i64: 1, 3, 16>}, {pipeline_mode = #tpu.pipeline_mode<synchronous>, transform_indices = @transform_1, window_bounds = array<i64: 64, 3>}, {pipeline_mode = #tpu.pipeline_mode<synchronous>, transform_indices = @transform_2, window_bounds = array<i64: 64, 1>}, {pipeline_mode = #tpu.pipeline_mode<synchronous>, transform_indices = @transform_3, window_bounds = array<i64: 128, 64>}, {pipeline_mode = #tpu.pipeline_mode<synchronous>, transform_indices = @transform_4, window_bounds = array<i64: 128, 1>}, {pipeline_mode = #tpu.pipeline_mode<synchronous>, transform_indices = @transform_5, window_bounds = array<i64: 1024, 128>}, {transform_indices = @transform_6, window_bounds = array<i64: 1, 1024, 1>}]} {
    %c0 = arith.constant 0 : index
    %c0_0 = arith.constant 0 : index
    %c0_1 = arith.constant 0 : index
    %0 = vector.load %arg2[%c0, %c0_0, %c0_1] : memref<1x3x16xf32, #tpu.memory_space<vmem>>, vector<1x3x16xf32>
    %1 = vector.shape_cast %0 : vector<1x3x16xf32> to vector<3x16xf32>
    %c0_2 = arith.constant 0 : index
    %c0_3 = arith.constant 0 : index
    %2 = vector.load %arg3[%c0_2, %c0_3] : memref<64x3xf32, #tpu.memory_space<vmem>>, vector<64x3xf32>
    %cst = arith.constant dense<0.000000e+00> : vector<64x16xf32>
    %3 = tpu.matmul %2, %1, %cst {dimension_numbers = #tpu.dot_dimension_numbers<[1], [0], [0], [1], [0, 0, 1, 1], [], []>} : vector<64x3xf32>, vector<3x16xf32>, vector<64x16xf32> -> vector<64x16xf32>
    %c0_4 = arith.constant 0 : index
    %c0_5 = arith.constant 0 : index
    %4 = vector.load %arg4[%c0_4, %c0_5] : memref<64x1xf32, #tpu.memory_space<vmem>>, vector<64x1xf32>
    %5 = vector.broadcast %4 : vector<64x1xf32> to vector<64x16xf32>
    %6 = arith.addf %3, %5 : vector<64x16xf32>
    %cst_6 = arith.constant 0.000000e+00 : f32
    %7 = vector.broadcast %cst_6 : f32 to vector<64x16xf32>
    %8 = arith.maximumf %6, %7 : vector<64x16xf32>
    %c0_7 = arith.constant 0 : index
    %c0_8 = arith.constant 0 : index
    %9 = vector.load %arg5[%c0_7, %c0_8] : memref<128x64xbf16, #tpu.memory_space<vmem>>, vector<128x64xbf16>
    %10 = arith.truncf %8 : vector<64x16xf32> to vector<64x16xbf16>
    %cst_9 = arith.constant dense<0.000000e+00> : vector<128x16xf32>
    %11 = tpu.matmul %9, %10, %cst_9 {dimension_numbers = #tpu.dot_dimension_numbers<[1], [0], [0], [1], [0, 0, 1, 1], [], []>} : vector<128x64xbf16>, vector<64x16xbf16>, vector<128x16xf32> -> vector<128x16xf32>
    %c0_10 = arith.constant 0 : index
    %c0_11 = arith.constant 0 : index
    %12 = vector.load %arg6[%c0_10, %c0_11] : memref<128x1xf32, #tpu.memory_space<vmem>>, vector<128x1xf32>
    %13 = vector.broadcast %12 : vector<128x1xf32> to vector<128x16xf32>
    %14 = arith.addf %11, %13 : vector<128x16xf32>
    %cst_12 = arith.constant 0.000000e+00 : f32
    %15 = vector.broadcast %cst_12 : f32 to vector<128x16xf32>
    %16 = arith.maximumf %14, %15 : vector<128x16xf32>
    %c0_13 = arith.constant 0 : index
    %c0_14 = arith.constant 0 : index
    %17 = vector.load %arg7[%c0_13, %c0_14] : memref<1024x128xbf16, #tpu.memory_space<vmem>>, vector<1024x128xbf16>
    %18 = arith.truncf %16 : vector<128x16xf32> to vector<128x16xbf16>
    %cst_15 = arith.constant dense<0.000000e+00> : vector<1024x16xf32>
    %19 = tpu.matmul %17, %18, %cst_15 {dimension_numbers = #tpu.dot_dimension_numbers<[1], [0], [0], [1], [0, 0, 1, 1], [], []>} : vector<1024x128xbf16>, vector<128x16xbf16>, vector<1024x16xf32> -> vector<1024x16xf32>
    %cst_16 = arith.constant dense<0xFF800000> : vector<1024xf32>
    %20 = vector.multi_reduction <maximumf>, %19, %cst_16 [1] : vector<1024x16xf32> to vector<1024xf32>
    %21 = vector.shape_cast %20 : vector<1024xf32> to vector<1024x1xf32>
    %c0_17 = arith.constant 0 : index
    %c0_18 = arith.constant 0 : index
    %c0_19 = arith.constant 0 : index
    %22 = vector.load %arg8[%c0_17, %c0_18, %c0_19] : memref<1x1024x1xf32, #tpu.memory_space<vmem>>, vector<1x1024x1xf32>
    %23 = vector.shape_cast %22 : vector<1x1024x1xf32> to vector<1024x1xf32>
    %24 = vector.shape_cast %21 : vector<1024x1xf32> to vector<1x1024x1xf32>
    tpu.vector_store %arg8[%c0_17, %c0_18, %c0_19], %24 {strides = array<i32>} : memref<1x1024x1xf32, #tpu.memory_space<vmem>>, vector<1x1024x1xf32>,
    return
  }
  func.func @transform_0(%arg0: i32, %arg1: i32) -> (i32, i32, i32) {
    %c0_i32 = arith.constant 0 : i32
    %c0_i32_0 = arith.constant 0 : i32
    return %arg0, %c0_i32, %arg1 : i32, i32, i32
  }
  func.func @transform_1(%arg0: i32, %arg1: i32) -> (i32, i32) {
    %c0_i32 = arith.constant 0 : i32
    %c0_i32_0 = arith.constant 0 : i32
    %c0_i32_1 = arith.constant 0 : i32
    return %c0_i32, %c0_i32_0 : i32, i32
  }
  func.func @transform_2(%arg0: i32, %arg1: i32) -> (i32, i32) {
    %c0_i32 = arith.constant 0 : i32
    %c0_i32_0 = arith.constant 0 : i32
    %c0_i32_1 = arith.constant 0 : i32
    return %c0_i32, %c0_i32_0 : i32, i32
  }
  func.func @transform_3(%arg0: i32, %arg1: i32) -> (i32, i32) {
    %c0_i32 = arith.constant 0 : i32
    %c0_i32_0 = arith.constant 0 : i32
    %c0_i32_1 = arith.constant 0 : i32
    return %c0_i32, %c0_i32_0 : i32, i32
  }
  func.func @transform_4(%arg0: i32, %arg1: i32) -> (i32, i32) {
    %c0_i32 = arith.constant 0 : i32
    %c0_i32_0 = arith.constant 0 : i32
    %c0_i32_1 = arith.constant 0 : i32
    return %c0_i32, %c0_i32_0 : i32, i32
  }
  func.func @transform_5(%arg0: i32, %arg1: i32) -> (i32, i32) {
    %c0_i32 = arith.constant 0 : i32
    %c0_i32_0 = arith.constant 0 : i32
    %c0_i32_1 = arith.constant 0 : i32
    return %c0_i32, %c0_i32_0 : i32, i32
  }
  func.func @transform_6(%arg0: i32, %arg1: i32) -> (i32, i32, i32) {
    %c0_i32 = arith.constant 0 : i32
    %c0_i32_0 = arith.constant 0 : i32
    %c0_i32_1 = arith.constant 0 : i32
    return %arg0, %c0_i32, %c0_i32_0 : i32, i32, i32
  }
}

module attributes {stable_mosaic.version = 11 : i64} {
  func.func @_feat_conv_kernel(%arg0: i32, %arg1: i32, %arg2: memref<1x3x16xf32, #tpu.memory_space<vmem>>, %arg3: memref<1x3x3xf32, #tpu.memory_space<vmem>>, %arg4: memref<1x64x3xf32, #tpu.memory_space<vmem>>, %arg5: memref<64x1xf32, #tpu.memory_space<vmem>>, %arg6: memref<128x64xbf16, #tpu.memory_space<vmem>>, %arg7: memref<128x1xf32, #tpu.memory_space<vmem>>, %arg8: memref<1024x128xbf16, #tpu.memory_space<vmem>>, %arg9: memref<1x3x16xf32, #tpu.memory_space<vmem>>, %arg10: memref<1x1024x1xf32, #tpu.memory_space<vmem>>, %arg11: memref<8x128xf32, #tpu.memory_space<vmem>>) attributes {dimension_semantics = [#tpu.dimension_semantics<parallel>, #tpu.dimension_semantics<arbitrary>], iteration_bounds = array<i64: 2, 1>, scalar_prefetch = 0 : i64, scratch_operands = 1 : i64, tpu.core_type = #tpu.core_type<tc>, window_params = [{transform_indices = @transform_0, window_bounds = array<i64: 1, 3, 16>}, {transform_indices = @transform_1, window_bounds = array<i64: 1, 3, 3>}, {transform_indices = @transform_2, window_bounds = array<i64: 1, 64, 3>}, {pipeline_mode = #tpu.pipeline_mode<synchronous>, transform_indices = @transform_3, window_bounds = array<i64: 64, 1>}, {pipeline_mode = #tpu.pipeline_mode<synchronous>, transform_indices = @transform_4, window_bounds = array<i64: 128, 64>}, {pipeline_mode = #tpu.pipeline_mode<synchronous>, transform_indices = @transform_5, window_bounds = array<i64: 128, 1>}, {pipeline_mode = #tpu.pipeline_mode<synchronous>, transform_indices = @transform_6, window_bounds = array<i64: 1024, 128>}, {transform_indices = @transform_7, window_bounds = array<i64: 1, 3, 16>}, {transform_indices = @transform_8, window_bounds = array<i64: 1, 1024, 1>}]} {
    %c0 = arith.constant 0 : index
    %c0_0 = arith.constant 0 : index
    %c0_1 = arith.constant 0 : index
    %0 = vector.load %arg2[%c0, %c0_0, %c0_1] : memref<1x3x16xf32, #tpu.memory_space<vmem>>, vector<1x3x16xf32>
    %1 = vector.shape_cast %0 : vector<1x3x16xf32> to vector<3x16xf32>
    %c0_2 = arith.constant 0 : index
    %c0_3 = arith.constant 0 : index
    %c0_4 = arith.constant 0 : index
    %2 = vector.load %arg3[%c0_2, %c0_3, %c0_4] : memref<1x3x3xf32, #tpu.memory_space<vmem>>, vector<1x3x3xf32>
    %3 = vector.shape_cast %2 : vector<1x3x3xf32> to vector<3x3xf32>
    %cst = arith.constant dense<0.000000e+00> : vector<3x16xf32>
    %4 = tpu.matmul %3, %1, %cst {dimension_numbers = #tpu.dot_dimension_numbers<[1], [0], [0], [1], [0, 0, 1, 1], [], []>} : vector<3x3xf32>, vector<3x16xf32>, vector<3x16xf32> -> vector<3x16xf32>
    %c0_5 = arith.constant 0 : index
    %c0_6 = arith.constant 0 : index
    %c0_7 = arith.constant 0 : index
    %5 = vector.load %arg9[%c0_5, %c0_6, %c0_7] : memref<1x3x16xf32, #tpu.memory_space<vmem>>, vector<1x3x16xf32>
    %6 = vector.shape_cast %5 : vector<1x3x16xf32> to vector<3x16xf32>
    %7 = vector.shape_cast %4 : vector<3x16xf32> to vector<1x3x16xf32>
    tpu.vector_store %arg9[%c0_5, %c0_6, %c0_7], %7 {strides = array<i32>} : memref<1x3x16xf32, #tpu.memory_space<vmem>>, vector<1x3x16xf32>,
    %c0_8 = arith.constant 0 : index
    %c0_9 = arith.constant 0 : index
    %c0_10 = arith.constant 0 : index
    %8 = vector.load %arg4[%c0_8, %c0_9, %c0_10] : memref<1x64x3xf32, #tpu.memory_space<vmem>>, vector<1x64x3xf32>
    %9 = vector.shape_cast %8 : vector<1x64x3xf32> to vector<64x3xf32>
    %cst_11 = arith.constant dense<0.000000e+00> : vector<64x16xf32>
    %10 = tpu.matmul %9, %1, %cst_11 {dimension_numbers = #tpu.dot_dimension_numbers<[1], [0], [0], [1], [0, 0, 1, 1], [], []>} : vector<64x3xf32>, vector<3x16xf32>, vector<64x16xf32> -> vector<64x16xf32>
    %c0_12 = arith.constant 0 : index
    %c0_13 = arith.constant 0 : index
    %11 = vector.load %arg5[%c0_12, %c0_13] : memref<64x1xf32, #tpu.memory_space<vmem>>, vector<64x1xf32>
    %12 = vector.broadcast %11 : vector<64x1xf32> to vector<64x16xf32>
    %13 = arith.addf %10, %12 : vector<64x16xf32>
    %cst_14 = arith.constant 0.000000e+00 : f32
    %14 = vector.broadcast %cst_14 : f32 to vector<64x16xf32>
    %15 = arith.maximumf %13, %14 : vector<64x16xf32>
    %c0_15 = arith.constant 0 : index
    %c0_16 = arith.constant 0 : index
    %16 = vector.load %arg6[%c0_15, %c0_16] : memref<128x64xbf16, #tpu.memory_space<vmem>>, vector<128x64xbf16>
    %17 = arith.truncf %15 : vector<64x16xf32> to vector<64x16xbf16>
    %cst_17 = arith.constant dense<0.000000e+00> : vector<128x16xf32>
    %18 = tpu.matmul %16, %17, %cst_17 {dimension_numbers = #tpu.dot_dimension_numbers<[1], [0], [0], [1], [0, 0, 1, 1], [], []>} : vector<128x64xbf16>, vector<64x16xbf16>, vector<128x16xf32> -> vector<128x16xf32>
    %c0_18 = arith.constant 0 : index
    %c0_19 = arith.constant 0 : index
    %19 = vector.load %arg7[%c0_18, %c0_19] : memref<128x1xf32, #tpu.memory_space<vmem>>, vector<128x1xf32>
    %20 = vector.broadcast %19 : vector<128x1xf32> to vector<128x16xf32>
    %21 = arith.addf %18, %20 : vector<128x16xf32>
    %cst_20 = arith.constant 0.000000e+00 : f32
    %22 = vector.broadcast %cst_20 : f32 to vector<128x16xf32>
    %23 = arith.maximumf %21, %22 : vector<128x16xf32>
    %c0_21 = arith.constant 0 : index
    %c0_22 = arith.constant 0 : index
    %24 = vector.load %arg8[%c0_21, %c0_22] : memref<1024x128xbf16, #tpu.memory_space<vmem>>, vector<1024x128xbf16>
    %25 = arith.truncf %23 : vector<128x16xf32> to vector<128x16xbf16>
    %cst_23 = arith.constant dense<0.000000e+00> : vector<1024x16xf32>
    %26 = tpu.matmul %24, %25, %cst_23 {dimension_numbers = #tpu.dot_dimension_numbers<[1], [0], [0], [1], [0, 0, 1, 1], [], []>} : vector<1024x128xbf16>, vector<128x16xbf16>, vector<1024x16xf32> -> vector<1024x16xf32>
    %cst_24 = arith.constant dense<0xFF800000> : vector<1024xf32>
    %27 = vector.multi_reduction <maximumf>, %26, %cst_24 [1] : vector<1024x16xf32> to vector<1024xf32>
    %28 = vector.shape_cast %27 : vector<1024xf32> to vector<1024x1xf32>
    %c0_25 = arith.constant 0 : index
    %c0_26 = arith.constant 0 : index
    %c0_27 = arith.constant 0 : index
    %29 = vector.load %arg10[%c0_25, %c0_26, %c0_27] : memref<1x1024x1xf32, #tpu.memory_space<vmem>>, vector<1x1024x1xf32>
    %30 = vector.shape_cast %29 : vector<1x1024x1xf32> to vector<1024x1xf32>
    %31 = vector.shape_cast %28 : vector<1024x1xf32> to vector<1x1024x1xf32>
    tpu.vector_store %arg10[%c0_25, %c0_26, %c0_27], %31 {strides = array<i32>} : memref<1x1024x1xf32, #tpu.memory_space<vmem>>, vector<1x1024x1xf32>,
    return
  }
  func.func @transform_0(%arg0: i32, %arg1: i32) -> (i32, i32, i32) {
    %c0_i32 = arith.constant 0 : i32
    %c0_i32_0 = arith.constant 0 : i32
    return %arg0, %c0_i32, %arg1 : i32, i32, i32
  }
  func.func @transform_1(%arg0: i32, %arg1: i32) -> (i32, i32, i32) {
    %c0_i32 = arith.constant 0 : i32
    %c0_i32_0 = arith.constant 0 : i32
    %c0_i32_1 = arith.constant 0 : i32
    return %arg0, %c0_i32, %c0_i32_0 : i32, i32, i32
  }
  func.func @transform_2(%arg0: i32, %arg1: i32) -> (i32, i32, i32) {
    %c0_i32 = arith.constant 0 : i32
    %c0_i32_0 = arith.constant 0 : i32
    %c0_i32_1 = arith.constant 0 : i32
    return %arg0, %c0_i32, %c0_i32_0 : i32, i32, i32
  }
  func.func @transform_3(%arg0: i32, %arg1: i32) -> (i32, i32) {
    %c0_i32 = arith.constant 0 : i32
    %c0_i32_0 = arith.constant 0 : i32
    %c0_i32_1 = arith.constant 0 : i32
    return %c0_i32, %c0_i32_0 : i32, i32
  }
  func.func @transform_4(%arg0: i32, %arg1: i32) -> (i32, i32) {
    %c0_i32 = arith.constant 0 : i32
    %c0_i32_0 = arith.constant 0 : i32
    %c0_i32_1 = arith.constant 0 : i32
    return %c0_i32, %c0_i32_0 : i32, i32
  }
  func.func @transform_5(%arg0: i32, %arg1: i32) -> (i32, i32) {
    %c0_i32 = arith.constant 0 : i32
    %c0_i32_0 = arith.constant 0 : i32
    %c0_i32_1 = arith.constant 0 : i32
    return %c0_i32, %c0_i32_0 : i32, i32
  }
  func.func @transform_6(%arg0: i32, %arg1: i32) -> (i32, i32) {
    %c0_i32 = arith.constant 0 : i32
    %c0_i32_0 = arith.constant 0 : i32
    %c0_i32_1 = arith.constant 0 : i32
    return %c0_i32, %c0_i32_0 : i32, i32
  }
  func.func @transform_7(%arg0: i32, %arg1: i32) -> (i32, i32, i32) {
    %c0_i32 = arith.constant 0 : i32
    %c0_i32_0 = arith.constant 0 : i32
    return %arg0, %c0_i32, %arg1 : i32, i32, i32
  }
  func.func @transform_8(%arg0: i32, %arg1: i32) -> (i32, i32, i32) {
    %c0_i32 = arith.constant 0 : i32
    %c0_i32_0 = arith.constant 0 : i32
    %c0_i32_1 = arith.constant 0 : i32
    return %arg0, %c0_i32, %c0_i32_0 : i32, i32, i32
  }
}

</mosaic_0001>

<bundles_post_ra>
// kernel: pointnetfeat_forward.2
= control target key start
LH: loop header
LB: loop body
LE: loop exit
PB: predicated region body
PF: predicated region fallthrough
CT: control target
= control target key end

     0   :  { %11 = vsyncpa [#allocation4], 0  ;;  %s4133_s0 = inlined_call_operand.vmem [shape: f32[2,3,16], index: 0, kind: input, shape index: {}]   ;;  %s4134_s1 = inlined_call_operand.hbm [shape: f32[64,3], index: 1, kind: input, shape index: {}]   ;;  %s4135_s2 = inlined_call_operand.hbm [shape: f32[64,1], index: 2, kind: input, shape index: {}]   ;;  %s4136_s3 = inlined_call_operand.vmem [shape: bf16[128,64], index: 3, kind: input, shape index: {}]   ;;  %s4137_s4 = inlined_call_operand.hbm [shape: f32[128,1], index: 4, kind: input, shape index: {}]   ;;  %s4138_s5 = inlined_call_operand.hbm [shape: bf16[1024,128], index: 5, kind: input, shape index: {}]   ;;  %s4139_s6 = inlined_call_operand.vmem [shape: f32[2,1024,1], index: 6, kind: output, shape index: {}]  }
   0x1   :  { %12 = vsyncpa [#allocation6], 0 }
   0x2   :  { %13 = vsyncpa [#allocation9], 0  ;;  %s3247_s21 = smov 0   ;;  %s3249_s22 = smov 0  }
   0x3   :  { %s3251_s23 = smov 0  }
   0x4 LB: > { %s2512_s24 = sadd.s32 4294967295, %s3201_s23   ;;  %p2514_p0 = scmp.ge.s32.totalorder %s3201_s23, 1  ;;  %s3201_s23 = sphi %s3251_s23, %s19_s23   ;;  %s3197_s22 = sphi %s3249_s22, %s4161_s22   ;;  %s3193_s21 = sphi %s3247_s21, %s4160_s21  }
   0x5   : > { %p195_p1 = scmp.lt.s32.totalorder %s3201_s23, 3  ;;  %p3265_p2 = scmp.eq.s32.totalorder %s2512_s24, 0 }
   0x6   : > { %s3203_s27 = smov [#allocation5]   ;;  %s31_s30 = sadd.s32 1, %s3197_s22 }
   0x7   : > { %s4143_s25 = scalar_select %p3265_p2, 1, 0 }
   0x8   : > { %p3269_p3 = pnand %p2514_p0, %p195_p1  ;;  %s220_s28 = sshll.u32 %s3203_s27, 4  ;;  %s3273_s28 = int_to_ptr.vmem [resolvable:$true] %s220_s28 }
   0x9   : > { %p3284_p6 = scmp.ge.s32.totalorder %s31_s30, 2  ;;  %s3204_s8 = smov [#allocation3]  }
   0xa   : > { %s4144_s26 = scalar_select %p3269_p3, 1, 0 }
   0xb   : > { %p2927_p4 = pneg %p3269_p3  ;;  %s207_s9 = sshll.u32 %s3204_s8, 4  ;;  %s208_s9 = int_to_ptr.vmem [resolvable:$true] %s207_s9 }
   0xc   : > { %s3055_s12 = scalar_lea.hbm %s4135_s2, 1024 }
   0xd   : > { %p3279_p5 = pnand %p3265_p2, %p2927_p4  ;;  %p3056_p7 = scmp.ne.s32.totalorder %s4135_s2, %s3055_s12 }
   0xe   : > { %p3062_p11 = scmp.lt.u32.totalorder %s3055_s12, %s4135_s2 }
   0xf   : > { %p3296_p8 = pneg %p3279_p5 }
  0x11   : > { %p3058_p9 = pnand %p3296_p8, %p3056_p7 }
  0x13   : > { %p3059_p10 = pneg %p3058_p9 }
  0x15   : > { %p3064_p12 = pnand %p3062_p11, %p3059_p10 }
  0x17   : > { %3067 = shalt.err (!%p3064_p12)
}
  0x18   : > { %s3068_s18 = scalar_lea.vmem %s3273_s28, 1024  ;;  %p3076_p4 = scmp.lt.s32.totalorder %s3273_s28, %s3273_s28 }
  0x19   : > { %p3069_p13 = scmp.ne.s32.totalorder %s3273_s28, %s3068_s18  ;;  %p3077_p2 = scmp.lt.s32.totalorder %s3068_s18, %s3068_s18 }
  0x1b   : > { %p3071_p0 = pnand %p3069_p13, %p3296_p8  ;;  %p3078_p7 = por %p3077_p2, %p3076_p4 }
  0x1d   : > { %p3072_p1 = pneg %p3071_p0 }
  0x1f   : > { %p3079_p9 = pnand %p3078_p7, %p3072_p1 }
  0x21   : > { %3082 = shalt.err (!%p3079_p9)
}
  0x22   : > { %s3205_s19 = smov 128   ;;  %s3206_s20 = smov 8  }
  0x23   : > { %2933 = dma.hbm_to_vmem [thread:$0]  (!%p3279_p5), %s4135_s2, 1024, %s3273_s28, [#allocation6], %s3205_s19, %s3205_s19, %s3206_s20  }
  0x24   : > { %s4163_s30 = smov (%p3284_p6, %s31_s30), 0  ;;  %s3083_s11 = scalar_lea.hbm %s4134_s1, 1024 }
  0x25   : > { %p3084_p2 = scmp.ne.s32.totalorder %s4134_s1, %s3083_s11  ;;  %p3090_p12 = scmp.lt.u32.totalorder %s3083_s11, %s4134_s1 }
  0x27   : > { %p3086_p10 = pnand %p3084_p2, %p3296_p8 }
  0x29   : > { %p3087_p11 = pneg %p3086_p10 }
  0x2b   : > { %p3092_p13 = pnand %p3090_p12, %p3087_p11 }
  0x2d   : > { %3095 = shalt.err (!%p3092_p13)
}
  0x2e   : > { %s3096_s28 = scalar_lea.vmem %s208_s9, 1024  ;;  %p3104_p4 = scmp.lt.s32.totalorder %s208_s9, %s208_s9 }
  0x2f   : > { %p3097_p6 = scmp.ne.s32.totalorder %s208_s9, %s3096_s28  ;;  %p3105_p7 = scmp.lt.s32.totalorder %s3096_s28, %s3096_s28 }
  0x31   : > { %p3099_p0 = pnand %p3097_p6, %p3296_p8  ;;  %p3106_p9 = por %p3105_p7, %p3104_p4 }
  0x33   : > { %p3100_p1 = pneg %p3099_p0 }
  0x35   : > { %p3107_p3 = pnand %p3106_p9, %p3100_p1 }
  0x37   : > { %3110 = shalt.err (!%p3107_p3)
}
  0x38   : > { %2930 = dma.hbm_to_vmem [thread:$0]  (!%p3279_p5), %s4134_s1, 1024, %s208_s9, [#allocation4], %s3205_s19, %s3205_s19, %s3206_s20  }
  0x39   : > { %s3207_s18 = smov [#allocation7]   ;;  %s3208_s27 = smov [#allocation8]  }
  0x3a   : > { %s236_s24 = sshll.u32 %s3207_s18, 4  ;;  %s249_s8 = sshll.u32 %s3208_s27, 4  ;;  %s237_s24 = int_to_ptr.vmem [resolvable:$true] %s236_s24  ;;  %s250_s8 = int_to_ptr.vmem [resolvable:$true] %s249_s8 }
  0x3b   : > { %s3111_s12 = scalar_lea.hbm %s4137_s4, 2048 }
  0x3c   : > { %p3112_p3 = scmp.ne.s32.totalorder %s4137_s4, %s3111_s12  ;;  %p3118_p11 = scmp.lt.u32.totalorder %s3111_s12, %s4137_s4 }
  0x3e   : > { %p3114_p2 = pnand %p3112_p3, %p3296_p8 }
  0x40   : > { %p3115_p10 = pneg %p3114_p2 }
  0x42   : > { %p3120_p12 = pnand %p3118_p11, %p3115_p10 }
  0x44   : > { %3123 = shalt.err (!%p3120_p12)
}
  0x45   : > { %s3124_s9 = scalar_lea.vmem %s237_s24, 2048  ;;  %p3132_p1 = scmp.lt.s32.totalorder %s237_s24, %s237_s24 }
  0x46   : > { %p3125_p13 = scmp.ne.s32.totalorder %s237_s24, %s3124_s9  ;;  %p3133_p4 = scmp.lt.s32.totalorder %s3124_s9, %s3124_s9 }
  0x48   : > { %p3127_p6 = pnand %p3125_p13, %p3296_p8  ;;  %p3134_p7 = por %p3133_p4, %p3132_p1 }
  0x4a   : > { %p3128_p0 = pneg %p3127_p6 }
  0x4c   : > { %p3135_p9 = pnand %p3134_p7, %p3128_p0 }
  0x4e   : > { %3138 = shalt.err (!%p3135_p9)
}
  0x4f   : > { %2936 = dma.hbm_to_vmem [thread:$0]  (!%p3279_p5), %s4137_s4, 2048, %s237_s24, [#allocation6], %s3205_s19, %s3205_s19, %s3206_s20  }
  0x50   : > { %s3139_s10 = scalar_lea.hbm %s4138_s5, 8192 }
  0x51   : > { %p3140_p3 = scmp.ne.s32.totalorder %s4138_s5, %s3139_s10  ;;  %p3146_p11 = scmp.lt.u32.totalorder %s3139_s10, %s4138_s5 }
  0x53   : > { %p3142_p2 = pnand %p3140_p3, %p3296_p8 }
  0x55   : > { %p3143_p10 = pneg %p3142_p2 }
  0x57   : > { %p3148_p12 = pnand %p3146_p11, %p3143_p10 }
  0x59   : > { %3151 = shalt.err (!%p3148_p12)
}
  0x5a   : > { %s3152_s16 = scalar_lea.vmem %s250_s8, 8192  ;;  %p3160_p1 = scmp.lt.s32.totalorder %s250_s8, %s250_s8 }
  0x5b   : > { %p3153_p13 = scmp.ne.s32.totalorder %s250_s8, %s3152_s16  ;;  %p3161_p4 = scmp.lt.s32.totalorder %s3152_s16, %s3152_s16 }
  0x5d   : > { %p3155_p6 = pnand %p3153_p13, %p3296_p8  ;;  %p3162_p7 = por %p3161_p4, %p3160_p1 }
  0x5f   : > { %p3156_p0 = pneg %p3155_p6 }
  0x61   : > { %p3163_p9 = pnand %p3162_p7, %p3156_p0 }
  0x63   : > { %3166 = shalt.err (!%p3163_p9)
}
  0x64   : > { %s3209_s19 = smov 64   ;;  %s3210_s20 = smov 4  }
  0x65   : > { %2939 = dma.hbm_to_vmem [thread:$0]  (!%p3279_p5), %s4138_s5, 8192, %s250_s8, [#allocation9], %s3209_s19, %s3209_s19, %s3210_s20  }
  0x66   : > { %p4148_p3 = scmp.ne.s32.totalorder %s4144_s26, 0 }
  0x68   : > { %275 = sbr.rel (%p4148_p3) target bundleno = 1226 (0x4ca), region = 44 }
  0x6f   : > { %p4149_p2 = scmp.ne.s32.totalorder %s4143_s25, 0 }
  0x71   : > { %3180 = dma.done.wait (%p4149_p2), [#allocation4], 1024  }
  0x72   : > { %3182 = vsyncadd (%p4149_p2), [#allocation4], 4294966272 }
  0x73   : > { %3184 = dma.done.wait (%p4149_p2), [#allocation6], 3072  }
  0x74   : > { %3186 = vsyncadd (%p4149_p2), [#allocation6], 4294964224 }
  0x75   : > { %3188 = dma.done.wait (%p4149_p2), [#allocation9], 8192  }
  0x76   : > { %3190 = vsyncadd (%p4149_p2), [#allocation9], 4294959104  ;;  %p319_p5 = scmp.lt.s32.totalorder %s3193_s21, 1  ;;  %v3211_v0 = vmov 0   ;;  %vm414_vm0 = vcmask 1042432   ;;  %vm389_vm1 = vcmask 23552  }
  0x77   : > { %2981 = vset.pattern.permute.xlu0 %v3211_v0  ;;  %2982 = vset.pattern.permute.xlu1 %v3211_v0  ;;  %v333_v2 = vld [vmem:[#allocation3] sm:$0xff]  ;;  %v334_v3 = vld [vmem:[#allocation3 + $0x8] sm:$0xff]  ;;  %v335_v4 = vld [vmem:[#allocation3 + $0x10] sm:$0xff]  ;;  %vm687_vm2 = vcmask 523264   ;;  %vm1890_vm3 = vcmask 130048   ;;  %vm2275_vm4 = vcmask 7168  }
  0x78   : > { %s4165_s21 = smov (!%p319_p5, %s3193_s21), 1  ;;  %2715 = vmatprep.mubr.msk.f32.mxu0 %vm389_vm1, %v333_v2  ;;  %v341_v5 = vld [vmem:[#allocation5] sm:$0xff]  ;;  %v343_v6 = vld [vmem:[#allocation5 + $0x10] sm:$0xff]  ;;  %v336_v7 = vld [vmem:[#allocation3 + $0x18] sm:$0xff] }
  0x79   : > { %s2525_s26 = sshll.u32 %s4165_s21, 2  ;;  %351 = vperm.xlu0 %2981, %v341_v5   ;;  %v337_v8 = vld [vmem:[#allocation3 + $0x20] sm:$0xff]  ;;  %361 = vperm.xlu1 %2982, %v343_v6   ;;  %v342_v9 = vld [vmem:[#allocation5 + $0x8] sm:$0xff]  ;;  %v344_v10 = vld [vmem:[#allocation5 + $0x18] sm:$0xff] }
  0x7a   : > { %s325_s8 = scalar_lea.vmem %s4133_s0, %s2525_s26  ;;  %v338_v11 = vld [vmem:[#allocation3 + $0x28] sm:$0xff]  ;;  %v339_v12 = vld [vmem:[#allocation3 + $0x30] sm:$0xff]  ;;  %v345_v13 = vld [vmem:[#allocation5 + $0x20] sm:$0xff]  ;;  %s2619_s26 = sshll.u32 %s4165_s21, 10 }
  0x7b   : > { %v332_v1 = vld [vmem:[%s325_s8] sm:$0x7]  ;;  %v340_v14 = vld [vmem:[#allocation3 + $0x38] sm:$0xff]  ;;  %v346_v15 = vld [vmem:[#allocation5 + $0x28] sm:$0xff]  ;;  %s3752_s8 = scalar_lea.vmem %s4139_s6, %s2619_s26 }
  0x7c   : > { %2713 = vmatprep.subr.msk.mxu0 %vm414_vm0, %v332_v1  ;;  %v347_v16 = vld [vmem:[#allocation5 + $0x30] sm:$0xff]  ;;  %v348_v17 = vld [vmem:[#allocation5 + $0x38] sm:$0xff]  ;;  %v551_v18 = vld [vmem:[#allocation7] sm:$0xff] }
  0x7d   : > { %2714 = vmatpush3.msk.msra.mxu0 %vm414_vm0, %v332_v1  ;;  %356 = vperm.xlu0 %2981, %v342_v9   ;;  %v552_v19 = vld [vmem:[#allocation7 + $0x8] sm:$0xff]  ;;  %v553_v20 = vld [vmem:[#allocation7 + $0x10] sm:$0xff]  ;;  %v554_v21 = vld [vmem:[#allocation7 + $0x18] sm:$0xff] }
  0x7e   : > { %2716 = vmatmul.mubr.msk.f32.vlgmr.msra.gmra.mrb[0].mxu0 %vm389_vm1, %v334_v3  ;;  %366 = vperm.xlu1 %2982, %v344_v10   ;;  %v555_v22 = vld [vmem:[#allocation7 + $0x20] sm:$0xff]  ;;  %v556_v23 = vld [vmem:[#allocation7 + $0x28] sm:$0xff]  ;;  %v557_v24 = vld [vmem:[#allocation7 + $0x30] sm:$0xff] }
  0x7f   : > { %2718 = vmatprep.mubr.msk.f32.mxu0 %vm389_vm1, %v335_v4  ;;  %v558_v25 = vld [vmem:[#allocation7 + $0x38] sm:$0xff]  ;;  %v559_v26 = vld [vmem:[#allocation7 + $0x40] sm:$0xff]  ;;  %v560_v27 = vld [vmem:[#allocation7 + $0x48] sm:$0xff] }
  0x80   : > { %v561_v28 = vld [vmem:[#allocation7 + $0x50] sm:$0xff]  ;;  %v562_v29 = vld [vmem:[#allocation7 + $0x58] sm:$0xff]  ;;  %v563_v30 = vld [vmem:[#allocation7 + $0x60] sm:$0xff] }
  0x81   : > { %371 = vperm.xlu0 %2981, %v345_v13   ;;  %v564_v31 = vld [vmem:[#allocation7 + $0x68] sm:$0xff]  ;;  %v565_v32 = vld [vmem:[#allocation7 + $0x70] sm:$0xff]  ;;  %v566_v33 = vld [vmem:[#allocation7 + $0x78] sm:$0xff] }
  0x82   : > { %2719 = vmatmul.mubr.msk.f32.gmra.mrb[2].mxu0 %vm389_vm1, %v336_v7  ;;  %376 = vperm.xlu1 %2982, %v346_v15   ;;  %v2983_v34 = vld [vmem:[%s4136_s3] sm:$0xff]   ;;  %v2984_v7 = vld [vmem:[%s4136_s3 + $0x8] sm:$0xff]   ;;  %v2986_v9 = vld [vmem:[%s4136_s3 + $0x18] sm:$0xff]  }
  0x83   : > { %2721 = vmatprep.mubr.msk.f32.mxu0 %vm389_vm1, %v337_v8  ;;  %2735 = vmatprep.mubr.msk.bf16.mxu1 %vm687_vm2, %v2983_v34  ;;  %v2985_v8 = vld [vmem:[%s4136_s3 + $0x10] sm:$0xff]   ;;  %v2987_v10 = vld [vmem:[%s4136_s3 + $0x20] sm:$0xff]   ;;  %v2990_v13 = vld [vmem:[%s4136_s3 + $0x38] sm:$0xff]  }
  0x84   : > { %v2992_v15 = vld [vmem:[#allocation8 + $0x110] sm:$0xff]  }
  0x85   : > { %381 = vperm.xlu0 %2981, %v347_v16  }
  0x86   : > { %2722 = vmatmul.mubr.msk.f32.gmra.mrb[4].mxu0 %vm389_vm1, %v338_v11  ;;  %386 = vperm.xlu1 %2982, %v348_v17   ;;  %v2988_v11 = vld [vmem:[%s4136_s3 + $0x28] sm:$0xff]  }
  0x87   : > { %2724 = vmatprep.mubr.msk.f32.mxu0 %vm389_vm1, %v339_v12  ;;  %v2989_v12 = vld [vmem:[%s4136_s3 + $0x30] sm:$0xff]  }
  0x89   : > { %569 = vperm.xlu0 %2981, %v551_v18  }
  0x8a   : > { %2725 = vmatmul.mubr.msk.f32.gmra.mrb[6].mxu0 %vm389_vm1, %v340_v14  ;;  %574 = vperm.xlu1 %2982, %v552_v19   ;;  %v2991_v14 = vld [vmem:[#allocation8] sm:$0xff]  }
  0x8b   : > { %2767 = vmatprep.mubr.bf16.mxu0 %v2991_v14 }
  0x8d   : > { %579 = vperm.xlu0 %2981, %v553_v20  }
  0x8e   : > { %584 = vperm.xlu1 %2982, %v554_v21  }
  0x91   : > { %589 = vperm.xlu0 %2981, %v555_v22  }
  0x92   : > { %594 = vperm.xlu1 %2982, %v556_v23  }
  0x95   : > { %599 = vperm.xlu0 %2981, %v557_v24  }
  0x96   : > { %604 = vperm.xlu1 %2982, %v558_v25  }
  0x99   : > { %609 = vperm.xlu0 %2981, %v559_v26  }
  0x9a   : > { %614 = vperm.xlu1 %2982, %v560_v27  }
  0x9d   : > { %619 = vperm.xlu0 %2981, %v561_v28  }
  0x9e   : > { %624 = vperm.xlu1 %2982, %v562_v29  }
  0xa1   : > { %629 = vperm.xlu0 %2981, %v563_v30  }
  0xa2   : > { %634 = vperm.xlu1 %2982, %v564_v31  }
  0xa5   : > { %639 = vperm.xlu0 %2981, %v565_v32  }
  0xa6   : > { %644 = vperm.xlu1 %2982, %v566_v33  }
  0xf8   : > { %v352_v35 = vpop.permute.xlu0 %351  ;;  %v362_v36 = vpop.permute.xlu1 %361 }
  0xfc   : > { %v357_v37 = vpop.permute.xlu0 %356 }
  0xfd   : > { %v367_v38 = vpop.permute.xlu1 %366 }
 0x100   : > { %v372_v51 = vpop.permute.xlu0 %371 }
 0x101   : > { %v377_v48 = vpop.permute.xlu1 %376 }
 0x104   : > { %v382_v63 = vpop.permute.xlu0 %381 }
 0x105   : > { %v387_v60 = vpop.permute.xlu1 %386 }
 0x108   : > { %v570_v16 = vpop.permute.xlu0 %569 }
 0x109   : > { %v575_v17 = vpop.permute.xlu1 %574 }
 0x10c   : > { %v580_v18 = vpop.permute.xlu0 %579 }
 0x10d   : > { %v585_v19 = vpop.permute.xlu1 %584 }
 0x110   : > { %v590_v20 = vpop.permute.xlu0 %589 }
 0x111   : > { %v595_v21 = vpop.permute.xlu1 %594 }
 0x114   : > { %v600_v22 = vpop.permute.xlu0 %599 }
 0x115   : > { %v605_v26 = vpop.permute.xlu1 %604 }
 0x118   : > { %v610_v34 = vpop.permute.xlu0 %609 }
 0x151   : > { %v2717_v39 = vpop.f32.mrb[0].mxu0 }
 0x152   : > { %v490_v40 = vadd.f32 %v2717_v39, %v357_v37  ;;  %v484_v41 = vpop.f32.mrb[1].mxu0 }
 0x153   : > { %v485_v42 = vadd.f32 %v484_v41, %v352_v35 }
 0x154   : > { %v524_v43 = vmax.f32 %v490_v40, 0.0 }
 0x155   : > { %v523_v44 = vmax.f32 %v485_v42, 0.0  ;;  %v2720_v45 = vpop.f32.mrb[2].mxu0 }
 0x156   : > { %v500_v46 = vadd.f32 %v2720_v45, %v367_v38  ;;  %v494_v47 = vpop.f32.mrb[3].mxu0  ;;  %v615_v38 = vpop.permute.xlu1 %614 }
 0x157   : > { %v495_v49 = vadd.f32 %v494_v47, %v362_v36  ;;  %v547_v50 = vpack.c.bf16 %v524_v43, %v523_v44  ;;  %v620_v47 = vpop.permute.xlu0 %619 }
 0x158   : > { %v526_v52 = vmax.f32 %v500_v46, 0.0 }
 0x159   : > { %v525_v53 = vmax.f32 %v495_v49, 0.0  ;;  %v2723_v54 = vpop.f32.mrb[4].mxu0  ;;  %2727 = vmatprep.subr.bf16.mxu1 %v547_v50 }
 0x15a   : > { %v510_v55 = vadd.f32 %v2723_v54, %v377_v48  ;;  %v504_v56 = vpop.f32.mrb[5].mxu0  ;;  %2728 = vmatpush3.bf16.msra.mxu1 %v547_v50 }
 0x15b   : > { %v548_v57 = vpack.c.bf16 %v526_v52, %v525_v53  ;;  %v505_v58 = vadd.f32 %v504_v56, %v372_v51  ;;  %v625_v51 = vpop.permute.xlu1 %624 }
 0x15c   : > { %v528_v59 = vmax.f32 %v510_v55, 0.0 }
 0x15d   : > { %v527_v61 = vmax.f32 %v505_v58, 0.0  ;;  %v2726_v62 = vpop.f32.mrb[6].mxu0  ;;  %2729 = vmatprep.subr.bf16.mxu1 %v548_v57 }
 0x15e   : > { %v520_v0 = vadd.f32 %v2726_v62, %v387_v60  ;;  %v514_v1 = vpop.f32.mrb[7].mxu0  ;;  %2730 = vmatpush3.bf16.msra.mxu1 %v548_v57 }
 0x15f   : > { %v549_v2 = vpack.c.bf16 %v528_v59, %v527_v61  ;;  %v515_v3 = vadd.f32 %v514_v1, %v382_v63  ;;  %v630_v59 = vpop.permute.xlu0 %629 }
 0x160   : > { %v530_v4 = vmax.f32 %v520_v0, 0.0  ;;  %v635_v0 = vpop.permute.xlu1 %634 }
 0x161   : > { %v529_v5 = vmax.f32 %v515_v3, 0.0  ;;  %2731 = vmatprep.subr.bf16.mxu1 %v549_v2 }
 0x162   : > { %2732 = vmatpush3.bf16.msra.mxu1 %v549_v2 }
 0x163   : > { %v550_v6 = vpack.c.bf16 %v530_v4, %v529_v5 }
 0x165   : > { %2733 = vmatprep.subr.bf16.mxu1 %v550_v6 }
 0x166   : > { %2734 = vmatpush3.bf16.msra.mxu1 %v550_v6 }
 0x169   : > { %2736 = vmatmul.mubr.msk.bf16.vlgmr.msra.gmra.mrb[0].mxu1 %vm687_vm2, %v2984_v7  ;;  %v640_v7 = vpop.permute.xlu0 %639 }
 0x16a   : > { %2739 = vmatprep.mubr.msk.bf16.mxu1 %vm687_vm2, %v2985_v8 }
 0x171   : > { %2740 = vmatmul.mubr.msk.bf16.gmra.mrb[4].mxu1 %vm687_vm2, %v2986_v9 }
 0x172   : > { %2743 = vmatprep.mubr.msk.bf16.mxu1 %vm687_vm2, %v2987_v10 }
 0x179   : > { %2744 = vmatmul.mubr.msk.bf16.gmra.mrb[8].mxu1 %vm687_vm2, %v2988_v11 }
 0x17a   : > { %2747 = vmatprep.mubr.msk.bf16.mxu1 %vm687_vm2, %v2989_v12  ;;  %v645_v12 = vpop.permute.xlu1 %644 }
 0x181   : > { %2748 = vmatmul.mubr.msk.bf16.gmra.mrb[12].mxu1 %vm687_vm2, %v2990_v13 }
 0x182   : > { %2835 = vmatprep.mubr.bf16.mxu1 %v2992_v15 }
 0x23c   : > { %v2737_v23 = vpop.f32.mrb[0].mxu1 }
 0x23d   : > { %v755_v24 = vadd.f32 %v2737_v23, %v580_v18  ;;  %v746_v25 = vpop.f32.mrb[1].mxu1 }
 0x23e   : > { %v747_v27 = vadd.f32 %v746_v25, %v570_v16  ;;  %v2738_v28 = vpop.f32.mrb[2].mxu1  ;;  %v2994_v25 = vld [vmem:[#allocation8 + $0x118] sm:$0xff]  }
 0x23f   : > { %v758_v29 = vadd.f32 %v2738_v28, %v585_v19  ;;  %v749_v30 = vpop.f32.mrb[3].mxu1  ;;  %v811_v32 = vmax.f32 %v755_v24, 0.0  ;;  %v2993_v24 = vld [vmem:[#allocation8 + $0x8] sm:$0xff]   ;;  %v2996_v28 = vld [vmem:[#allocation8 + $0x18] sm:$0xff]  }
 0x240   : > { %v750_v31 = vadd.f32 %v749_v30, %v575_v17  ;;  %v809_v35 = vmax.f32 %v747_v27, 0.0  ;;  %v2997_v27 = vld [vmem:[#allocation8 + $0x120] sm:$0xff]  }
 0x241   : > { %v812_v33 = vmax.f32 %v758_v29, 0.0  ;;  %v2998_v29 = vld [vmem:[#allocation8 + $0x128] sm:$0xff]   ;;  %v2999_v30 = vld [vmem:[#allocation8 + $0x20] sm:$0xff]  }
 0x242   : > { %v810_v36 = vmax.f32 %v750_v31, 0.0  ;;  %v3001_v31 = vld [vmem:[#allocation8 + $0x130] sm:$0xff]  }
 0x243   : > { %v954_v37 = vpack.c.bf16 %v812_v33, %v811_v32  ;;  %v3000_v32 = vld [vmem:[#allocation8 + $0x28] sm:$0xff]   ;;  %v3002_v33 = vld [vmem:[#allocation8 + $0x138] sm:$0xff]  }
 0x244   : > { %v953_v39 = vpack.c.bf16 %v810_v36, %v809_v35  ;;  %v2741_v40 = vpop.f32.mrb[4].mxu1  ;;  %v3005_v35 = vld [vmem:[#allocation8 + $0x140] sm:$0xff]   ;;  %v3004_v36 = vld [vmem:[#allocation8 + $0x38] sm:$0xff]  }
 0x245   : > { %v771_v41 = vadd.f32 %v2741_v40, %v600_v22  ;;  %v762_v42 = vpop.f32.mrb[5].mxu1  ;;  %v3008_v40 = vld [vmem:[#allocation8 + $0x48] sm:$0xff]  }
 0x246   : > { %v763_v43 = vadd.f32 %v762_v42, %v590_v20  ;;  %v2742_v44 = vpop.f32.mrb[6].mxu1  ;;  %2751 = vmatprep.subr.bf16.mxu0 %v953_v39  ;;  %2895 = vmatprep.subr.bf16.mxu1 %v953_v39  ;;  %v3011_v42 = vld [vmem:[#allocation8 + $0x50] sm:$0xff]  }
 0x247   : > { %v774_v45 = vadd.f32 %v2742_v44, %v605_v26  ;;  %v765_v46 = vpop.f32.mrb[7].mxu1  ;;  %2752 = vmatpush3.bf16.msra.mxu0 %v953_v39  ;;  %2903 = vmatpush3.bf16.msra.mxu1 %v953_v39  ;;  %v815_v49 = vmax.f32 %v771_v41, 0.0  ;;  %v2995_v26 = vld [vmem:[#allocation8 + $0x10] sm:$0xff]   ;;  %v3010_v41 = vld [vmem:[#allocation8 + $0x158] sm:$0xff]  }
 0x248   : > { %v766_v48 = vadd.f32 %v765_v46, %v595_v21  ;;  %2753 = vmatprep.subr.bf16.mxu0 %v954_v37  ;;  %2896 = vmatprep.subr.bf16.mxu1 %v954_v37  ;;  %v813_v52 = vmax.f32 %v763_v43, 0.0  ;;  %v3009_v39 = vld [vmem:[#allocation8 + $0x150] sm:$0xff]   ;;  %v3013_v43 = vld [vmem:[#allocation8 + $0x160] sm:$0xff]   ;;  %v3012_v44 = vld [vmem:[#allocation8 + $0x58] sm:$0xff]  }
 0x249   : > { %v816_v50 = vmax.f32 %v774_v45, 0.0  ;;  %v3014_v45 = vld [vmem:[#allocation8 + $0x168] sm:$0xff]   ;;  %v3015_v46 = vld [vmem:[#allocation8 + $0x60] sm:$0xff]  }
 0x24a   : > { %v814_v53 = vmax.f32 %v766_v48, 0.0  ;;  %v3016_v48 = vld [vmem:[#allocation8 + $0x68] sm:$0xff]  }
 0x24b   : > { %v956_v54 = vpack.c.bf16 %v816_v50, %v815_v49  ;;  %2754 = vmatpush3.bf16.msra.mxu0 %v954_v37  ;;  %2904 = vmatpush3.bf16.msra.mxu1 %v954_v37  ;;  %v3006_v37 = vld [vmem:[#allocation8 + $0x148] sm:$0xff]   ;;  %v3018_v49 = vld [vmem:[#allocation8 + $0x178] sm:$0xff]   ;;  %v3019_v50 = vld [vmem:[#allocation8 + $0x70] sm:$0xff]  }
 0x24c   : > { %v955_v55 = vpack.c.bf16 %v814_v53, %v813_v52  ;;  %v2745_v56 = vpop.f32.mrb[8].mxu1  ;;  %v3020_v52 = vld [vmem:[#allocation8 + $0x78] sm:$0xff]   ;;  %v3022_v53 = vld [vmem:[#allocation8 + $0x188] sm:$0xff]  }
 0x24d   : > { %v787_v57 = vadd.f32 %v2745_v56, %v620_v47  ;;  %v778_v58 = vpop.f32.mrb[9].mxu1  ;;  %v3017_v47 = vld [vmem:[#allocation8 + $0x170] sm:$0xff]   ;;  %v3024_v56 = vld [vmem:[#allocation8 + $0x88] sm:$0xff]  }
 0x24e   : > { %v779_v60 = vadd.f32 %v778_v58, %v610_v34  ;;  %v2746_v61 = vpop.f32.mrb[10].mxu1  ;;  %2755 = vmatprep.subr.bf16.mxu0 %v955_v55  ;;  %2897 = vmatprep.subr.bf16.mxu1 %v955_v55  ;;  %v3003_v34 = vld [vmem:[#allocation8 + $0x30] sm:$0xff]  }
 0x24f   : > { %v790_v62 = vadd.f32 %v2746_v61, %v625_v51  ;;  %v781_v63 = vpop.f32.mrb[11].mxu1  ;;  %2756 = vmatpush3.bf16.msra.mxu0 %v955_v55  ;;  %2905 = vmatpush3.bf16.msra.mxu1 %v955_v55  ;;  %v819_v2 = vmax.f32 %v787_v57, 0.0  ;;  %v3021_v51 = vld [vmem:[#allocation8 + $0x180] sm:$0xff]   ;;  %v3025_v55 = vld [vmem:[#allocation8 + $0x190] sm:$0xff]   ;;  %v3026_v57 = vld [vmem:[#allocation8 + $0x198] sm:$0xff]  }
 0x250   : > { %v782_v1 = vadd.f32 %v781_v63, %v615_v38  ;;  %2757 = vmatprep.subr.bf16.mxu0 %v956_v54  ;;  %2898 = vmatprep.subr.bf16.mxu1 %v956_v54  ;;  %v817_v4 = vmax.f32 %v779_v60, 0.0  ;;  %v3007_v38 = vld [vmem:[#allocation8 + $0x40] sm:$0xff]   ;;  %v3027_v58 = vld [vmem:[#allocation8 + $0x90] sm:$0xff]   ;;  %v3028_v60 = vld [vmem:[#allocation8 + $0x98] sm:$0xff]  }
 0x251   : > { %v820_v3 = vmax.f32 %v790_v62, 0.0  ;;  %v3030_v61 = vld [vmem:[#allocation8 + $0x1a8] sm:$0xff]   ;;  %v3031_v62 = vld [vmem:[#allocation8 + $0xa0] sm:$0xff]   ;;  %v3033_v63 = vld [vmem:[#allocation8 + $0x1b0] sm:$0xff]  }
 0x252   : > { %v818_v5 = vmax.f32 %v782_v1, 0.0  ;;  %v3034_v1 = vld [vmem:[#allocation8 + $0x1b8] sm:$0xff]  }
 0x253   : > { %v958_v6 = vpack.c.bf16 %v820_v3, %v819_v2  ;;  %2758 = vmatpush3.bf16.msra.mxu0 %v956_v54  ;;  %2906 = vmatpush3.bf16.msra.mxu1 %v956_v54  ;;  %v3023_v54 = vld [vmem:[#allocation8 + $0x80] sm:$0xff]   ;;  %v3035_v2 = vld [vmem:[#allocation8 + $0xb0] sm:$0xff]  }
 0x254   : > { %v957_v8 = vpack.c.bf16 %v818_v5, %v817_v4  ;;  %v2749_v9 = vpop.f32.mrb[12].mxu1  ;;  %v3037_v3 = vld [vmem:[#allocation8 + $0x1c0] sm:$0xff]   ;;  %v3036_v4 = vld [vmem:[#allocation8 + $0xb8] sm:$0xff]   ;;  %v3038_v5 = vld [vmem:[#allocation8 + $0x1c8] sm:$0xff]  }
 0x255   : > { %v803_v10 = vadd.f32 %v2749_v9, %v640_v7  ;;  %v794_v11 = vpop.f32.mrb[13].mxu1  ;;  %v3041_v7 = vld [vmem:[#allocation8 + $0x1d0] sm:$0xff]   ;;  %v3042_v9 = vld [vmem:[#allocation8 + $0x1d8] sm:$0xff]  }
 0x256   : > { %v795_v13 = vadd.f32 %v794_v11, %v630_v59  ;;  %v2750_v14 = vpop.f32.mrb[14].mxu1  ;;  %2759 = vmatprep.subr.bf16.mxu0 %v957_v8  ;;  %2899 = vmatprep.subr.bf16.mxu1 %v957_v8  ;;  %v3029_v59 = vld [vmem:[#allocation8 + $0x1a0] sm:$0xff]  }
 0x257   : > { %v806_v15 = vadd.f32 %v2750_v14, %v645_v12  ;;  %v797_v16 = vpop.f32.mrb[15].mxu1  ;;  %2760 = vmatpush3.bf16.msra.mxu0 %v957_v8  ;;  %2907 = vmatpush3.bf16.msra.mxu1 %v957_v8  ;;  %v823_v18 = vmax.f32 %v803_v10, 0.0  ;;  %v3040_v8 = vld [vmem:[#allocation8 + $0xc8] sm:$0xff]   ;;  %v3043_v10 = vld [vmem:[#allocation8 + $0xd0] sm:$0xff]   ;;  %v3045_v11 = vld [vmem:[#allocation8 + $0x1e0] sm:$0xff]  }
 0x258   : > { %v798_v17 = vadd.f32 %v797_v16, %v635_v0  ;;  %2761 = vmatprep.subr.bf16.mxu0 %v958_v6  ;;  %2900 = vmatprep.subr.bf16.mxu1 %v958_v6  ;;  %v821_v20 = vmax.f32 %v795_v13, 0.0  ;;  %v3032_v0 = vld [vmem:[#allocation8 + $0xa8] sm:$0xff]   ;;  %v3044_v12 = vld [vmem:[#allocation8 + $0xd8] sm:$0xff]   ;;  %v3047_v14 = vld [vmem:[#allocation8 + $0xe0] sm:$0xff]  }
 0x259   : > { %v824_v19 = vmax.f32 %v806_v15, 0.0  ;;  %v3046_v13 = vld [vmem:[#allocation8 + $0x1e8] sm:$0xff]   ;;  %v3049_v15 = vld [vmem:[#allocation8 + $0x1f0] sm:$0xff]  }
 0x25a   : > { %v822_v21 = vmax.f32 %v798_v17, 0.0  ;;  %v3048_v16 = vld [vmem:[#allocation8 + $0xe8] sm:$0xff]   ;;  %v3050_v17 = vld [vmem:[#allocation8 + $0x1f8] sm:$0xff]  }
 0x25b   : > { %v960_v22 = vpack.c.bf16 %v824_v19, %v823_v18  ;;  %2762 = vmatpush3.bf16.msra.mxu0 %v958_v6  ;;  %2908 = vmatpush3.bf16.msra.mxu1 %v958_v6  ;;  %v3039_v6 = vld [vmem:[#allocation8 + $0xc0] sm:$0xff]   ;;  %v3051_v18 = vld [vmem:[#allocation8 + $0xf0] sm:$0xff]   ;;  %v3052_v19 = vld [vmem:[#allocation8 + $0xf8] sm:$0xff]  }
 0x25c   : > { %v959_v23 = vpack.c.bf16 %v822_v21, %v821_v20  ;;  %v3053_v20 = vld [vmem:[#allocation8 + $0x100] sm:$0xff]   ;;  %v3054_v21 = vld [vmem:[#allocation8 + $0x108] sm:$0xff]  }
 0x25e   : > { %2763 = vmatprep.subr.bf16.mxu0 %v959_v23  ;;  %2901 = vmatprep.subr.bf16.mxu1 %v959_v23 }
 0x25f   : > { %2764 = vmatpush3.bf16.msra.mxu0 %v959_v23  ;;  %2909 = vmatpush3.bf16.msra.mxu1 %v959_v23 }
 0x260   : > { %2765 = vmatprep.subr.bf16.mxu0 %v960_v22  ;;  %2902 = vmatprep.subr.bf16.mxu1 %v960_v22 }
 0x263   : > { %2766 = vmatpush3.bf16.msra.mxu0 %v960_v22  ;;  %2910 = vmatpush3.bf16.msra.mxu1 %v960_v22 }
 0x266   : > { %2768 = vmatmul.mubr.bf16.vlgmr.msra.gmra.mrb[8].mxu0 %v2993_v24  ;;  %2836 = vmatmul.mubr.bf16.vlgmr.msra.gmra.mrb[16].mxu1 %v2994_v25 }
 0x267   : > { %2771 = vmatprep.mubr.bf16.mxu0 %v2995_v26  ;;  %2839 = vmatprep.mubr.bf16.mxu1 %v2997_v27 }
 0x26e   : > { %2772 = vmatmul.mubr.bf16.gmra.mrb[12].mxu0 %v2996_v28  ;;  %2840 = vmatmul.mubr.bf16.gmra.mrb[20].mxu1 %v2998_v29 }
 0x26f   : > { %2775 = vmatprep.mubr.bf16.mxu0 %v2999_v30  ;;  %2843 = vmatprep.mubr.bf16.mxu1 %v3001_v31 }
 0x276   : > { %2776 = vmatmul.mubr.bf16.gmra.mrb[16].mxu0 %v3000_v32  ;;  %2844 = vmatmul.mubr.bf16.gmra.mrb[24].mxu1 %v3002_v33 }
 0x277   : > { %2779 = vmatprep.mubr.bf16.mxu0 %v3003_v34  ;;  %2847 = vmatprep.mubr.bf16.mxu1 %v3005_v35 }
 0x27e   : > { %2780 = vmatmul.mubr.bf16.gmra.mrb[20].mxu0 %v3004_v36  ;;  %2848 = vmatmul.mubr.bf16.gmra.mrb[28].mxu1 %v3006_v37 }
 0x27f   : > { %2783 = vmatprep.mubr.bf16.mxu0 %v3007_v38  ;;  %2851 = vmatprep.mubr.bf16.mxu1 %v3009_v39 }
 0x286   : > { %2784 = vmatmul.mubr.bf16.gmra.mrb[24].mxu0 %v3008_v40  ;;  %2852 = vmatmul.mubr.bf16.gmra.mrb[32].mxu1 %v3010_v41 }
 0x287   : > { %2787 = vmatprep.mubr.bf16.mxu0 %v3011_v42  ;;  %2855 = vmatprep.mubr.bf16.mxu1 %v3013_v43 }
 0x28e   : > { %2788 = vmatmul.mubr.bf16.gmra.mrb[28].mxu0 %v3012_v44  ;;  %2856 = vmatmul.mubr.bf16.gmra.mrb[36].mxu1 %v3014_v45 }
 0x28f   : > { %2791 = vmatprep.mubr.bf16.mxu0 %v3015_v46  ;;  %2859 = vmatprep.mubr.bf16.mxu1 %v3017_v47 }
 0x296   : > { %2792 = vmatmul.mubr.bf16.gmra.mrb[32].mxu0 %v3016_v48  ;;  %2860 = vmatmul.mubr.bf16.gmra.mrb[40].mxu1 %v3018_v49 }
 0x297   : > { %2795 = vmatprep.mubr.bf16.mxu0 %v3019_v50  ;;  %2863 = vmatprep.mubr.bf16.mxu1 %v3021_v51 }
 0x29e   : > { %2796 = vmatmul.mubr.bf16.gmra.mrb[36].mxu0 %v3020_v52  ;;  %2864 = vmatmul.mubr.bf16.gmra.mrb[44].mxu1 %v3022_v53 }
 0x29f   : > { %2799 = vmatprep.mubr.bf16.mxu0 %v3023_v54  ;;  %2867 = vmatprep.mubr.bf16.mxu1 %v3025_v55 }
 0x2a6   : > { %2800 = vmatmul.mubr.bf16.gmra.mrb[40].mxu0 %v3024_v56  ;;  %2868 = vmatmul.mubr.bf16.gmra.mrb[48].mxu1 %v3026_v57 }
 0x2a7   : > { %2803 = vmatprep.mubr.bf16.mxu0 %v3027_v58  ;;  %2871 = vmatprep.mubr.bf16.mxu1 %v3029_v59 }
 0x2ae   : > { %2804 = vmatmul.mubr.bf16.gmra.mrb[44].mxu0 %v3028_v60  ;;  %2872 = vmatmul.mubr.bf16.gmra.mrb[52].mxu1 %v3030_v61 }
 0x2af   : > { %2807 = vmatprep.mubr.bf16.mxu0 %v3031_v62  ;;  %2875 = vmatprep.mubr.bf16.mxu1 %v3033_v63 }
 0x2b6   : > { %2808 = vmatmul.mubr.bf16.gmra.mrb[48].mxu0 %v3032_v0  ;;  %2876 = vmatmul.mubr.bf16.gmra.mrb[56].mxu1 %v3034_v1 }
 0x2b7   : > { %2811 = vmatprep.mubr.bf16.mxu0 %v3035_v2  ;;  %2879 = vmatprep.mubr.bf16.mxu1 %v3037_v3 }
 0x2be   : > { %2812 = vmatmul.mubr.bf16.gmra.mrb[52].mxu0 %v3036_v4  ;;  %2880 = vmatmul.mubr.bf16.gmra.mrb[60].mxu1 %v3038_v5 }
 0x2bf   : > { %2815 = vmatprep.mubr.bf16.mxu0 %v3039_v6  ;;  %2883 = vmatprep.mubr.bf16.mxu1 %v3041_v7 }
 0x2c6   : > { %2816 = vmatmul.mubr.bf16.gmra.mrb[56].mxu0 %v3040_v8  ;;  %2884 = vmatmul.mubr.bf16.gmra.mrb[64].mxu1 %v3042_v9 }
 0x2c7   : > { %2819 = vmatprep.mubr.bf16.mxu0 %v3043_v10  ;;  %2887 = vmatprep.mubr.bf16.mxu1 %v3045_v11 }
 0x2ce   : > { %2820 = vmatmul.mubr.bf16.gmra.mrb[60].mxu0 %v3044_v12  ;;  %2888 = vmatmul.mubr.bf16.gmra.mrb[68].mxu1 %v3046_v13 }
 0x2cf   : > { %2823 = vmatprep.mubr.bf16.mxu0 %v3047_v14  ;;  %2891 = vmatprep.mubr.bf16.mxu1 %v3049_v15 }
 0x2d6   : > { %2824 = vmatmul.mubr.bf16.gmra.mrb[64].mxu0 %v3048_v16  ;;  %2892 = vmatmul.mubr.bf16.gmra.mrb[72].mxu1 %v3050_v17 }
 0x2d7   : > { %2827 = vmatprep.mubr.bf16.mxu0 %v3051_v18 }
 0x2de   : > { %2828 = vmatmul.mubr.bf16.gmra.mrb[68].mxu0 %v3052_v19 }
 0x2df   : > { %2831 = vmatprep.mubr.bf16.mxu0 %v3053_v20 }
 0x2e6   : > { %2832 = vmatmul.mubr.bf16.gmra.mrb[72].mxu0 %v3054_v21 }
 0x339   : > { %v2769_v22 = vpop.f32.mrb[8].mxu0  ;;  %v2837_v23 = vpop.f32.mrb[16].mxu1 }
 0x33a   : > { %v1379_v24 = vpop.f32.mrb[9].mxu0  ;;  %v2101_v25 = vsel %vm1890_vm3, %v2837_v23, -inf  ;;  %v1897_v26 = vsel %vm1890_vm3, %v2769_v22, -inf  ;;  %v1651_v27 = vpop.f32.mrb[17].mxu1 }
 0x33b   : > { %2102 = vmax.xlane.f32.xlu1 %v2101_v25  ;;  %1898 = vmax.xlane.f32.xlu0 %v1897_v26  ;;  %v2770_v28 = vpop.f32.mrb[10].mxu0  ;;  %v2838_v29 = vpop.f32.mrb[18].mxu1  ;;  %v2095_v31 = vsel %vm1890_vm3, %v1651_v27, -inf  ;;  %v1891_v33 = vsel %vm1890_vm3, %v1379_v24, -inf }
 0x33c   : > { %v1382_v30 = vpop.f32.mrb[11].mxu0  ;;  %v1654_v32 = vpop.f32.mrb[19].mxu1  ;;  %v1900_v36 = vsel %vm1890_vm3, %v2770_v28, -inf  ;;  %v2104_v45 = vsel %vm1890_vm3, %v2838_v29, -inf }
 0x33d   : > { %v1894_v37 = vsel %vm1890_vm3, %v1382_v30, -inf  ;;  %v2098_v49 = vsel %vm1890_vm3, %v1654_v32, -inf }
 0x33f   : > { %2096 = vmax.xlane.f32.xlu1 %v2095_v31  ;;  %1892 = vmax.xlane.f32.xlu0 %v1891_v33 }
 0x341   : > { %v2773_v34 = vpop.f32.mrb[12].mxu0  ;;  %v2841_v35 = vpop.f32.mrb[20].mxu1 }
 0x342   : > { %v1395_v38 = vpop.f32.mrb[13].mxu0  ;;  %v1667_v39 = vpop.f32.mrb[21].mxu1  ;;  %v1909_v42 = vsel %vm1890_vm3, %v2773_v34, -inf  ;;  %v2113_v46 = vsel %vm1890_vm3, %v2841_v35, -inf }
 0x343   : > { %1901 = vmax.xlane.f32.xlu0 %v1900_v36  ;;  %1895 = vmax.xlane.f32.xlu1 %v1894_v37  ;;  %v2774_v40 = vpop.f32.mrb[14].mxu0  ;;  %v2842_v41 = vpop.f32.mrb[22].mxu1  ;;  %v1903_v56 = vsel %vm1890_vm3, %v1395_v38, -inf  ;;  %v2107_v60 = vsel %vm1890_vm3, %v1667_v39, -inf }
 0x344   : > { %v1398_v43 = vpop.f32.mrb[15].mxu0  ;;  %v1670_v44 = vpop.f32.mrb[23].mxu1  ;;  %v1912_v57 = vsel %vm1890_vm3, %v2774_v40, -inf  ;;  %v2116_v61 = vsel %vm1890_vm3, %v2842_v41, -inf }
 0x345   : > { %v1906_v5 = vsel %vm1890_vm3, %v1398_v43, -inf  ;;  %v2110_v9 = vsel %vm1890_vm3, %v1670_v44, -inf }
 0x347   : > { %2105 = vmax.xlane.f32.xlu0 %v2104_v45  ;;  %1910 = vmax.xlane.f32.xlu1 %v1909_v42 }
 0x349   : > { %v2777_v47 = vpop.f32.mrb[16].mxu0  ;;  %v2845_v48 = vpop.f32.mrb[24].mxu1 }
 0x34a   : > { %v1411_v50 = vpop.f32.mrb[17].mxu0  ;;  %v1683_v51 = vpop.f32.mrb[25].mxu1  ;;  %v1921_v2 = vsel %vm1890_vm3, %v2777_v47, -inf  ;;  %v2125_v6 = vsel %vm1890_vm3, %v2845_v48, -inf }
 0x34b   : > { %2099 = vmax.xlane.f32.xlu0 %v2098_v49  ;;  %2114 = vmax.xlane.f32.xlu1 %v2113_v46  ;;  %v2778_v52 = vpop.f32.mrb[18].mxu0  ;;  %v2846_v53 = vpop.f32.mrb[26].mxu1  ;;  %v1915_v16 = vsel %vm1890_vm3, %v1411_v50, -inf  ;;  %v2119_v20 = vsel %vm1890_vm3, %v1683_v51, -inf }
 0x34c   : > { %v1414_v54 = vpop.f32.mrb[19].mxu0  ;;  %v1686_v55 = vpop.f32.mrb[27].mxu1  ;;  %v1924_v17 = vsel %vm1890_vm3, %v2778_v52, -inf  ;;  %v2128_v21 = vsel %vm1890_vm3, %v2846_v53, -inf }
 0x34d   : > { %v1918_v29 = vsel %vm1890_vm3, %v1414_v54, -inf  ;;  %v2122_v33 = vsel %vm1890_vm3, %v1686_v55, -inf }
 0x34f   : > { %1904 = vmax.xlane.f32.xlu1 %v1903_v56  ;;  %1913 = vmax.xlane.f32.xlu0 %v1912_v57 }
 0x351   : > { %v2781_v58 = vpop.f32.mrb[20].mxu0  ;;  %v2849_v59 = vpop.f32.mrb[28].mxu1 }
 0x352   : > { %v1427_v62 = vpop.f32.mrb[21].mxu0  ;;  %v1699_v63 = vpop.f32.mrb[29].mxu1  ;;  %v1933_v26 = vsel %vm1890_vm3, %v2781_v58, -inf  ;;  %v2137_v30 = vsel %vm1890_vm3, %v2849_v59, -inf }
 0x353   : > { %2108 = vmax.xlane.f32.xlu1 %v2107_v60  ;;  %2117 = vmax.xlane.f32.xlu0 %v2116_v61  ;;  %v2782_v0 = vpop.f32.mrb[22].mxu0  ;;  %v2850_v1 = vpop.f32.mrb[30].mxu1  ;;  %v1927_v40 = vsel %vm1890_vm3, %v1427_v62, -inf  ;;  %v2131_v44 = vsel %vm1890_vm3, %v1699_v63, -inf }
 0x354   : > { %v3461_v3 = vpop.f32.mrb[23].mxu0  ;;  %v3463_v4 = vpop.f32.mrb[31].mxu1  ;;  %v1936_v41 = vsel %vm1890_vm3, %v2782_v0, -inf  ;;  %v2140_v45 = vsel %vm1890_vm3, %v2850_v1, -inf }
 0x355   : > { %v1930_v53 = vsel %vm1890_vm3, %v3461_v3, -inf  ;;  %v2134_v57 = vsel %vm1890_vm3, %v3463_v4, -inf }
 0x357   : > { %1907 = vmax.xlane.f32.xlu0 %v1906_v5  ;;  %1922 = vmax.xlane.f32.xlu1 %v1921_v2 }
 0x359   : > { %v2785_v7 = vpop.f32.mrb[24].mxu0  ;;  %v2853_v8 = vpop.f32.mrb[32].mxu1 }
 0x35a   : > { %v3468_v10 = vpop.f32.mrb[25].mxu0  ;;  %v3470_v11 = vpop.f32.mrb[33].mxu1  ;;  %v1945_v50 = vsel %vm1890_vm3, %v2785_v7, -inf  ;;  %v2149_v54 = vsel %vm1890_vm3, %v2853_v8, -inf }
 0x35b   : > { %2111 = vmax.xlane.f32.xlu0 %v2110_v9  ;;  %2126 = vmax.xlane.f32.xlu1 %v2125_v6  ;;  %v3472_v12 = vpop.f32.mrb[26].mxu0  ;;  %v3474_v13 = vpop.f32.mrb[34].mxu1  ;;  %v1939_v0 = vsel %vm1890_vm3, %v3468_v10, -inf  ;;  %v2143_v4 = vsel %vm1890_vm3, %v3470_v11, -inf }
 0x35c   : > { %v3476_v14 = vpop.f32.mrb[27].mxu0  ;;  %v3478_v15 = vpop.f32.mrb[35].mxu1  ;;  %v1948_v1 = vsel %vm1890_vm3, %v3472_v12, -inf  ;;  %v2152_v5 = vsel %vm1890_vm3, %v3474_v13, -inf }
 0x35d   : > { %v1942_v11 = vsel %vm1890_vm3, %v3476_v14, -inf }
 0x35f   : > { %1916 = vmax.xlane.f32.xlu1 %v1915_v16  ;;  %1925 = vmax.xlane.f32.xlu0 %v1924_v17 }
 0x361   : > { %v3482_v18 = vpop.f32.mrb[28].mxu0  ;;  %v3484_v19 = vpop.f32.mrb[36].mxu1 }
 0x362   : > { %v3488_v22 = vpop.f32.mrb[29].mxu0  ;;  %v3490_v23 = vpop.f32.mrb[37].mxu1  ;;  %v1957_v10 = vsel %vm1890_vm3, %v3482_v18, -inf  ;;  %v2161_v13 = vsel %vm1890_vm3, %v3484_v19, -inf }
 0x363   : > { %2120 = vmax.xlane.f32.xlu1 %v2119_v20  ;;  %2129 = vmax.xlane.f32.xlu0 %v2128_v21  ;;  %v3492_v24 = vpop.f32.mrb[30].mxu0  ;;  %v3494_v25 = vpop.f32.mrb[38].mxu1  ;;  %v2146_v21 = vsel %vm1890_vm3, %v3478_v15, -inf }
 0x364   : > { %v3497_v27 = vpop.f32.mrb[31].mxu0  ;;  %v3499_v28 = vpop.f32.mrb[39].mxu1  ;;  %v1960_v15 = vsel %vm1890_vm3, %v3492_v24, -inf }
 0x367   : > { %1919 = vmax.xlane.f32.xlu0 %v1918_v29  ;;  %1934 = vmax.xlane.f32.xlu1 %v1933_v26 }
 0x369   : > { %v3503_v31 = vpop.f32.mrb[32].mxu0  ;;  %v3505_v32 = vpop.f32.mrb[40].mxu1 }
 0x36a   : > { %v3508_v34 = vpop.f32.mrb[33].mxu0  ;;  %v3510_v35 = vpop.f32.mrb[41].mxu1 }
 0x36b   : > { %2123 = vmax.xlane.f32.xlu0 %v2122_v33  ;;  %2138 = vmax.xlane.f32.xlu1 %v2137_v30  ;;  %v3512_v36 = vpop.f32.mrb[34].mxu0  ;;  %v3514_v37 = vpop.f32.mrb[42].mxu1  ;;  %v1951_v33 = vsel %vm1890_vm3, %v3488_v22, -inf }
 0x36c   : > { %v3516_v38 = vpop.f32.mrb[35].mxu0  ;;  %v3518_v39 = vpop.f32.mrb[43].mxu1 }
 0x36f   : > { %1928 = vmax.xlane.f32.xlu1 %v1927_v40  ;;  %1937 = vmax.xlane.f32.xlu0 %v1936_v41 }
 0x371   : > { %v3522_v42 = vpop.f32.mrb[36].mxu0  ;;  %v3524_v43 = vpop.f32.mrb[44].mxu1 }
 0x372   : > { %v3528_v46 = vpop.f32.mrb[37].mxu0  ;;  %v3530_v47 = vpop.f32.mrb[45].mxu1 }
 0x373   : > { %2132 = vmax.xlane.f32.xlu1 %v2131_v44  ;;  %2141 = vmax.xlane.f32.xlu0 %v2140_v45  ;;  %v3532_v48 = vpop.f32.mrb[38].mxu0  ;;  %v3534_v49 = vpop.f32.mrb[46].mxu1  ;;  %v2155_v44 = vsel %vm1890_vm3, %v3490_v23, -inf  ;;  %v2164_v45 = vsel %vm1890_vm3, %v3494_v25, -inf  ;;  %v1954_v23 = vsel %vm1890_vm3, %v3497_v27, -inf  ;;  %v2173_v25 = vsel %vm1890_vm3, %v3505_v32, -inf }
 0x374   : > { %v3537_v51 = vpop.f32.mrb[39].mxu0  ;;  %v3539_v52 = vpop.f32.mrb[47].mxu1 }
 0x377   : > { %1931 = vmax.xlane.f32.xlu0 %v1930_v53  ;;  %1946 = vmax.xlane.f32.xlu1 %v1945_v50 }
 0x379   : > { %v3544_v55 = vpop.f32.mrb[40].mxu0  ;;  %v3546_v56 = vpop.f32.mrb[48].mxu1 }
 0x37a   : > { %v3550_v58 = vpop.f32.mrb[41].mxu0  ;;  %v3552_v59 = vpop.f32.mrb[49].mxu1 }
 0x37b   : > { %2135 = vmax.xlane.f32.xlu0 %v2134_v57  ;;  %2150 = vmax.xlane.f32.xlu1 %v2149_v54  ;;  %v3554_v60 = vpop.f32.mrb[42].mxu0  ;;  %v3556_v61 = vpop.f32.mrb[50].mxu1  ;;  %v1969_v54 = vsel %vm1890_vm3, %v3503_v31, -inf }
 0x37c   : > { %v3558_v62 = vpop.f32.mrb[43].mxu0  ;;  %v3560_v63 = vpop.f32.mrb[51].mxu1 }
 0x37f   : > { %1940 = vmax.xlane.f32.xlu1 %v1939_v0  ;;  %1949 = vmax.xlane.f32.xlu0 %v1948_v1 }
 0x381   : > { %v3566_v2 = vpop.f32.mrb[44].mxu0  ;;  %v3568_v3 = vpop.f32.mrb[52].mxu1 }
 0x382   : > { %v3574_v6 = vpop.f32.mrb[45].mxu0  ;;  %v3576_v7 = vpop.f32.mrb[53].mxu1 }
 0x383   : > { %2144 = vmax.xlane.f32.xlu1 %v2143_v4  ;;  %2153 = vmax.xlane.f32.xlu0 %v2152_v5  ;;  %v3578_v8 = vpop.f32.mrb[46].mxu0  ;;  %v3580_v9 = vpop.f32.mrb[54].mxu1  ;;  %v2158_v5 = vsel %vm1890_vm3, %v3499_v28, -inf  ;;  %v1972_v28 = vsel %vm1890_vm3, %v3512_v36, -inf }
 0x384   : > { %v3584_v12 = vpop.f32.mrb[47].mxu0  ;;  %v3586_v16 = vpop.f32.mrb[55].mxu1 }
 0x387   : > { %1943 = vmax.xlane.f32.xlu0 %v1942_v11  ;;  %1958 = vmax.xlane.f32.xlu1 %v1957_v10 }
 0x389   : > { %v3592_v17 = vpop.f32.mrb[48].mxu0  ;;  %v3594_v20 = vpop.f32.mrb[56].mxu1 }
 0x38a   : > { %v3598_v18 = vpop.f32.mrb[49].mxu0  ;;  %v3600_v26 = vpop.f32.mrb[57].mxu1 }
 0x38b   : > { %2147 = vmax.xlane.f32.xlu0 %v2146_v21  ;;  %2162 = vmax.xlane.f32.xlu1 %v2161_v13  ;;  %v3602_v29 = vpop.f32.mrb[50].mxu0  ;;  %v3604_v14 = vpop.f32.mrb[58].mxu1  ;;  %v1963_v21 = vsel %vm1890_vm3, %v3508_v34, -inf }
 0x38c   : > { %v3606_v30 = vpop.f32.mrb[51].mxu0  ;;  %v3608_v19 = vpop.f32.mrb[59].mxu1 }
 0x38f   : > { %1952 = vmax.xlane.f32.xlu1 %v1951_v33  ;;  %1961 = vmax.xlane.f32.xlu0 %v1960_v15 }
 0x391   : > { %v3614_v40 = vpop.f32.mrb[52].mxu0  ;;  %v3616_v41 = vpop.f32.mrb[60].mxu1 }
 0x392   : > { %v3622_v50 = vpop.f32.mrb[53].mxu0  ;;  %v3624_v53 = vpop.f32.mrb[61].mxu1 }
 0x393   : > { %2156 = vmax.xlane.f32.xlu1 %v2155_v44  ;;  %2165 = vmax.xlane.f32.xlu0 %v2164_v45  ;;  %v3626_v22 = vpop.f32.mrb[54].mxu0  ;;  %v3628_v24 = vpop.f32.mrb[62].mxu1  ;;  %v2167_v44 = vsel %vm1890_vm3, %v3510_v35, -inf  ;;  %v2176_v45 = vsel %vm1890_vm3, %v3514_v37, -inf  ;;  %v1966_v35 = vsel %vm1890_vm3, %v3516_v38, -inf  ;;  %v2185_v37 = vsel %vm1890_vm3, %v3524_v43, -inf }
 0x394   : > { %v3632_v57 = vpop.f32.mrb[55].mxu0  ;;  %v3634_v0 = vpop.f32.mrb[63].mxu1 }
 0x397   : > { %1955 = vmax.xlane.f32.xlu0 %v1954_v23  ;;  %1970 = vmax.xlane.f32.xlu1 %v1969_v54 }
 0x399   : > { %v3640_v1 = vpop.f32.mrb[56].mxu0  ;;  %v3642_v4 = vpop.f32.mrb[64].mxu1 }
 0x39a   : > { %v3646_v31 = vpop.f32.mrb[57].mxu0  ;;  %v3648_v10 = vpop.f32.mrb[65].mxu1 }
 0x39b   : > { %2159 = vmax.xlane.f32.xlu0 %v2158_v5  ;;  %2174 = vmax.xlane.f32.xlu1 %v2173_v25  ;;  %v3650_v11 = vpop.f32.mrb[58].mxu0  ;;  %v3652_v27 = vpop.f32.mrb[66].mxu1  ;;  %v1981_v25 = vsel %vm1890_vm3, %v3522_v42, -inf }
 0x39c   : > { %v3654_v13 = vpop.f32.mrb[59].mxu0  ;;  %v3656_v32 = vpop.f32.mrb[67].mxu1 }
 0x39f   : > { %1964 = vmax.xlane.f32.xlu1 %v1963_v21  ;;  %1973 = vmax.xlane.f32.xlu0 %v1972_v28 }
 0x3a1   : > { %v3662_v33 = vpop.f32.mrb[60].mxu0  ;;  %v3664_v15 = vpop.f32.mrb[68].mxu1 }
 0x3a2   : > { %v3670_v54 = vpop.f32.mrb[61].mxu0  ;;  %v3672_v23 = vpop.f32.mrb[69].mxu1 }
 0x3a3   : > { %2168 = vmax.xlane.f32.xlu1 %v2167_v44  ;;  %2177 = vmax.xlane.f32.xlu0 %v2176_v45  ;;  %v3674_v34 = vpop.f32.mrb[62].mxu0  ;;  %v3676_v36 = vpop.f32.mrb[70].mxu1  ;;  %v2170_v45 = vsel %vm1890_vm3, %v3518_v39, -inf  ;;  %v1984_v39 = vsel %vm1890_vm3, %v3532_v48, -inf }
 0x3a4   : > { %v3680_v5 = vpop.f32.mrb[63].mxu0  ;;  %v3682_v21 = vpop.f32.mrb[71].mxu1 }
 0x3a5   : > { %4150 = vst [vmem:[#allocation13_spill] sm:$0xff] %v3680_v5  ;;  %4151 = vst [vmem:[#allocation14_spill] sm:$0xff] %v3682_v21 }
 0x3a7   : > { %1967 = vmax.xlane.f32.xlu0 %v1966_v35  ;;  %1982 = vmax.xlane.f32.xlu1 %v1981_v25  ;;  %v1975_v35 = vsel %vm1890_vm3, %v3528_v46, -inf  ;;  %v1993_v46 = vsel %vm1890_vm3, %v3544_v55, -inf }
 0x3a9   : > { %v3688_v28 = vpop.f32.mrb[64].mxu0  ;;  %v3690_v44 = vpop.f32.mrb[72].mxu1 }
 0x3aa   : > { %4152 = vst [vmem:[#allocation15_spill] sm:$0xff] %v3690_v44  ;;  %v3694_v42 = vpop.f32.mrb[65].mxu0  ;;  %v3696_v5 = vpop.f32.mrb[73].mxu1 }
 0x3ab   : > { %2171 = vmax.xlane.f32.xlu0 %v2170_v45  ;;  %2186 = vmax.xlane.f32.xlu1 %v2185_v37  ;;  %v3698_v21 = vpop.f32.mrb[66].mxu0  ;;  %v3700_v38 = vpop.f32.mrb[74].mxu1  ;;  %v2179_v37 = vsel %vm1890_vm3, %v3530_v47, -inf  ;;  %v2188_v45 = vsel %vm1890_vm3, %v3534_v49, -inf  ;;  %v2197_v47 = vsel %vm1890_vm3, %v3546_v56, -inf  ;;  %v2191_v56 = vsel %vm1890_vm3, %v3552_v59, -inf }
 0x3ac   : > { %4153 = vst [vmem:[#allocation16_spill] sm:$0xff] %v3700_v38  ;;  %v3702_v25 = vpop.f32.mrb[67].mxu0  ;;  %v3704_v43 = vpop.f32.mrb[75].mxu1 }
 0x3ad   : > { %4154 = vst [vmem:[#allocation17_spill] sm:$0xff] %v3704_v43 }
 0x3af   : > { %1976 = vmax.xlane.f32.xlu1 %v1975_v35  ;;  %1985 = vmax.xlane.f32.xlu0 %v1984_v39  ;;  %v1978_v35 = vsel %vm1890_vm3, %v3537_v51, -inf  ;;  %v2182_v39 = vsel %vm1890_vm3, %v3539_v52, -inf  ;;  %v1987_v51 = vsel %vm1890_vm3, %v3550_v58, -inf  ;;  %v2200_v52 = vsel %vm1890_vm3, %v3556_v61, -inf }
 0x3b0   : > { %v1990_v58 = vsel %vm1890_vm3, %v3558_v62, -inf  ;;  %v2209_v61 = vsel %vm1890_vm3, %v3568_v3, -inf  ;;  %v1999_v3 = vsel %vm1890_vm3, %v3574_v6, -inf  ;;  %v2212_v6 = vsel %vm1890_vm3, %v3580_v9, -inf }
 0x3b1   : > { %v3710_v44 = vpop.f32.mrb[68].mxu0 }
 0x3b2   : > { %v3716_v38 = vpop.f32.mrb[69].mxu0 }
 0x3b3   : > { %2180 = vmax.xlane.f32.xlu1 %v2179_v37  ;;  %2189 = vmax.xlane.f32.xlu0 %v2188_v45  ;;  %v3718_v43 = vpop.f32.mrb[70].mxu0 }
 0x3b4   : > { %v3722_v48 = vpop.f32.mrb[71].mxu0 }
 0x3b7   : > { %1979 = vmax.xlane.f32.xlu0 %v1978_v35  ;;  %1994 = vmax.xlane.f32.xlu1 %v1993_v46  ;;  %v1996_v46 = vsel %vm1890_vm3, %v3554_v60, -inf  ;;  %v2005_v35 = vsel %vm1890_vm3, %v3566_v2, -inf  ;;  %v2194_v2 = vsel %vm1890_vm3, %v3560_v63, -inf }
 0x3b9   : > { %v3728_v49 = vpop.f32.mrb[72].mxu0 }
 0x3ba   : > { %v3732_v37 = vpop.f32.mrb[73].mxu0 }
 0x3bb   : > { %2183 = vmax.xlane.f32.xlu0 %v2182_v39  ;;  %2198 = vmax.xlane.f32.xlu1 %v2197_v47  ;;  %v3734_v55 = vpop.f32.mrb[74].mxu0  ;;  %v2008_v39 = vsel %vm1890_vm3, %v3578_v8, -inf }
 0x3bc   : > { %v3736_v45 = vpop.f32.mrb[75].mxu0 }
 0x3bf   : > { %1988 = vmax.xlane.f32.xlu1 %v1987_v51  ;;  %1997 = vmax.xlane.f32.xlu0 %v1996_v46  ;;  %v2203_v46 = vsel %vm1890_vm3, %v3576_v7, -inf  ;;  %v2002_v7 = vsel %vm1890_vm3, %v3584_v12, -inf }
 0x3c3   : > { %2192 = vmax.xlane.f32.xlu1 %v2191_v56  ;;  %2201 = vmax.xlane.f32.xlu0 %v2200_v52  ;;  %v2017_v52 = vsel %vm1890_vm3, %v3592_v17, -inf  ;;  %v2206_v17 = vsel %vm1890_vm3, %v3586_v16, -inf }
 0x3c7   : > { %1991 = vmax.xlane.f32.xlu0 %v1990_v58  ;;  %2006 = vmax.xlane.f32.xlu1 %v2005_v35  ;;  %v2221_v58 = vsel %vm1890_vm3, %v3594_v20, -inf  ;;  %v2011_v20 = vsel %vm1890_vm3, %v3598_v18, -inf  ;;  %v2224_v18 = vsel %vm1890_vm3, %v3604_v14, -inf }
 0x3c8   : > { %v2103_v59 = vpop.xlane.xlu1 %2102  ;;  %v1899_v60 = vpop.xlane.xlu0 %1898 }
 0x3c9   : > { %2346 = vst.msk [vmem:[%s3752_s8 + $0x230] sm:$0xff] %vm2275_vm4, %v2103_v59  ;;  %2278 = vst.msk [vmem:[%s3752_s8 + $0x10] sm:$0xff] %vm2275_vm4, %v1899_v60  ;;  %v2020_v60 = vsel %vm1890_vm3, %v3602_v29, -inf }
 0x3cb   : > { %2195 = vmax.xlane.f32.xlu0 %v2194_v2  ;;  %2210 = vmax.xlane.f32.xlu1 %v2209_v61  ;;  %v2215_v2 = vsel %vm1890_vm3, %v3600_v26, -inf  ;;  %v2014_v26 = vsel %vm1890_vm3, %v3606_v30, -inf }
 0x3cc   : > { %v2097_v62 = vpop.xlane.xlu1 %2096  ;;  %v1893_v47 = vpop.xlane.xlu0 %1892 }
 0x3cd   : > { %2344 = vst.msk [vmem:[%s3752_s8 + $0x220] sm:$0xff] %vm2275_vm4, %v2097_v62  ;;  %2276 = vst.msk [vmem:[%s3752_s8] sm:$0xff] %vm2275_vm4, %v1893_v47  ;;  %v2029_v47 = vsel %vm1890_vm3, %v3614_v40, -inf  ;;  %v2218_v40 = vsel %vm1890_vm3, %v3608_v19, -inf }
 0x3cf   : > { %2000 = vmax.xlane.f32.xlu1 %v1999_v3  ;;  %2009 = vmax.xlane.f32.xlu0 %v2008_v39  ;;  %v2233_v39 = vsel %vm1890_vm3, %v3616_v41, -inf  ;;  %v2023_v41 = vsel %vm1890_vm3, %v3622_v50, -inf  ;;  %v2236_v50 = vsel %vm1890_vm3, %v3628_v24, -inf }
 0x3d0   : > { %v1902_v51 = vpop.xlane.xlu0 %1901  ;;  %v1896_v63 = vpop.xlane.xlu1 %1895 }
 0x3d1   : > { %2279 = vst.msk [vmem:[%s3752_s8 + $0x18] sm:$0xff] %vm2275_vm4, %v1902_v51  ;;  %2277 = vst.msk [vmem:[%s3752_s8 + $0x8] sm:$0xff] %vm2275_vm4, %v1896_v63  ;;  %v2032_v63 = vsel %vm1890_vm3, %v3626_v22, -inf }
 0x3d3   : > { %2204 = vmax.xlane.f32.xlu1 %v2203_v46  ;;  %2213 = vmax.xlane.f32.xlu0 %v2212_v6  ;;  %v2227_v6 = vsel %vm1890_vm3, %v3624_v53, -inf  ;;  %v2026_v53 = vsel %vm1890_vm3, %v3632_v57, -inf }
 0x3d4   : > { %v2106_v56 = vpop.xlane.xlu0 %2105  ;;  %v1911_v8 = vpop.xlane.xlu1 %1910 }
 0x3d5   : > { %2347 = vst.msk [vmem:[%s3752_s8 + $0x238] sm:$0xff] %vm2275_vm4, %v2106_v56  ;;  %2282 = vst.msk [vmem:[%s3752_s8 + $0x30] sm:$0xff] %vm2275_vm4, %v1911_v8  ;;  %v2041_v8 = vsel %vm1890_vm3, %v3640_v1, -inf  ;;  %v2230_v1 = vsel %vm1890_vm3, %v3634_v0, -inf }
 0x3d7   : > { %2003 = vmax.xlane.f32.xlu0 %v2002_v7  ;;  %2018 = vmax.xlane.f32.xlu1 %v2017_v52  ;;  %v2245_v7 = vsel %vm1890_vm3, %v3642_v4, -inf  ;;  %v2035_v4 = vsel %vm1890_vm3, %v3646_v31, -inf  ;;  %v2248_v31 = vsel %vm1890_vm3, %v3652_v27, -inf }
 0x3d8   : > { %v2100_v35 = vpop.xlane.xlu0 %2099  ;;  %v2115_v9 = vpop.xlane.xlu1 %2114 }
 0x3d9   : > { %2345 = vst.msk [vmem:[%s3752_s8 + $0x228] sm:$0xff] %vm2275_vm4, %v2100_v35  ;;  %2350 = vst.msk [vmem:[%s3752_s8 + $0x250] sm:$0xff] %vm2275_vm4, %v2115_v9  ;;  %v2044_v9 = vsel %vm1890_vm3, %v3650_v11, -inf }
 0x3db   : > { %2207 = vmax.xlane.f32.xlu0 %v2206_v17  ;;  %2222 = vmax.xlane.f32.xlu1 %v2221_v58  ;;  %v2239_v17 = vsel %vm1890_vm3, %v3648_v10, -inf  ;;  %v2038_v10 = vsel %vm1890_vm3, %v3654_v13, -inf }
 0x3dc   : > { %v1905_v59 = vpop.xlane.xlu1 %1904  ;;  %v1914_v12 = vpop.xlane.xlu0 %1913 }
 0x3dd   : > { %2280 = vst.msk [vmem:[%s3752_s8 + $0x20] sm:$0xff] %vm2275_vm4, %v1905_v59  ;;  %2283 = vst.msk [vmem:[%s3752_s8 + $0x38] sm:$0xff] %vm2275_vm4, %v1914_v12  ;;  %v2053_v12 = vsel %vm1890_vm3, %v3662_v33, -inf  ;;  %v2242_v33 = vsel %vm1890_vm3, %v3656_v32, -inf }
 0x3df   : > { %2012 = vmax.xlane.f32.xlu1 %v2011_v20  ;;  %2021 = vmax.xlane.f32.xlu0 %v2020_v60  ;;  %v2257_v60 = vsel %vm1890_vm3, %v3664_v15, -inf  ;;  %v2047_v15 = vsel %vm1890_vm3, %v3670_v54, -inf  ;;  %v2260_v54 = vsel %vm1890_vm3, %v3676_v36, -inf }
 0x3e0   : > { %v2109_v61 = vpop.xlane.xlu1 %2108  ;;  %v2118_v16 = vpop.xlane.xlu0 %2117 }
 0x3e1   : > { %2348 = vst.msk [vmem:[%s3752_s8 + $0x240] sm:$0xff] %vm2275_vm4, %v2109_v61  ;;  %2351 = vst.msk [vmem:[%s3752_s8 + $0x258] sm:$0xff] %vm2275_vm4, %v2118_v16  ;;  %v2056_v16 = vsel %vm1890_vm3, %v3674_v34, -inf }
 0x3e3   : > { %2216 = vmax.xlane.f32.xlu1 %v2215_v2  ;;  %2225 = vmax.xlane.f32.xlu0 %v2224_v18  ;;  %v2251_v18 = vsel %vm1890_vm3, %v3672_v23, -inf }
 0x3e4   : > { %v1908_v62 = vpop.xlane.xlu0 %1907  ;;  %v1923_v29 = vpop.xlane.xlu1 %1922 }
 0x3e5   : > { %2281 = vst.msk [vmem:[%s3752_s8 + $0x28] sm:$0xff] %vm2275_vm4, %v1908_v62  ;;  %2286 = vst.msk [vmem:[%s3752_s8 + $0x50] sm:$0xff] %vm2275_vm4, %v1923_v29  ;;  %v2065_v29 = vsel %vm1890_vm3, %v3688_v28, -inf  ;;  %v4156_v28 = vld [vmem:[#allocation14_spill] sm:$0xff] }
 0x3e7   : > { %2015 = vmax.xlane.f32.xlu0 %v2014_v26  ;;  %2030 = vmax.xlane.f32.xlu1 %v2029_v47  ;;  %v4155_v47 = vld [vmem:[#allocation13_spill] sm:$0xff] }
 0x3e8   : > { %v2112_v3 = vpop.xlane.xlu0 %2111  ;;  %v2127_v14 = vpop.xlane.xlu1 %2126  ;;  %v2050_v23 = vsel %vm1890_vm3, %v4155_v47, -inf }
 0x3e9   : > { %2349 = vst.msk [vmem:[%s3752_s8 + $0x248] sm:$0xff] %vm2275_vm4, %v2112_v3  ;;  %2354 = vst.msk [vmem:[%s3752_s8 + $0x270] sm:$0xff] %vm2275_vm4, %v2127_v14  ;;  %v2059_v3 = vsel %vm1890_vm3, %v3694_v42, -inf  ;;  %v2254_v14 = vsel %vm1890_vm3, %v4156_v28, -inf  ;;  %v2068_v42 = vsel %vm1890_vm3, %v3698_v21, -inf }
 0x3eb   : > { %2219 = vmax.xlane.f32.xlu0 %v2218_v40  ;;  %2234 = vmax.xlane.f32.xlu1 %v2233_v39 }
 0x3ec   : > { %v1917_v51 = vpop.xlane.xlu1 %1916  ;;  %v1926_v30 = vpop.xlane.xlu0 %1925 }
 0x3ed   : > { %2284 = vst.msk [vmem:[%s3752_s8 + $0x40] sm:$0xff] %vm2275_vm4, %v1917_v51  ;;  %2287 = vst.msk [vmem:[%s3752_s8 + $0x58] sm:$0xff] %vm2275_vm4, %v1926_v30  ;;  %v2263_v51 = vsel %vm1890_vm3, %v3696_v5, -inf  ;;  %v2062_v5 = vsel %vm1890_vm3, %v3702_v25, -inf }
 0x3ef   : > { %2024 = vmax.xlane.f32.xlu1 %v2023_v41  ;;  %2033 = vmax.xlane.f32.xlu0 %v2032_v63  ;;  %v2077_v63 = vsel %vm1890_vm3, %v3710_v44, -inf  ;;  %v4157_v44 = vld [vmem:[#allocation17_spill] sm:$0xff] }
 0x3f0   : > { %v2121_v46 = vpop.xlane.xlu1 %2120  ;;  %v2130_v19 = vpop.xlane.xlu0 %2129 }
 0x3f1   : > { %2352 = vst.msk [vmem:[%s3752_s8 + $0x260] sm:$0xff] %vm2275_vm4, %v2121_v46  ;;  %2355 = vst.msk [vmem:[%s3752_s8 + $0x278] sm:$0xff] %vm2275_vm4, %v2130_v19  ;;  %v2071_v19 = vsel %vm1890_vm3, %v3716_v38, -inf  ;;  %v2080_v38 = vsel %vm1890_vm3, %v3718_v43, -inf }
 0x3f3   : > { %2228 = vmax.xlane.f32.xlu1 %v2227_v6  ;;  %2237 = vmax.xlane.f32.xlu0 %v2236_v50  ;;  %v2266_v6 = vsel %vm1890_vm3, %v4157_v44, -inf }
 0x3f4   : > { %v1920_v56 = vpop.xlane.xlu0 %1919  ;;  %v1935_v22 = vpop.xlane.xlu1 %1934 }
 0x3f5   : > { %2285 = vst.msk [vmem:[%s3752_s8 + $0x48] sm:$0xff] %vm2275_vm4, %v1920_v56  ;;  %2290 = vst.msk [vmem:[%s3752_s8 + $0x70] sm:$0xff] %vm2275_vm4, %v1935_v22  ;;  %v2089_v56 = vsel %vm1890_vm3, %v3728_v49, -inf  ;;  %v2074_v49 = vsel %vm1890_vm3, %v3722_v48, -inf }
 0x3f7   : > { %2027 = vmax.xlane.f32.xlu0 %v2026_v53  ;;  %2042 = vmax.xlane.f32.xlu1 %v2041_v8  ;;  %v2083_v53 = vsel %vm1890_vm3, %v3732_v37, -inf  ;;  %v4158_v37 = vld [vmem:[#allocation15_spill] sm:$0xff] }
 0x3f8   : > { %v2124_v52 = vpop.xlane.xlu0 %2123  ;;  %v2139_v24 = vpop.xlane.xlu1 %2138 }
 0x3f9   : > { %2353 = vst.msk [vmem:[%s3752_s8 + $0x268] sm:$0xff] %vm2275_vm4, %v2124_v52  ;;  %2358 = vst.msk [vmem:[%s3752_s8 + $0x290] sm:$0xff] %vm2275_vm4, %v2139_v24  ;;  %v2269_v24 = vsel %vm1890_vm3, %v4158_v37, -inf }
 0x3fb   : > { %2231 = vmax.xlane.f32.xlu0 %v2230_v1  ;;  %2246 = vmax.xlane.f32.xlu1 %v2245_v7  ;;  %v2092_v7 = vsel %vm1890_vm3, %v3734_v55, -inf  ;;  %v4159_v55 = vld [vmem:[#allocation16_spill] sm:$0xff] }
 0x3fc   : > { %v1929_v35 = vpop.xlane.xlu1 %1928  ;;  %v1938_v57 = vpop.xlane.xlu0 %1937 }
 0x3fd   : > { %2288 = vst.msk [vmem:[%s3752_s8 + $0x60] sm:$0xff] %vm2275_vm4, %v1929_v35  ;;  %2291 = vst.msk [vmem:[%s3752_s8 + $0x78] sm:$0xff] %vm2275_vm4, %v1938_v57  ;;  %v2086_v35 = vsel %vm1890_vm3, %v3736_v45, -inf }
 0x3ff   : > { %2036 = vmax.xlane.f32.xlu1 %v2035_v4  ;;  %2045 = vmax.xlane.f32.xlu0 %v2044_v9  ;;  %v2272_v9 = vsel %vm1890_vm3, %v4159_v55, -inf }
 0x400   : > { %v2133_v58 = vpop.xlane.xlu1 %2132  ;;  %v2142_v0 = vpop.xlane.xlu0 %2141 }
 0x401   : > { %2356 = vst.msk [vmem:[%s3752_s8 + $0x280] sm:$0xff] %vm2275_vm4, %v2133_v58  ;;  %2359 = vst.msk [vmem:[%s3752_s8 + $0x298] sm:$0xff] %vm2275_vm4, %v2142_v0 }
 0x403   : > { %2240 = vmax.xlane.f32.xlu1 %v2239_v17  ;;  %2249 = vmax.xlane.f32.xlu0 %v2248_v31 }
 0x404   : > { %v1932_v59 = vpop.xlane.xlu0 %1931  ;;  %v1947_v11 = vpop.xlane.xlu1 %1946 }
 0x405   : > { %2289 = vst.msk [vmem:[%s3752_s8 + $0x68] sm:$0xff] %vm2275_vm4, %v1932_v59  ;;  %2294 = vst.msk [vmem:[%s3752_s8 + $0x90] sm:$0xff] %vm2275_vm4, %v1947_v11 }
 0x407   : > { %2039 = vmax.xlane.f32.xlu0 %v2038_v10  ;;  %2054 = vmax.xlane.f32.xlu1 %v2053_v12 }
 0x408   : > { %v2136_v20 = vpop.xlane.xlu0 %2135  ;;  %v2151_v27 = vpop.xlane.xlu1 %2150 }
 0x409   : > { %2357 = vst.msk [vmem:[%s3752_s8 + $0x288] sm:$0xff] %vm2275_vm4, %v2136_v20  ;;  %2362 = vst.msk [vmem:[%s3752_s8 + $0x2b0] sm:$0xff] %vm2275_vm4, %v2151_v27 }
 0x40b   : > { %2243 = vmax.xlane.f32.xlu0 %v2242_v33  ;;  %2258 = vmax.xlane.f32.xlu1 %v2257_v60 }
 0x40c   : > { %v1941_v61 = vpop.xlane.xlu1 %1940  ;;  %v1950_v13 = vpop.xlane.xlu0 %1949 }
 0x40d   : > { %2292 = vst.msk [vmem:[%s3752_s8 + $0x80] sm:$0xff] %vm2275_vm4, %v1941_v61  ;;  %2295 = vst.msk [vmem:[%s3752_s8 + $0x98] sm:$0xff] %vm2275_vm4, %v1950_v13 }
 0x40f   : > { %2048 = vmax.xlane.f32.xlu1 %v2047_v15  ;;  %2057 = vmax.xlane.f32.xlu0 %v2056_v16 }
 0x410   : > { %v2145_v2 = vpop.xlane.xlu1 %2144  ;;  %v2154_v32 = vpop.xlane.xlu0 %2153 }
 0x411   : > { %2360 = vst.msk [vmem:[%s3752_s8 + $0x2a0] sm:$0xff] %vm2275_vm4, %v2145_v2  ;;  %2363 = vst.msk [vmem:[%s3752_s8 + $0x2b8] sm:$0xff] %vm2275_vm4, %v2154_v32 }
 0x413   : > { %2252 = vmax.xlane.f32.xlu1 %v2251_v18  ;;  %2261 = vmax.xlane.f32.xlu0 %v2260_v54 }
 0x414   : > { %v1944_v62 = vpop.xlane.xlu0 %1943  ;;  %v1959_v34 = vpop.xlane.xlu1 %1958 }
 0x415   : > { %2293 = vst.msk [vmem:[%s3752_s8 + $0x88] sm:$0xff] %vm2275_vm4, %v1944_v62  ;;  %2298 = vst.msk [vmem:[%s3752_s8 + $0xb0] sm:$0xff] %vm2275_vm4, %v1959_v34 }
 0x417   : > { %2051 = vmax.xlane.f32.xlu0 %v2050_v23  ;;  %2066 = vmax.xlane.f32.xlu1 %v2065_v29 }
 0x418   : > { %v2148_v26 = vpop.xlane.xlu0 %2147  ;;  %v2163_v36 = vpop.xlane.xlu1 %2162 }
 0x419   : > { %2361 = vst.msk [vmem:[%s3752_s8 + $0x2a8] sm:$0xff] %vm2275_vm4, %v2148_v26  ;;  %2366 = vst.msk [vmem:[%s3752_s8 + $0x2d0] sm:$0xff] %vm2275_vm4, %v2163_v36 }
 0x41b   : > { %2255 = vmax.xlane.f32.xlu0 %v2254_v14  ;;  %2060 = vmax.xlane.f32.xlu1 %v2059_v3 }
 0x41c   : > { %v1953_v39 = vpop.xlane.xlu1 %1952  ;;  %v1962_v40 = vpop.xlane.xlu0 %1961 }
 0x41d   : > { %2296 = vst.msk [vmem:[%s3752_s8 + $0xa0] sm:$0xff] %vm2275_vm4, %v1953_v39  ;;  %2299 = vst.msk [vmem:[%s3752_s8 + $0xb8] sm:$0xff] %vm2275_vm4, %v1962_v40 }
 0x41f   : > { %2264 = vmax.xlane.f32.xlu1 %v2263_v51  ;;  %2069 = vmax.xlane.f32.xlu0 %v2068_v42 }
 0x420   : > { %v2157_v30 = vpop.xlane.xlu1 %2156  ;;  %v2166_v41 = vpop.xlane.xlu0 %2165 }
 0x421   : > { %2364 = vst.msk [vmem:[%s3752_s8 + $0x2c0] sm:$0xff] %vm2275_vm4, %v2157_v30  ;;  %2367 = vst.msk [vmem:[%s3752_s8 + $0x2d8] sm:$0xff] %vm2275_vm4, %v2166_v41 }
 0x423   : > { %2063 = vmax.xlane.f32.xlu0 %v2062_v5  ;;  %2078 = vmax.xlane.f32.xlu1 %v2077_v63 }
 0x424   : > { %v1956_v46 = vpop.xlane.xlu0 %1955  ;;  %v1971_v21 = vpop.xlane.xlu1 %1970 }
 0x425   : > { %2297 = vst.msk [vmem:[%s3752_s8 + $0xa8] sm:$0xff] %vm2275_vm4, %v1956_v46  ;;  %2302 = vst.msk [vmem:[%s3752_s8 + $0xd0] sm:$0xff] %vm2275_vm4, %v1971_v21 }
 0x427   : > { %2267 = vmax.xlane.f32.xlu0 %v2266_v6  ;;  %2072 = vmax.xlane.f32.xlu1 %v2071_v19 }
 0x428   : > { %v2160_v50 = vpop.xlane.xlu0 %2159  ;;  %v2175_v25 = vpop.xlane.xlu1 %2174 }
 0x429   : > { %2365 = vst.msk [vmem:[%s3752_s8 + $0x2c8] sm:$0xff] %vm2275_vm4, %v2160_v50  ;;  %2370 = vst.msk [vmem:[%s3752_s8 + $0x2f0] sm:$0xff] %vm2275_vm4, %v2175_v25 }
 0x42b   : > { %2081 = vmax.xlane.f32.xlu0 %v2080_v38  ;;  %2090 = vmax.xlane.f32.xlu1 %v2089_v56 }
 0x42c   : > { %v1965_v22 = vpop.xlane.xlu1 %1964  ;;  %v1974_v8 = vpop.xlane.xlu0 %1973 }
 0x42d   : > { %2300 = vst.msk [vmem:[%s3752_s8 + $0xc0] sm:$0xff] %vm2275_vm4, %v1965_v22  ;;  %2303 = vst.msk [vmem:[%s3752_s8 + $0xd8] sm:$0xff] %vm2275_vm4, %v1974_v8 }
 0x42f   : > { %2075 = vmax.xlane.f32.xlu0 %v2074_v49  ;;  %2084 = vmax.xlane.f32.xlu1 %v2083_v53 }
 0x430   : > { %v2169_v52 = vpop.xlane.xlu1 %2168  ;;  %v2178_v43 = vpop.xlane.xlu0 %2177 }
 0x431   : > { %2368 = vst.msk [vmem:[%s3752_s8 + $0x2e0] sm:$0xff] %vm2275_vm4, %v2169_v52  ;;  %2371 = vst.msk [vmem:[%s3752_s8 + $0x2f8] sm:$0xff] %vm2275_vm4, %v2178_v43 }
 0x433   : > { %2270 = vmax.xlane.f32.xlu1 %v2269_v24  ;;  %2093 = vmax.xlane.f32.xlu0 %v2092_v7 }
 0x434   : > { %v1968_v48 = vpop.xlane.xlu0 %1967  ;;  %v1983_v1 = vpop.xlane.xlu1 %1982 }
 0x435   : > { %2301 = vst.msk [vmem:[%s3752_s8 + $0xc8] sm:$0xff] %vm2275_vm4, %v1968_v48  ;;  %2306 = vst.msk [vmem:[%s3752_s8 + $0xf0] sm:$0xff] %vm2275_vm4, %v1983_v1 }
 0x437   : > { %2087 = vmax.xlane.f32.xlu0 %v2086_v35 }
 0x438   : > { %v2172_v57 = vpop.xlane.xlu0 %2171  ;;  %v2187_v4 = vpop.xlane.xlu1 %2186 }
 0x439   : > { %2369 = vst.msk [vmem:[%s3752_s8 + $0x2e8] sm:$0xff] %vm2275_vm4, %v2172_v57  ;;  %2374 = vst.msk [vmem:[%s3752_s8 + $0x310] sm:$0xff] %vm2275_vm4, %v2187_v4 }
 0x43b   : > { %2273 = vmax.xlane.f32.xlu0 %v2272_v9 }
 0x43c   : > { %v1977_v58 = vpop.xlane.xlu1 %1976  ;;  %v1986_v0 = vpop.xlane.xlu0 %1985 }
 0x43d   : > { %2304 = vst.msk [vmem:[%s3752_s8 + $0xe0] sm:$0xff] %vm2275_vm4, %v1977_v58  ;;  %2307 = vst.msk [vmem:[%s3752_s8 + $0xf8] sm:$0xff] %vm2275_vm4, %v1986_v0 }
 0x440   : > { %v2181_v45 = vpop.xlane.xlu1 %2180  ;;  %v2190_v17 = vpop.xlane.xlu0 %2189 }
 0x441   : > { %2372 = vst.msk [vmem:[%s3752_s8 + $0x300] sm:$0xff] %vm2275_vm4, %v2181_v45  ;;  %2375 = vst.msk [vmem:[%s3752_s8 + $0x318] sm:$0xff] %vm2275_vm4, %v2190_v17 }
 0x444   : > { %v1980_v31 = vpop.xlane.xlu0 %1979  ;;  %v1995_v59 = vpop.xlane.xlu1 %1994 }
 0x445   : > { %2305 = vst.msk [vmem:[%s3752_s8 + $0xe8] sm:$0xff] %vm2275_vm4, %v1980_v31  ;;  %2310 = vst.msk [vmem:[%s3752_s8 + $0x110] sm:$0xff] %vm2275_vm4, %v1995_v59 }
 0x448   : > { %v2184_v11 = vpop.xlane.xlu0 %2183  ;;  %v2199_v12 = vpop.xlane.xlu1 %2198 }
 0x449   : > { %2373 = vst.msk [vmem:[%s3752_s8 + $0x308] sm:$0xff] %vm2275_vm4, %v2184_v11  ;;  %2378 = vst.msk [vmem:[%s3752_s8 + $0x330] sm:$0xff] %vm2275_vm4, %v2199_v12 }
 0x44c   : > { %v1989_v10 = vpop.xlane.xlu1 %1988  ;;  %v1998_v20 = vpop.xlane.xlu0 %1997 }
 0x44d   : > { %2308 = vst.msk [vmem:[%s3752_s8 + $0x100] sm:$0xff] %vm2275_vm4, %v1989_v10  ;;  %2311 = vst.msk [vmem:[%s3752_s8 + $0x118] sm:$0xff] %vm2275_vm4, %v1998_v20 }
 0x450   : > { %v2193_v27 = vpop.xlane.xlu1 %2192  ;;  %v2202_v60 = vpop.xlane.xlu0 %2201 }
 0x451   : > { %2376 = vst.msk [vmem:[%s3752_s8 + $0x320] sm:$0xff] %vm2275_vm4, %v2193_v27  ;;  %2379 = vst.msk [vmem:[%s3752_s8 + $0x338] sm:$0xff] %vm2275_vm4, %v2202_v60 }
 0x454   : > { %v1992_v33 = vpop.xlane.xlu0 %1991  ;;  %v2007_v61 = vpop.xlane.xlu1 %2006 }
 0x455   : > { %2309 = vst.msk [vmem:[%s3752_s8 + $0x108] sm:$0xff] %vm2275_vm4, %v1992_v33  ;;  %2314 = vst.msk [vmem:[%s3752_s8 + $0x130] sm:$0xff] %vm2275_vm4, %v2007_v61 }
 0x458   : > { %v2196_v13 = vpop.xlane.xlu0 %2195  ;;  %v2211_v15 = vpop.xlane.xlu1 %2210 }
 0x459   : > { %2377 = vst.msk [vmem:[%s3752_s8 + $0x328] sm:$0xff] %vm2275_vm4, %v2196_v13  ;;  %2382 = vst.msk [vmem:[%s3752_s8 + $0x350] sm:$0xff] %vm2275_vm4, %v2211_v15 }
 0x45c   : > { %v2001_v16 = vpop.xlane.xlu1 %2000  ;;  %v2010_v2 = vpop.xlane.xlu0 %2009 }
 0x45d   : > { %2312 = vst.msk [vmem:[%s3752_s8 + $0x120] sm:$0xff] %vm2275_vm4, %v2001_v16  ;;  %2315 = vst.msk [vmem:[%s3752_s8 + $0x138] sm:$0xff] %vm2275_vm4, %v2010_v2 }
 0x460   : > { %v2205_v32 = vpop.xlane.xlu1 %2204  ;;  %v2214_v18 = vpop.xlane.xlu0 %2213 }
 0x461   : > { %2380 = vst.msk [vmem:[%s3752_s8 + $0x340] sm:$0xff] %vm2275_vm4, %v2205_v32  ;;  %2383 = vst.msk [vmem:[%s3752_s8 + $0x358] sm:$0xff] %vm2275_vm4, %v2214_v18 }
 0x464   : > { %v2004_v54 = vpop.xlane.xlu0 %2003  ;;  %v2019_v62 = vpop.xlane.xlu1 %2018 }
 0x465   : > { %2313 = vst.msk [vmem:[%s3752_s8 + $0x128] sm:$0xff] %vm2275_vm4, %v2004_v54  ;;  %2318 = vst.msk [vmem:[%s3752_s8 + $0x150] sm:$0xff] %vm2275_vm4, %v2019_v62 }
 0x468   : > { %v2208_v34 = vpop.xlane.xlu0 %2207  ;;  %v2223_v29 = vpop.xlane.xlu1 %2222 }
 0x469   : > { %2381 = vst.msk [vmem:[%s3752_s8 + $0x348] sm:$0xff] %vm2275_vm4, %v2208_v34  ;;  %2386 = vst.msk [vmem:[%s3752_s8 + $0x370] sm:$0xff] %vm2275_vm4, %v2223_v29 }
 0x46c   : > { %v2013_v47 = vpop.xlane.xlu1 %2012  ;;  %v2022_v23 = vpop.xlane.xlu0 %2021 }
 0x46d   : > { %2316 = vst.msk [vmem:[%s3752_s8 + $0x140] sm:$0xff] %vm2275_vm4, %v2013_v47  ;;  %2319 = vst.msk [vmem:[%s3752_s8 + $0x158] sm:$0xff] %vm2275_vm4, %v2022_v23 }
 0x470   : > { %v2217_v26 = vpop.xlane.xlu1 %2216  ;;  %v2226_v36 = vpop.xlane.xlu0 %2225 }
 0x471   : > { %2384 = vst.msk [vmem:[%s3752_s8 + $0x360] sm:$0xff] %vm2275_vm4, %v2217_v26  ;;  %2387 = vst.msk [vmem:[%s3752_s8 + $0x378] sm:$0xff] %vm2275_vm4, %v2226_v36 }
 0x474   : > { %v2016_v3 = vpop.xlane.xlu0 %2015  ;;  %v2031_v28 = vpop.xlane.xlu1 %2030 }
 0x475   : > { %2317 = vst.msk [vmem:[%s3752_s8 + $0x148] sm:$0xff] %vm2275_vm4, %v2016_v3  ;;  %2322 = vst.msk [vmem:[%s3752_s8 + $0x170] sm:$0xff] %vm2275_vm4, %v2031_v28 }
 0x478   : > { %v2220_v14 = vpop.xlane.xlu0 %2219  ;;  %v2235_v39 = vpop.xlane.xlu1 %2234 }
 0x479   : > { %2385 = vst.msk [vmem:[%s3752_s8 + $0x368] sm:$0xff] %vm2275_vm4, %v2220_v14  ;;  %2390 = vst.msk [vmem:[%s3752_s8 + $0x390] sm:$0xff] %vm2275_vm4, %v2235_v39 }
 0x47c   : > { %v2025_v40 = vpop.xlane.xlu1 %2024  ;;  %v2034_v51 = vpop.xlane.xlu0 %2033 }
 0x47d   : > { %2320 = vst.msk [vmem:[%s3752_s8 + $0x160] sm:$0xff] %vm2275_vm4, %v2025_v40  ;;  %2323 = vst.msk [vmem:[%s3752_s8 + $0x178] sm:$0xff] %vm2275_vm4, %v2034_v51 }
 0x480   : > { %v2229_v42 = vpop.xlane.xlu1 %2228  ;;  %v2238_v30 = vpop.xlane.xlu0 %2237 }
 0x481   : > { %2388 = vst.msk [vmem:[%s3752_s8 + $0x380] sm:$0xff] %vm2275_vm4, %v2229_v42  ;;  %2391 = vst.msk [vmem:[%s3752_s8 + $0x398] sm:$0xff] %vm2275_vm4, %v2238_v30 }
 0x484   : > { %v2028_v41 = vpop.xlane.xlu0 %2027  ;;  %v2043_v63 = vpop.xlane.xlu1 %2042 }
 0x485   : > { %2321 = vst.msk [vmem:[%s3752_s8 + $0x168] sm:$0xff] %vm2275_vm4, %v2028_v41  ;;  %2326 = vst.msk [vmem:[%s3752_s8 + $0x190] sm:$0xff] %vm2275_vm4, %v2043_v63 }
 0x488   : > { %v2232_v5 = vpop.xlane.xlu0 %2231  ;;  %v2247_v46 = vpop.xlane.xlu1 %2246 }
 0x489   : > { %2389 = vst.msk [vmem:[%s3752_s8 + $0x388] sm:$0xff] %vm2275_vm4, %v2232_v5  ;;  %2394 = vst.msk [vmem:[%s3752_s8 + $0x3b0] sm:$0xff] %vm2275_vm4, %v2247_v46 }
 0x48c   : > { %v2037_v21 = vpop.xlane.xlu1 %2036  ;;  %v2046_v19 = vpop.xlane.xlu0 %2045 }
 0x48d   : > { %2324 = vst.msk [vmem:[%s3752_s8 + $0x180] sm:$0xff] %vm2275_vm4, %v2037_v21  ;;  %2327 = vst.msk [vmem:[%s3752_s8 + $0x198] sm:$0xff] %vm2275_vm4, %v2046_v19 }
 0x490   : > { %v2241_v44 = vpop.xlane.xlu1 %2240  ;;  %v2250_v6 = vpop.xlane.xlu0 %2249 }
 0x491   : > { %2392 = vst.msk [vmem:[%s3752_s8 + $0x3a0] sm:$0xff] %vm2275_vm4, %v2241_v44  ;;  %2395 = vst.msk [vmem:[%s3752_s8 + $0x3b8] sm:$0xff] %vm2275_vm4, %v2250_v6 }
 0x494   : > { %v2040_v50 = vpop.xlane.xlu0 %2039  ;;  %v2055_v25 = vpop.xlane.xlu1 %2054 }
 0x495   : > { %2325 = vst.msk [vmem:[%s3752_s8 + $0x188] sm:$0xff] %vm2275_vm4, %v2040_v50  ;;  %2330 = vst.msk [vmem:[%s3752_s8 + $0x1b0] sm:$0xff] %vm2275_vm4, %v2055_v25 }
 0x498   : > { %v2244_v56 = vpop.xlane.xlu0 %2243  ;;  %v2259_v38 = vpop.xlane.xlu1 %2258 }
 0x499   : > { %2393 = vst.msk [vmem:[%s3752_s8 + $0x3a8] sm:$0xff] %vm2275_vm4, %v2244_v56  ;;  %2398 = vst.msk [vmem:[%s3752_s8 + $0x3d0] sm:$0xff] %vm2275_vm4, %v2259_v38 }
 0x49c   : > { %v2049_v22 = vpop.xlane.xlu1 %2048  ;;  %v2058_v8 = vpop.xlane.xlu0 %2057 }
 0x49d   : > { %2328 = vst.msk [vmem:[%s3752_s8 + $0x1a0] sm:$0xff] %vm2275_vm4, %v2049_v22  ;;  %2331 = vst.msk [vmem:[%s3752_s8 + $0x1b8] sm:$0xff] %vm2275_vm4, %v2058_v8 }
 0x4a0   : > { %v2253_v53 = vpop.xlane.xlu1 %2252  ;;  %v2262_v49 = vpop.xlane.xlu0 %2261 }
 0x4a1   : > { %2396 = vst.msk [vmem:[%s3752_s8 + $0x3c0] sm:$0xff] %vm2275_vm4, %v2253_v53  ;;  %2399 = vst.msk [vmem:[%s3752_s8 + $0x3d8] sm:$0xff] %vm2275_vm4, %v2262_v49 }
 0x4a4   : > { %v2052_v52 = vpop.xlane.xlu0 %2051  ;;  %v2067_v43 = vpop.xlane.xlu1 %2066 }
 0x4a5   : > { %2329 = vst.msk [vmem:[%s3752_s8 + $0x1a8] sm:$0xff] %vm2275_vm4, %v2052_v52  ;;  %2334 = vst.msk [vmem:[%s3752_s8 + $0x1d0] sm:$0xff] %vm2275_vm4, %v2067_v43 }
 0x4a8   : > { %v2256_v37 = vpop.xlane.xlu0 %2255  ;;  %v2061_v24 = vpop.xlane.xlu1 %2060 }
 0x4a9   : > { %2397 = vst.msk [vmem:[%s3752_s8 + $0x3c8] sm:$0xff] %vm2275_vm4, %v2256_v37  ;;  %2332 = vst.msk [vmem:[%s3752_s8 + $0x1c0] sm:$0xff] %vm2275_vm4, %v2061_v24 }
 0x4ac   : > { %v2265_v7 = vpop.xlane.xlu1 %2264  ;;  %v2070_v48 = vpop.xlane.xlu0 %2069 }
 0x4ad   : > { %2400 = vst.msk [vmem:[%s3752_s8 + $0x3e0] sm:$0xff] %vm2275_vm4, %v2265_v7  ;;  %2335 = vst.msk [vmem:[%s3752_s8 + $0x1d8] sm:$0xff] %vm2275_vm4, %v2070_v48 }
 0x4b0   : > { %v2064_v1 = vpop.xlane.xlu0 %2063  ;;  %v2079_v35 = vpop.xlane.xlu1 %2078 }
 0x4b1   : > { %2333 = vst.msk [vmem:[%s3752_s8 + $0x1c8] sm:$0xff] %vm2275_vm4, %v2064_v1  ;;  %2338 = vst.msk [vmem:[%s3752_s8 + $0x1f0] sm:$0xff] %vm2275_vm4, %v2079_v35 }
 0x4b4   : > { %v2268_v57 = vpop.xlane.xlu0 %2267  ;;  %v2073_v4 = vpop.xlane.xlu1 %2072 }
 0x4b5   : > { %2401 = vst.msk [vmem:[%s3752_s8 + $0x3e8] sm:$0xff] %vm2275_vm4, %v2268_v57  ;;  %2336 = vst.msk [vmem:[%s3752_s8 + $0x1e0] sm:$0xff] %vm2275_vm4, %v2073_v4 }
 0x4b8   : > { %v2082_v55 = vpop.xlane.xlu0 %2081  ;;  %v2091_v9 = vpop.xlane.xlu1 %2090 }
 0x4b9   : > { %2339 = vst.msk [vmem:[%s3752_s8 + $0x1f8] sm:$0xff] %vm2275_vm4, %v2082_v55  ;;  %2342 = vst.msk [vmem:[%s3752_s8 + $0x210] sm:$0xff] %vm2275_vm4, %v2091_v9 }
 0x4bc   : > { %v2076_v58 = vpop.xlane.xlu0 %2075  ;;  %v2085_v0 = vpop.xlane.xlu1 %2084 }
 0x4bd   : > { %2337 = vst.msk [vmem:[%s3752_s8 + $0x1e8] sm:$0xff] %vm2275_vm4, %v2076_v58  ;;  %2340 = vst.msk [vmem:[%s3752_s8 + $0x200] sm:$0xff] %vm2275_vm4, %v2085_v0 }
 0x4c0   : > { %v2271_v45 = vpop.xlane.xlu1 %2270  ;;  %v2094_v17 = vpop.xlane.xlu0 %2093 }
 0x4c1   : > { %2402 = vst.msk [vmem:[%s3752_s8 + $0x3f0] sm:$0xff] %vm2275_vm4, %v2271_v45  ;;  %2343 = vst.msk [vmem:[%s3752_s8 + $0x218] sm:$0xff] %vm2275_vm4, %v2094_v17 }
 0x4c4   : > { %v2088_v31 = vpop.xlane.xlu0 %2087 }
 0x4c5   : > { %2341 = vst.msk [vmem:[%s3752_s8 + $0x208] sm:$0xff] %vm2275_vm4, %v2088_v31 }
 0x4c8   : > { %v2274_v59 = vpop.xlane.xlu0 %2273 }
 0x4c9   : > { %2403 = vst.msk [vmem:[%s3752_s8 + $0x3f8] sm:$0xff] %vm2275_vm4, %v2274_v59 }
 0x4ca PF: > { %s19_s23 = sadd.s32 1, %s3201_s23   ;;  %s4160_s21 = smov %s3197_s22 }
 0x4cb   : > { %p16_p8 = scmp.ge.s32.totalorder %s19_s23, 4   ;;  %s4161_s22 = smov %s4163_s30 }
 0x4cd   :  { %18 = sbr.rel (!%p16_p8) target bundleno = 4 (0x4), region = 91 }
 0x4d4   :  { %2425 = vsyncpa [#allocation4], 1 }
 0x4d5   :  { %2427 = vsyncpa [#allocation4 + $0x1], 1 }
 0x4d6   :  { %2428 = vsyncpa [#allocation6], 1 }
 0x4d7   :  { %2429 = vsyncpa [#allocation9], 1 }

// kernel: pointnetfeat_forward.3
= control target key start
LH: loop header
LB: loop body
LE: loop exit
PB: predicated region body
PF: predicated region fallthrough
CT: control target
= control target key end

     0   :  { %s3240_s27 = smov 0   ;;  %s3242_s28 = smov 0   ;;  %s4279_s0 = inlined_call_operand.vmem [shape: f32[2,3,16], index: 0, kind: input, shape index: {}]   ;;  %s4280_s1 = inlined_call_operand.vmem [shape: f32[2,3,3], index: 1, kind: input, shape index: {}]   ;;  %s4281_s2 = inlined_call_operand.vmem [shape: f32[2,64,3], index: 2, kind: input, shape index: {}]   ;;  %s4282_s3 = inlined_call_operand.vmem [shape: f32[64,1], index: 3, kind: input, shape index: {}]   ;;  %s4283_s4 = inlined_call_operand.vmem [shape: bf16[128,64], index: 4, kind: input, shape index: {}]   ;;  %s4284_s5 = inlined_call_operand.vmem [shape: f32[128,1], index: 5, kind: input, shape index: {}]   ;;  %s4285_s6 = inlined_call_operand.vmem [shape: bf16[1024,128], index: 6, kind: input, shape index: {}]   ;;  %s4286_s7 = inlined_call_operand.vmem [shape: f32[2,3,16], index: 7, kind: output, shape index: {0}]   ;;  %s4287_s8 = inlined_call_operand.vmem [shape: f32[2,1024,1], index: 8, kind: output, shape index: {1}]  }
   0x1   :  { %s3244_s29 = smov 0  }
   0x2 LB: > { %s31_s30 = sadd.s32 1, %s3186_s28  ;;  %p2666_p0 = scmp.ge.s32.totalorder %s3190_s29, 1  ;;  %s3190_s29 = sphi %s3244_s29, %s19_s29   ;;  %s3186_s28 = sphi %s3242_s28, %s4299_s28   ;;  %s3182_s27 = sphi %s3240_s27, %s4298_s27  }
   0x3   : > { %p33_p1 = scmp.ge.s32.totalorder %s31_s30, 2  ;;  %p302_p2 = scmp.lt.s32.totalorder %s3190_s29, 3 }
   0x5   : > { %s4301_s30 = smov (%p33_p1, %s31_s30), 0  ;;  %p303_p3 = pnand %p2666_p0, %p302_p2 }
   0x7   : > { %306 = sbr.rel (%p303_p3) target bundleno = 1123 (0x463), region = 48 }
   0xe   : > { %p354_p4 = scmp.lt.s32.totalorder %s3182_s27, 1  ;;  %v473_v0 = vld [vmem:[%s4282_s3] sm:$0xff]  ;;  %v475_v1 = vld [vmem:[%s4282_s3 + $0x10] sm:$0xff]  ;;  %v3192_v2 = vmov 0   ;;  %v474_v3 = vld [vmem:[%s4282_s3 + $0x8] sm:$0xff]  ;;  %vm389_vm0 = vcmask 1042432  }
   0xf   : > { %3094 = vset.pattern.permute.xlu0 %v3192_v2  ;;  %3095 = vset.pattern.permute.xlu1 %v3192_v2  ;;  %v476_v4 = vld [vmem:[%s4282_s3 + $0x18] sm:$0xff]  ;;  %vm385_vm1 = vcmask 23552   ;;  %v477_v9 = vld [vmem:[%s4282_s3 + $0x20] sm:$0xff]  ;;  %v478_v10 = vld [vmem:[%s4282_s3 + $0x28] sm:$0xff]  ;;  %v3193_v34 = vmov 0.0   ;;  %vm3194_vm2 = vmmov 0  }
  0x10   : > { %s4303_s27 = smov (!%p354_p4, %s3182_s27), 1  ;;  %483 = vperm.xlu0 %3094, %v473_v0   ;;  %493 = vperm.xlu1 %3095, %v475_v1   ;;  %v479_v12 = vld [vmem:[%s4282_s3 + $0x30] sm:$0xff]  ;;  %v480_v13 = vld [vmem:[%s4282_s3 + $0x38] sm:$0xff]  ;;  %v678_v17 = vld [vmem:[%s4284_s5] sm:$0xff]  ;;  %vm814_vm3 = vcmask 523264   ;;  %vm463_vm4 = vcmask 124928  }
  0x11   : > { %s3273_s17 = sshll.u32 %s4303_s27, 2  ;;  %s2767_s18 = sshll.u32 %s4303_s27, 6  ;;  %v679_v18 = vld [vmem:[%s4284_s5 + $0x8] sm:$0xff]  ;;  %v680_v20 = vld [vmem:[%s4284_s5 + $0x10] sm:$0xff]  ;;  %v681_v21 = vld [vmem:[%s4284_s5 + $0x18] sm:$0xff]  ;;  %2864 = vmatprep.subr.mxu0 %v3193_v34  ;;  %2866 = vmatprep.mubr.msk.f32.mxu0 %vm3194_vm2, %v3193_v34  ;;  %vm2017_vm5 = vcmask 130048  }
  0x12   : > { %s360_s21 = scalar_lea.vmem %s4279_s0, %s3273_s17  ;;  %s369_s24 = scalar_lea.vmem %s4281_s2, %s2767_s18  ;;  %v682_v22 = vld [vmem:[%s4284_s5 + $0x20] sm:$0xff]  ;;  %v683_v23 = vld [vmem:[%s4284_s5 + $0x28] sm:$0xff]  ;;  %v684_v24 = vld [vmem:[%s4284_s5 + $0x30] sm:$0xff]  ;;  %vm2402_vm6 = vcmask 7168  }
  0x13   : > { %v3283_v5 = vld [vmem:[%s360_s21] sm:$0x7]  ;;  %v466_v7 = vld [vmem:[%s369_s24 + $0x8] sm:$0xff]  ;;  %v467_v8 = vld [vmem:[%s369_s24 + $0x10] sm:$0xff]  ;;  %s364_s15 = scalar_lea.vmem %s4280_s1, %s3273_s17  ;;  %s376_s18 = scalar_lea.vmem %s4286_s7, %s3273_s17 }
  0x14   : > { %v465_v6 = vld [vmem:[%s369_s24] sm:$0xff]  ;;  %488 = vperm.xlu0 %3094, %v474_v3   ;;  %498 = vperm.xlu1 %3095, %v476_v4   ;;  %v468_v11 = vld [vmem:[%s369_s24 + $0x18] sm:$0xff]  ;;  %v470_v15 = vld [vmem:[%s369_s24 + $0x28] sm:$0xff]  ;;  %s2768_s21 = sshll.u32 %s4303_s27, 10 }
  0x15   : > { %2869 = vmatprep.subr.msk.mxu1 %vm389_vm0, %v3283_v5  ;;  %2871 = vmatprep.mubr.msk.f32.mxu1 %vm385_vm1, %v465_v6  ;;  %v469_v14 = vld [vmem:[%s369_s24 + $0x20] sm:$0xff]  ;;  %v471_v16 = vld [vmem:[%s369_s24 + $0x30] sm:$0xff]  ;;  %v472_v19 = vld [vmem:[%s369_s24 + $0x38] sm:$0xff]  ;;  %s3898_s23 = scalar_lea.vmem %s4287_s8, %s2768_s21 }
  0x16   : > { %2870 = vmatpush3.msk.msra.mxu1 %vm389_vm0, %v3283_v5  ;;  %v685_v25 = vld [vmem:[%s4284_s5 + $0x38] sm:$0xff]  ;;  %v686_v26 = vld [vmem:[%s4284_s5 + $0x40] sm:$0xff]  ;;  %v687_v27 = vld [vmem:[%s4284_s5 + $0x48] sm:$0xff]  ;;  %2865 = vmatpush3.msk.msra.mxu0 %vm389_vm0, %v3283_v5 }
  0x17   : > { %2872 = vmatmul.mubr.msk.f32.vlgmr.msra.gmra.mrb[0].mxu1 %vm385_vm1, %v466_v7  ;;  %v688_v28 = vld [vmem:[%s4284_s5 + $0x50] sm:$0xff]  ;;  %v689_v29 = vld [vmem:[%s4284_s5 + $0x58] sm:$0xff]  ;;  %v690_v30 = vld [vmem:[%s4284_s5 + $0x60] sm:$0xff] }
  0x18   : > { %2874 = vmatprep.mubr.msk.f32.mxu1 %vm385_vm1, %v467_v8  ;;  %503 = vperm.xlu0 %3094, %v477_v9   ;;  %v691_v31 = vld [vmem:[%s4284_s5 + $0x68] sm:$0xff]  ;;  %v692_v32 = vld [vmem:[%s4284_s5 + $0x70] sm:$0xff]  ;;  %v693_v33 = vld [vmem:[%s4284_s5 + $0x78] sm:$0xff] }
  0x19   : > { %508 = vperm.xlu1 %3095, %v478_v10   ;;  %v384_v35 = vld [vmem:[%s364_s15] sm:$0x7]  ;;  %v3097_v9 = vld [vmem:[%s4283_s4 + $0x8] sm:$0xff]   ;;  %v3098_v10 = vld [vmem:[%s4283_s4 + $0x10] sm:$0xff]  }
  0x1a   : > { %2867 = vmatmul.mubr.msk.f32.vlgmr.msra.gmra.mrb[0].mxu0 %vm385_vm1, %v384_v35  ;;  %v3096_v36 = vld [vmem:[%s4283_s4] sm:$0xff]  }
  0x1b   : > { %2875 = vmatmul.mubr.msk.f32.gmra.mrb[2].mxu1 %vm385_vm1, %v468_v11  ;;  %2891 = vmatprep.mubr.msk.bf16.mxu0 %vm814_vm3, %v3096_v36  ;;  %v3099_v11 = vld [vmem:[%s4283_s4 + $0x18] sm:$0xff]  }
  0x1c   : > { %2877 = vmatprep.mubr.msk.f32.mxu1 %vm385_vm1, %v469_v14  ;;  %513 = vperm.xlu0 %3094, %v479_v12   ;;  %v3100_v12 = vld [vmem:[%s4283_s4 + $0x20] sm:$0xff]   ;;  %v3102_v14 = vld [vmem:[%s4283_s4 + $0x30] sm:$0xff]  }
  0x1d   : > { %518 = vperm.xlu1 %3095, %v480_v13   ;;  %v3101_v13 = vld [vmem:[%s4283_s4 + $0x28] sm:$0xff]  }
  0x1f   : > { %2878 = vmatmul.mubr.msk.f32.gmra.mrb[4].mxu1 %vm385_vm1, %v470_v15  ;;  %v3103_v15 = vld [vmem:[%s4283_s4 + $0x38] sm:$0xff]  }
  0x20   : > { %2880 = vmatprep.mubr.msk.f32.mxu1 %vm385_vm1, %v471_v16  ;;  %696 = vperm.xlu0 %3094, %v678_v17  }
  0x21   : > { %701 = vperm.xlu1 %3095, %v679_v18   ;;  %v3104_v18 = vld [vmem:[%s4285_s6] sm:$0xff]  }
  0x23   : > { %2881 = vmatmul.mubr.msk.f32.gmra.mrb[6].mxu1 %vm385_vm1, %v472_v19  ;;  %v3105_v19 = vld [vmem:[%s4285_s6 + $0xf0] sm:$0xff]  }
  0x24   : > { %706 = vperm.xlu0 %3094, %v680_v20   ;;  %2983 = vmatprep.mubr.bf16.mxu1 %v3105_v19 }
  0x25   : > { %711 = vperm.xlu1 %3095, %v681_v21  }
  0x28   : > { %716 = vperm.xlu0 %3094, %v682_v22  }
  0x29   : > { %721 = vperm.xlu1 %3095, %v683_v23  }
  0x2c   : > { %726 = vperm.xlu0 %3094, %v684_v24  }
  0x2d   : > { %731 = vperm.xlu1 %3095, %v685_v25  }
  0x30   : > { %736 = vperm.xlu0 %3094, %v686_v26  }
  0x31   : > { %741 = vperm.xlu1 %3095, %v687_v27  }
  0x34   : > { %746 = vperm.xlu0 %3094, %v688_v28  }
  0x35   : > { %751 = vperm.xlu1 %3095, %v689_v29  }
  0x38   : > { %756 = vperm.xlu0 %3094, %v690_v30  }
  0x39   : > { %761 = vperm.xlu1 %3095, %v691_v31  }
  0x3c   : > { %766 = vperm.xlu0 %3094, %v692_v32  }
  0x3d   : > { %771 = vperm.xlu1 %3095, %v693_v33  }
  0x8f   : > { %v484_v37 = vpop.permute.xlu0 %483  ;;  %v494_v38 = vpop.permute.xlu1 %493 }
  0x93   : > { %v489_v39 = vpop.permute.xlu0 %488  ;;  %v499_v40 = vpop.permute.xlu1 %498 }
  0x97   : > { %v504_v53 = vpop.permute.xlu0 %503 }
  0x98   : > { %v509_v50 = vpop.permute.xlu1 %508 }
  0x9b   : > { %v514_v1 = vpop.permute.xlu0 %513 }
  0x9c   : > { %v519_v62 = vpop.permute.xlu1 %518 }
  0x9f   : > { %v697_v20 = vpop.permute.xlu0 %696 }
  0xa0   : > { %v702_v21 = vpop.permute.xlu1 %701 }
  0xa3   : > { %v707_v22 = vpop.permute.xlu0 %706 }
  0xa4   : > { %v712_v23 = vpop.permute.xlu1 %711 }
  0xa7   : > { %v717_v24 = vpop.permute.xlu0 %716 }
  0xa8   : > { %v722_v25 = vpop.permute.xlu1 %721 }
  0xab   : > { %v727_v26 = vpop.permute.xlu0 %726 }
  0xac   : > { %v732_v30 = vpop.permute.xlu1 %731 }
  0xea   : > { %v2873_v41 = vpop.f32.mrb[0].mxu1 }
  0xeb   : > { %v617_v42 = vadd.f32 %v2873_v41, %v489_v39  ;;  %v611_v43 = vpop.f32.mrb[1].mxu1 }
  0xec   : > { %v612_v44 = vadd.f32 %v611_v43, %v484_v37 }
  0xed   : > { %v651_v45 = vmax.f32 %v617_v42, 0.0  ;;  %v459_v16 = vpop.f32.mrb[0].mxu0  ;;  %v742_v42 = vpop.permute.xlu1 %741 }
  0xee   : > { %v650_v46 = vmax.f32 %v612_v44, 0.0  ;;  %v2876_v47 = vpop.f32.mrb[2].mxu1  ;;  %464 = vst.msk [vmem:[%s376_s18] sm:$0x7] %vm463_vm4, %v459_v16  ;;  %v2868_v17 = vpop.f32.mrb[1].mxu0 }
  0xef   : > { %v627_v48 = vadd.f32 %v2876_v47, %v499_v40  ;;  %v621_v49 = vpop.f32.mrb[3].mxu1 }
  0xf0   : > { %v674_v51 = vpack.c.bf16 %v651_v45, %v650_v46  ;;  %v622_v52 = vadd.f32 %v621_v49, %v494_v38  ;;  %v737_v38 = vpop.permute.xlu0 %736 }
  0xf1   : > { %v653_v54 = vmax.f32 %v627_v48, 0.0 }
  0xf2   : > { %v652_v55 = vmax.f32 %v622_v52, 0.0  ;;  %v2879_v56 = vpop.f32.mrb[4].mxu1  ;;  %2883 = vmatprep.subr.bf16.mxu0 %v674_v51 }
  0xf3   : > { %v637_v57 = vadd.f32 %v2879_v56, %v509_v50  ;;  %v631_v58 = vpop.f32.mrb[5].mxu1  ;;  %2884 = vmatpush3.bf16.msra.mxu0 %v674_v51 }
  0xf4   : > { %v675_v59 = vpack.c.bf16 %v653_v54, %v652_v55  ;;  %v632_v60 = vadd.f32 %v631_v58, %v504_v53  ;;  %v747_v51 = vpop.permute.xlu0 %746  ;;  %v752_v55 = vpop.permute.xlu1 %751 }
  0xf5   : > { %v655_v61 = vmax.f32 %v637_v57, 0.0 }
  0xf6   : > { %v654_v63 = vmax.f32 %v632_v60, 0.0  ;;  %v2882_v0 = vpop.f32.mrb[6].mxu1  ;;  %2885 = vmatprep.subr.bf16.mxu0 %v675_v59 }
  0xf7   : > { %v647_v2 = vadd.f32 %v2882_v0, %v519_v62  ;;  %v641_v3 = vpop.f32.mrb[7].mxu1  ;;  %2886 = vmatpush3.bf16.msra.mxu0 %v675_v59 }
  0xf8   : > { %v676_v4 = vpack.c.bf16 %v655_v61, %v654_v63  ;;  %v642_v5 = vadd.f32 %v641_v3, %v514_v1  ;;  %v757_v63 = vpop.permute.xlu0 %756 }
  0xf9   : > { %v657_v6 = vmax.f32 %v647_v2, 0.0 }
  0xfa   : > { %v656_v7 = vmax.f32 %v642_v5, 0.0  ;;  %2887 = vmatprep.subr.bf16.mxu0 %v676_v4 }
  0xfb   : > { %2888 = vmatpush3.bf16.msra.mxu0 %v676_v4  ;;  %v762_v4 = vpop.permute.xlu1 %761 }
  0xfc   : > { %v677_v8 = vpack.c.bf16 %v657_v6, %v656_v7 }
  0xfe   : > { %2889 = vmatprep.subr.bf16.mxu0 %v677_v8 }
  0xff   : > { %2890 = vmatpush3.bf16.msra.mxu0 %v677_v8  ;;  %v772_v16 = vpop.permute.xlu1 %771 }
 0x102   : > { %2892 = vmatmul.mubr.msk.bf16.vlgmr.msra.gmra.mrb[4].mxu0 %vm814_vm3, %v3097_v9 }
 0x103   : > { %2895 = vmatprep.mubr.msk.bf16.mxu0 %vm814_vm3, %v3098_v10 }
 0x10a   : > { %2896 = vmatmul.mubr.msk.bf16.gmra.mrb[8].mxu0 %vm814_vm3, %v3099_v11  ;;  %v767_v11 = vpop.permute.xlu0 %766 }
 0x10b   : > { %2899 = vmatprep.mubr.msk.bf16.mxu0 %vm814_vm3, %v3100_v12 }
 0x112   : > { %2900 = vmatmul.mubr.msk.bf16.gmra.mrb[12].mxu0 %vm814_vm3, %v3101_v13 }
 0x113   : > { %2903 = vmatprep.mubr.msk.bf16.mxu0 %vm814_vm3, %v3102_v14 }
 0x11a   : > { %2904 = vmatmul.mubr.msk.bf16.gmra.mrb[16].mxu0 %vm814_vm3, %v3103_v15 }
 0x11b   : > { %2923 = vmatprep.mubr.bf16.mxu0 %v3104_v18 }
 0x1d5   : > { %v2893_v27 = vpop.f32.mrb[4].mxu0 }
 0x1d6   : > { %v882_v28 = vadd.f32 %v2893_v27, %v707_v22  ;;  %v873_v29 = vpop.f32.mrb[5].mxu0 }
 0x1d7   : > { %v874_v31 = vadd.f32 %v873_v29, %v697_v20  ;;  %v2894_v32 = vpop.f32.mrb[6].mxu0  ;;  %v3107_v29 = vld [vmem:[%s4285_s6 + $0xf8] sm:$0xff]  }
 0x1d8   : > { %v885_v33 = vadd.f32 %v2894_v32, %v712_v23  ;;  %v876_v34 = vpop.f32.mrb[7].mxu0  ;;  %v938_v36 = vmax.f32 %v882_v28, 0.0  ;;  %v3106_v28 = vld [vmem:[%s4285_s6 + $0x8] sm:$0xff]   ;;  %v3109_v32 = vld [vmem:[%s4285_s6 + $0x18] sm:$0xff]  }
 0x1d9   : > { %v877_v35 = vadd.f32 %v876_v34, %v702_v21  ;;  %v936_v39 = vmax.f32 %v874_v31, 0.0  ;;  %v3110_v31 = vld [vmem:[%s4285_s6 + $0x100] sm:$0xff]  }
 0x1da   : > { %v939_v37 = vmax.f32 %v885_v33, 0.0  ;;  %v3111_v33 = vld [vmem:[%s4285_s6 + $0x108] sm:$0xff]   ;;  %v3112_v34 = vld [vmem:[%s4285_s6 + $0x20] sm:$0xff]  }
 0x1db   : > { %v937_v40 = vmax.f32 %v877_v35, 0.0  ;;  %v3114_v35 = vld [vmem:[%s4285_s6 + $0x110] sm:$0xff]  }
 0x1dc   : > { %v1081_v41 = vpack.c.bf16 %v939_v37, %v938_v36  ;;  %v3113_v36 = vld [vmem:[%s4285_s6 + $0x28] sm:$0xff]   ;;  %v3115_v37 = vld [vmem:[%s4285_s6 + $0x118] sm:$0xff]  }
 0x1dd   : > { %v1080_v43 = vpack.c.bf16 %v937_v40, %v936_v39  ;;  %v2897_v44 = vpop.f32.mrb[8].mxu0  ;;  %v3118_v39 = vld [vmem:[%s4285_s6 + $0x120] sm:$0xff]   ;;  %v3117_v40 = vld [vmem:[%s4285_s6 + $0x38] sm:$0xff]  }
 0x1de   : > { %v898_v45 = vadd.f32 %v2897_v44, %v727_v26  ;;  %v889_v46 = vpop.f32.mrb[9].mxu0  ;;  %v3121_v44 = vld [vmem:[%s4285_s6 + $0x48] sm:$0xff]  }
 0x1df   : > { %v890_v47 = vadd.f32 %v889_v46, %v717_v24  ;;  %v2898_v48 = vpop.f32.mrb[10].mxu0  ;;  %2907 = vmatprep.subr.bf16.mxu0 %v1080_v43  ;;  %3051 = vmatprep.subr.bf16.mxu1 %v1080_v43  ;;  %v3124_v46 = vld [vmem:[%s4285_s6 + $0x50] sm:$0xff]  }
 0x1e0   : > { %v901_v49 = vadd.f32 %v2898_v48, %v732_v30  ;;  %v892_v50 = vpop.f32.mrb[11].mxu0  ;;  %2908 = vmatpush3.bf16.msra.mxu0 %v1080_v43  ;;  %3059 = vmatpush3.bf16.msra.mxu1 %v1080_v43  ;;  %v942_v53 = vmax.f32 %v898_v45, 0.0  ;;  %v3108_v30 = vld [vmem:[%s4285_s6 + $0x10] sm:$0xff]   ;;  %v3123_v45 = vld [vmem:[%s4285_s6 + $0x138] sm:$0xff]  }
 0x1e1   : > { %v893_v52 = vadd.f32 %v892_v50, %v722_v25  ;;  %2909 = vmatprep.subr.bf16.mxu0 %v1081_v41  ;;  %3052 = vmatprep.subr.bf16.mxu1 %v1081_v41  ;;  %v940_v56 = vmax.f32 %v890_v47, 0.0  ;;  %v3122_v43 = vld [vmem:[%s4285_s6 + $0x130] sm:$0xff]   ;;  %v3126_v47 = vld [vmem:[%s4285_s6 + $0x140] sm:$0xff]   ;;  %v3125_v48 = vld [vmem:[%s4285_s6 + $0x58] sm:$0xff]  }
 0x1e2   : > { %v943_v54 = vmax.f32 %v901_v49, 0.0  ;;  %v3127_v49 = vld [vmem:[%s4285_s6 + $0x148] sm:$0xff]   ;;  %v3128_v50 = vld [vmem:[%s4285_s6 + $0x60] sm:$0xff]  }
 0x1e3   : > { %v941_v57 = vmax.f32 %v893_v52, 0.0  ;;  %v3129_v52 = vld [vmem:[%s4285_s6 + $0x68] sm:$0xff]  }
 0x1e4   : > { %v1083_v58 = vpack.c.bf16 %v943_v54, %v942_v53  ;;  %2910 = vmatpush3.bf16.msra.mxu0 %v1081_v41  ;;  %3060 = vmatpush3.bf16.msra.mxu1 %v1081_v41  ;;  %v3119_v41 = vld [vmem:[%s4285_s6 + $0x128] sm:$0xff]   ;;  %v3131_v53 = vld [vmem:[%s4285_s6 + $0x158] sm:$0xff]   ;;  %v3132_v54 = vld [vmem:[%s4285_s6 + $0x70] sm:$0xff]  }
 0x1e5   : > { %v1082_v59 = vpack.c.bf16 %v941_v57, %v940_v56  ;;  %v2901_v60 = vpop.f32.mrb[12].mxu0  ;;  %v3133_v56 = vld [vmem:[%s4285_s6 + $0x78] sm:$0xff]   ;;  %v3135_v57 = vld [vmem:[%s4285_s6 + $0x168] sm:$0xff]  }
 0x1e6   : > { %v914_v61 = vadd.f32 %v2901_v60, %v747_v51  ;;  %v905_v62 = vpop.f32.mrb[13].mxu0  ;;  %v3130_v51 = vld [vmem:[%s4285_s6 + $0x150] sm:$0xff]   ;;  %v3137_v60 = vld [vmem:[%s4285_s6 + $0x88] sm:$0xff]  }
 0x1e7   : > { %v906_v0 = vadd.f32 %v905_v62, %v737_v38  ;;  %v2902_v1 = vpop.f32.mrb[14].mxu0  ;;  %2911 = vmatprep.subr.bf16.mxu0 %v1082_v59  ;;  %3053 = vmatprep.subr.bf16.mxu1 %v1082_v59  ;;  %v3116_v38 = vld [vmem:[%s4285_s6 + $0x30] sm:$0xff]  }
 0x1e8   : > { %v917_v2 = vadd.f32 %v2902_v1, %v752_v55  ;;  %v908_v3 = vpop.f32.mrb[15].mxu0  ;;  %2912 = vmatpush3.bf16.msra.mxu0 %v1082_v59  ;;  %3061 = vmatpush3.bf16.msra.mxu1 %v1082_v59  ;;  %v946_v6 = vmax.f32 %v914_v61, 0.0  ;;  %v3134_v55 = vld [vmem:[%s4285_s6 + $0x160] sm:$0xff]   ;;  %v3138_v59 = vld [vmem:[%s4285_s6 + $0x170] sm:$0xff]   ;;  %v3139_v61 = vld [vmem:[%s4285_s6 + $0x178] sm:$0xff]  }
 0x1e9   : > { %v909_v5 = vadd.f32 %v908_v3, %v742_v42  ;;  %2913 = vmatprep.subr.bf16.mxu0 %v1083_v58  ;;  %3054 = vmatprep.subr.bf16.mxu1 %v1083_v58  ;;  %v944_v8 = vmax.f32 %v906_v0, 0.0  ;;  %v3120_v42 = vld [vmem:[%s4285_s6 + $0x40] sm:$0xff]   ;;  %v3140_v62 = vld [vmem:[%s4285_s6 + $0x90] sm:$0xff]   ;;  %v3141_v0 = vld [vmem:[%s4285_s6 + $0x98] sm:$0xff]  }
 0x1ea   : > { %v947_v7 = vmax.f32 %v917_v2, 0.0  ;;  %v3143_v1 = vld [vmem:[%s4285_s6 + $0x188] sm:$0xff]   ;;  %v3144_v2 = vld [vmem:[%s4285_s6 + $0xa0] sm:$0xff]   ;;  %v3146_v3 = vld [vmem:[%s4285_s6 + $0x190] sm:$0xff]  }
 0x1eb   : > { %v945_v9 = vmax.f32 %v909_v5, 0.0  ;;  %v3147_v5 = vld [vmem:[%s4285_s6 + $0x198] sm:$0xff]  }
 0x1ec   : > { %v1085_v10 = vpack.c.bf16 %v947_v7, %v946_v6  ;;  %2914 = vmatpush3.bf16.msra.mxu0 %v1083_v58  ;;  %3062 = vmatpush3.bf16.msra.mxu1 %v1083_v58  ;;  %v3136_v58 = vld [vmem:[%s4285_s6 + $0x80] sm:$0xff]   ;;  %v3148_v6 = vld [vmem:[%s4285_s6 + $0xb0] sm:$0xff]  }
 0x1ed   : > { %v1084_v12 = vpack.c.bf16 %v945_v9, %v944_v8  ;;  %v2905_v13 = vpop.f32.mrb[16].mxu0  ;;  %v3150_v7 = vld [vmem:[%s4285_s6 + $0x1a0] sm:$0xff]   ;;  %v3149_v8 = vld [vmem:[%s4285_s6 + $0xb8] sm:$0xff]   ;;  %v3151_v9 = vld [vmem:[%s4285_s6 + $0x1a8] sm:$0xff]  }
 0x1ee   : > { %v930_v14 = vadd.f32 %v2905_v13, %v767_v11  ;;  %v921_v15 = vpop.f32.mrb[17].mxu0  ;;  %v3154_v11 = vld [vmem:[%s4285_s6 + $0x1b0] sm:$0xff]   ;;  %v3155_v13 = vld [vmem:[%s4285_s6 + $0x1b8] sm:$0xff]  }
 0x1ef   : > { %v922_v17 = vadd.f32 %v921_v15, %v757_v63  ;;  %v2906_v18 = vpop.f32.mrb[18].mxu0  ;;  %2915 = vmatprep.subr.bf16.mxu0 %v1084_v12  ;;  %3055 = vmatprep.subr.bf16.mxu1 %v1084_v12  ;;  %v3142_v63 = vld [vmem:[%s4285_s6 + $0x180] sm:$0xff]  }
 0x1f0   : > { %v933_v19 = vadd.f32 %v2906_v18, %v772_v16  ;;  %v924_v20 = vpop.f32.mrb[19].mxu0  ;;  %2916 = vmatpush3.bf16.msra.mxu0 %v1084_v12  ;;  %3063 = vmatpush3.bf16.msra.mxu1 %v1084_v12  ;;  %v950_v22 = vmax.f32 %v930_v14, 0.0  ;;  %v3153_v12 = vld [vmem:[%s4285_s6 + $0xc8] sm:$0xff]   ;;  %v3156_v14 = vld [vmem:[%s4285_s6 + $0xd0] sm:$0xff]   ;;  %v3158_v15 = vld [vmem:[%s4285_s6 + $0x1c0] sm:$0xff]  }
 0x1f1   : > { %v925_v21 = vadd.f32 %v924_v20, %v762_v4  ;;  %2917 = vmatprep.subr.bf16.mxu0 %v1085_v10  ;;  %3056 = vmatprep.subr.bf16.mxu1 %v1085_v10  ;;  %v948_v24 = vmax.f32 %v922_v17, 0.0  ;;  %v3145_v4 = vld [vmem:[%s4285_s6 + $0xa8] sm:$0xff]   ;;  %v3157_v16 = vld [vmem:[%s4285_s6 + $0xd8] sm:$0xff]   ;;  %v3160_v18 = vld [vmem:[%s4285_s6 + $0xe0] sm:$0xff]  }
 0x1f2   : > { %v951_v23 = vmax.f32 %v933_v19, 0.0  ;;  %v3159_v17 = vld [vmem:[%s4285_s6 + $0x1c8] sm:$0xff]   ;;  %v3162_v19 = vld [vmem:[%s4285_s6 + $0x1d0] sm:$0xff]  }
 0x1f3   : > { %v949_v25 = vmax.f32 %v925_v21, 0.0  ;;  %v3161_v20 = vld [vmem:[%s4285_s6 + $0xe8] sm:$0xff]   ;;  %v3163_v21 = vld [vmem:[%s4285_s6 + $0x1d8] sm:$0xff]  }
 0x1f4   : > { %v1087_v26 = vpack.c.bf16 %v951_v23, %v950_v22  ;;  %2918 = vmatpush3.bf16.msra.mxu0 %v1085_v10  ;;  %3064 = vmatpush3.bf16.msra.mxu1 %v1085_v10  ;;  %v3152_v10 = vld [vmem:[%s4285_s6 + $0xc0] sm:$0xff]   ;;  %v3165_v23 = vld [vmem:[%s4285_s6 + $0x1e8] sm:$0xff]  }
 0x1f5   : > { %v1086_v27 = vpack.c.bf16 %v949_v25, %v948_v24  ;;  %v3164_v22 = vld [vmem:[%s4285_s6 + $0x1e0] sm:$0xff]   ;;  %v3166_v24 = vld [vmem:[%s4285_s6 + $0x1f0] sm:$0xff]   ;;  %v3167_v25 = vld [vmem:[%s4285_s6 + $0x1f8] sm:$0xff]  }
 0x1f7   : > { %2919 = vmatprep.subr.bf16.mxu0 %v1086_v27  ;;  %3057 = vmatprep.subr.bf16.mxu1 %v1086_v27 }
 0x1f8   : > { %2920 = vmatpush3.bf16.msra.mxu0 %v1086_v27  ;;  %3065 = vmatpush3.bf16.msra.mxu1 %v1086_v27 }
 0x1f9   : > { %2921 = vmatprep.subr.bf16.mxu0 %v1087_v26  ;;  %3058 = vmatprep.subr.bf16.mxu1 %v1087_v26 }
 0x1fc   : > { %2922 = vmatpush3.bf16.msra.mxu0 %v1087_v26  ;;  %3066 = vmatpush3.bf16.msra.mxu1 %v1087_v26 }
 0x1ff   : > { %2924 = vmatmul.mubr.bf16.vlgmr.msra.gmra.mrb[20].mxu0 %v3106_v28  ;;  %2984 = vmatmul.mubr.bf16.vlgmr.msra.gmra.mrb[8].mxu1 %v3107_v29 }
 0x200   : > { %2927 = vmatprep.mubr.bf16.mxu0 %v3108_v30  ;;  %2987 = vmatprep.mubr.bf16.mxu1 %v3110_v31 }
 0x207   : > { %2928 = vmatmul.mubr.bf16.gmra.mrb[24].mxu0 %v3109_v32  ;;  %2988 = vmatmul.mubr.bf16.gmra.mrb[12].mxu1 %v3111_v33 }
 0x208   : > { %2931 = vmatprep.mubr.bf16.mxu0 %v3112_v34  ;;  %2991 = vmatprep.mubr.bf16.mxu1 %v3114_v35 }
 0x20f   : > { %2932 = vmatmul.mubr.bf16.gmra.mrb[28].mxu0 %v3113_v36  ;;  %2992 = vmatmul.mubr.bf16.gmra.mrb[16].mxu1 %v3115_v37 }
 0x210   : > { %2935 = vmatprep.mubr.bf16.mxu0 %v3116_v38  ;;  %2995 = vmatprep.mubr.bf16.mxu1 %v3118_v39 }
 0x217   : > { %2936 = vmatmul.mubr.bf16.gmra.mrb[32].mxu0 %v3117_v40  ;;  %2996 = vmatmul.mubr.bf16.gmra.mrb[20].mxu1 %v3119_v41 }
 0x218   : > { %2939 = vmatprep.mubr.bf16.mxu0 %v3120_v42  ;;  %2999 = vmatprep.mubr.bf16.mxu1 %v3122_v43 }
 0x21f   : > { %2940 = vmatmul.mubr.bf16.gmra.mrb[36].mxu0 %v3121_v44  ;;  %3000 = vmatmul.mubr.bf16.gmra.mrb[24].mxu1 %v3123_v45 }
 0x220   : > { %2943 = vmatprep.mubr.bf16.mxu0 %v3124_v46  ;;  %3003 = vmatprep.mubr.bf16.mxu1 %v3126_v47 }
 0x227   : > { %2944 = vmatmul.mubr.bf16.gmra.mrb[40].mxu0 %v3125_v48  ;;  %3004 = vmatmul.mubr.bf16.gmra.mrb[28].mxu1 %v3127_v49 }
 0x228   : > { %2947 = vmatprep.mubr.bf16.mxu0 %v3128_v50  ;;  %3007 = vmatprep.mubr.bf16.mxu1 %v3130_v51 }
 0x22f   : > { %2948 = vmatmul.mubr.bf16.gmra.mrb[44].mxu0 %v3129_v52  ;;  %3008 = vmatmul.mubr.bf16.gmra.mrb[32].mxu1 %v3131_v53 }
 0x230   : > { %2951 = vmatprep.mubr.bf16.mxu0 %v3132_v54  ;;  %3011 = vmatprep.mubr.bf16.mxu1 %v3134_v55 }
 0x237   : > { %2952 = vmatmul.mubr.bf16.gmra.mrb[48].mxu0 %v3133_v56  ;;  %3012 = vmatmul.mubr.bf16.gmra.mrb[36].mxu1 %v3135_v57 }
 0x238   : > { %2955 = vmatprep.mubr.bf16.mxu0 %v3136_v58  ;;  %3015 = vmatprep.mubr.bf16.mxu1 %v3138_v59 }
 0x23f   : > { %2956 = vmatmul.mubr.bf16.gmra.mrb[52].mxu0 %v3137_v60  ;;  %3016 = vmatmul.mubr.bf16.gmra.mrb[40].mxu1 %v3139_v61 }
 0x240   : > { %2959 = vmatprep.mubr.bf16.mxu0 %v3140_v62  ;;  %3019 = vmatprep.mubr.bf16.mxu1 %v3142_v63 }
 0x247   : > { %2960 = vmatmul.mubr.bf16.gmra.mrb[56].mxu0 %v3141_v0  ;;  %3020 = vmatmul.mubr.bf16.gmra.mrb[44].mxu1 %v3143_v1 }
 0x248   : > { %2963 = vmatprep.mubr.bf16.mxu0 %v3144_v2  ;;  %3023 = vmatprep.mubr.bf16.mxu1 %v3146_v3 }
 0x24f   : > { %2964 = vmatmul.mubr.bf16.gmra.mrb[60].mxu0 %v3145_v4  ;;  %3024 = vmatmul.mubr.bf16.gmra.mrb[48].mxu1 %v3147_v5 }
 0x250   : > { %2967 = vmatprep.mubr.bf16.mxu0 %v3148_v6  ;;  %3027 = vmatprep.mubr.bf16.mxu1 %v3150_v7 }
 0x257   : > { %2968 = vmatmul.mubr.bf16.gmra.mrb[64].mxu0 %v3149_v8  ;;  %3028 = vmatmul.mubr.bf16.gmra.mrb[52].mxu1 %v3151_v9 }
 0x258   : > { %2971 = vmatprep.mubr.bf16.mxu0 %v3152_v10  ;;  %3031 = vmatprep.mubr.bf16.mxu1 %v3154_v11 }
 0x25f   : > { %2972 = vmatmul.mubr.bf16.gmra.mrb[68].mxu0 %v3153_v12  ;;  %3032 = vmatmul.mubr.bf16.gmra.mrb[56].mxu1 %v3155_v13 }
 0x260   : > { %2975 = vmatprep.mubr.bf16.mxu0 %v3156_v14  ;;  %3035 = vmatprep.mubr.bf16.mxu1 %v3158_v15 }
 0x267   : > { %2976 = vmatmul.mubr.bf16.gmra.mrb[72].mxu0 %v3157_v16  ;;  %3036 = vmatmul.mubr.bf16.gmra.mrb[60].mxu1 %v3159_v17 }
 0x268   : > { %2979 = vmatprep.mubr.bf16.mxu0 %v3160_v18  ;;  %3039 = vmatprep.mubr.bf16.mxu1 %v3162_v19 }
 0x26f   : > { %2980 = vmatmul.mubr.bf16.gmra.mrb[76].mxu0 %v3161_v20  ;;  %3040 = vmatmul.mubr.bf16.gmra.mrb[64].mxu1 %v3163_v21 }
 0x270   : > { %3043 = vmatprep.mubr.bf16.mxu1 %v3164_v22 }
 0x277   : > { %3044 = vmatmul.mubr.bf16.gmra.mrb[68].mxu1 %v3165_v23 }
 0x278   : > { %3047 = vmatprep.mubr.bf16.mxu1 %v3166_v24 }
 0x27f   : > { %3048 = vmatmul.mubr.bf16.gmra.mrb[72].mxu1 %v3167_v25 }
 0x2d2   : > { %v2925_v26 = vpop.f32.mrb[20].mxu0  ;;  %v2985_v27 = vpop.f32.mrb[8].mxu1 }
 0x2d3   : > { %v1506_v28 = vpop.f32.mrb[21].mxu0  ;;  %v2204_v29 = vsel %vm2017_vm5, %v2985_v27, -inf  ;;  %v2024_v30 = vsel %vm2017_vm5, %v2925_v26, -inf  ;;  %v1746_v31 = vpop.f32.mrb[9].mxu1 }
 0x2d4   : > { %2205 = vmax.xlane.f32.xlu1 %v2204_v29  ;;  %2025 = vmax.xlane.f32.xlu0 %v2024_v30  ;;  %v2926_v32 = vpop.f32.mrb[22].mxu0  ;;  %v2986_v33 = vpop.f32.mrb[10].mxu1  ;;  %v2198_v35 = vsel %vm2017_vm5, %v1746_v31, -inf  ;;  %v2018_v37 = vsel %vm2017_vm5, %v1506_v28, -inf }
 0x2d5   : > { %v1509_v34 = vpop.f32.mrb[23].mxu0  ;;  %v1749_v36 = vpop.f32.mrb[11].mxu1  ;;  %v2027_v40 = vsel %vm2017_vm5, %v2926_v32, -inf  ;;  %v2207_v49 = vsel %vm2017_vm5, %v2986_v33, -inf }
 0x2d6   : > { %v2021_v41 = vsel %vm2017_vm5, %v1509_v34, -inf  ;;  %v2201_v53 = vsel %vm2017_vm5, %v1749_v36, -inf }
 0x2d8   : > { %2199 = vmax.xlane.f32.xlu1 %v2198_v35  ;;  %2019 = vmax.xlane.f32.xlu0 %v2018_v37 }
 0x2da   : > { %v2929_v38 = vpop.f32.mrb[24].mxu0  ;;  %v2989_v39 = vpop.f32.mrb[12].mxu1 }
 0x2db   : > { %v1522_v42 = vpop.f32.mrb[25].mxu0  ;;  %v1762_v43 = vpop.f32.mrb[13].mxu1  ;;  %v2036_v46 = vsel %vm2017_vm5, %v2929_v38, -inf  ;;  %v2216_v50 = vsel %vm2017_vm5, %v2989_v39, -inf }
 0x2dc   : > { %2028 = vmax.xlane.f32.xlu0 %v2027_v40  ;;  %2022 = vmax.xlane.f32.xlu1 %v2021_v41  ;;  %v2930_v44 = vpop.f32.mrb[26].mxu0  ;;  %v2990_v45 = vpop.f32.mrb[14].mxu1  ;;  %v2030_v60 = vsel %vm2017_vm5, %v1522_v42, -inf  ;;  %v2210_v0 = vsel %vm2017_vm5, %v1762_v43, -inf }
 0x2dd   : > { %v1525_v47 = vpop.f32.mrb[27].mxu0  ;;  %v1765_v48 = vpop.f32.mrb[15].mxu1  ;;  %v2039_v61 = vsel %vm2017_vm5, %v2930_v44, -inf  ;;  %v2219_v1 = vsel %vm2017_vm5, %v2990_v45, -inf }
 0x2de   : > { %v2033_v9 = vsel %vm2017_vm5, %v1525_v47, -inf  ;;  %v2213_v13 = vsel %vm2017_vm5, %v1765_v48, -inf }
 0x2e0   : > { %2208 = vmax.xlane.f32.xlu0 %v2207_v49  ;;  %2037 = vmax.xlane.f32.xlu1 %v2036_v46 }
 0x2e2   : > { %v2933_v51 = vpop.f32.mrb[28].mxu0  ;;  %v2993_v52 = vpop.f32.mrb[16].mxu1 }
 0x2e3   : > { %v1538_v54 = vpop.f32.mrb[29].mxu0  ;;  %v1778_v55 = vpop.f32.mrb[17].mxu1  ;;  %v2048_v6 = vsel %vm2017_vm5, %v2933_v51, -inf  ;;  %v2228_v10 = vsel %vm2017_vm5, %v2993_v52, -inf }
 0x2e4   : > { %2202 = vmax.xlane.f32.xlu0 %v2201_v53  ;;  %2217 = vmax.xlane.f32.xlu1 %v2216_v50  ;;  %v2934_v56 = vpop.f32.mrb[30].mxu0  ;;  %v2994_v57 = vpop.f32.mrb[18].mxu1  ;;  %v2042_v20 = vsel %vm2017_vm5, %v1538_v54, -inf  ;;  %v2222_v24 = vsel %vm2017_vm5, %v1778_v55, -inf }
 0x2e5   : > { %v1541_v58 = vpop.f32.mrb[31].mxu0  ;;  %v1781_v59 = vpop.f32.mrb[19].mxu1  ;;  %v2051_v21 = vsel %vm2017_vm5, %v2934_v56, -inf  ;;  %v2231_v25 = vsel %vm2017_vm5, %v2994_v57, -inf }
 0x2e6   : > { %v2045_v33 = vsel %vm2017_vm5, %v1541_v58, -inf  ;;  %v2225_v37 = vsel %vm2017_vm5, %v1781_v59, -inf }
 0x2e8   : > { %2031 = vmax.xlane.f32.xlu1 %v2030_v60  ;;  %2040 = vmax.xlane.f32.xlu0 %v2039_v61 }
 0x2ea   : > { %v2937_v62 = vpop.f32.mrb[32].mxu0  ;;  %v2997_v63 = vpop.f32.mrb[20].mxu1 }
 0x2eb   : > { %v1554_v2 = vpop.f32.mrb[33].mxu0  ;;  %v1794_v3 = vpop.f32.mrb[21].mxu1  ;;  %v2060_v30 = vsel %vm2017_vm5, %v2937_v62, -inf  ;;  %v2240_v34 = vsel %vm2017_vm5, %v2997_v63, -inf }
 0x2ec   : > { %2211 = vmax.xlane.f32.xlu1 %v2210_v0  ;;  %2220 = vmax.xlane.f32.xlu0 %v2219_v1  ;;  %v2938_v4 = vpop.f32.mrb[34].mxu0  ;;  %v2998_v5 = vpop.f32.mrb[22].mxu1  ;;  %v2054_v44 = vsel %vm2017_vm5, %v1554_v2, -inf  ;;  %v2234_v48 = vsel %vm2017_vm5, %v1794_v3, -inf }
 0x2ed   : > { %v3607_v7 = vpop.f32.mrb[35].mxu0  ;;  %v3609_v8 = vpop.f32.mrb[23].mxu1  ;;  %v2063_v45 = vsel %vm2017_vm5, %v2938_v4, -inf  ;;  %v2243_v49 = vsel %vm2017_vm5, %v2998_v5, -inf }
 0x2ee   : > { %v2057_v57 = vsel %vm2017_vm5, %v3607_v7, -inf  ;;  %v2237_v61 = vsel %vm2017_vm5, %v3609_v8, -inf }
 0x2f0   : > { %2034 = vmax.xlane.f32.xlu0 %v2033_v9  ;;  %2049 = vmax.xlane.f32.xlu1 %v2048_v6 }
 0x2f2   : > { %v2941_v11 = vpop.f32.mrb[36].mxu0  ;;  %v3001_v12 = vpop.f32.mrb[24].mxu1 }
 0x2f3   : > { %v3614_v14 = vpop.f32.mrb[37].mxu0  ;;  %v3616_v15 = vpop.f32.mrb[25].mxu1  ;;  %v2072_v54 = vsel %vm2017_vm5, %v2941_v11, -inf  ;;  %v2252_v58 = vsel %vm2017_vm5, %v3001_v12, -inf }
 0x2f4   : > { %2214 = vmax.xlane.f32.xlu0 %v2213_v13  ;;  %2229 = vmax.xlane.f32.xlu1 %v2228_v10  ;;  %v3618_v16 = vpop.f32.mrb[38].mxu0  ;;  %v3620_v17 = vpop.f32.mrb[26].mxu1  ;;  %v2066_v4 = vsel %vm2017_vm5, %v3614_v14, -inf  ;;  %v2246_v8 = vsel %vm2017_vm5, %v3616_v15, -inf }
 0x2f5   : > { %v3622_v18 = vpop.f32.mrb[39].mxu0  ;;  %v3624_v19 = vpop.f32.mrb[27].mxu1  ;;  %v2075_v5 = vsel %vm2017_vm5, %v3618_v16, -inf  ;;  %v2255_v9 = vsel %vm2017_vm5, %v3620_v17, -inf }
 0x2f6   : > { %v2069_v15 = vsel %vm2017_vm5, %v3622_v18, -inf }
 0x2f8   : > { %2043 = vmax.xlane.f32.xlu1 %v2042_v20  ;;  %2052 = vmax.xlane.f32.xlu0 %v2051_v21 }
 0x2fa   : > { %v3628_v22 = vpop.f32.mrb[40].mxu0  ;;  %v3630_v23 = vpop.f32.mrb[28].mxu1 }
 0x2fb   : > { %v3634_v26 = vpop.f32.mrb[41].mxu0  ;;  %v3636_v27 = vpop.f32.mrb[29].mxu1  ;;  %v2084_v14 = vsel %vm2017_vm5, %v3628_v22, -inf  ;;  %v2264_v17 = vsel %vm2017_vm5, %v3630_v23, -inf }
 0x2fc   : > { %2223 = vmax.xlane.f32.xlu1 %v2222_v24  ;;  %2232 = vmax.xlane.f32.xlu0 %v2231_v25  ;;  %v3638_v28 = vpop.f32.mrb[42].mxu0  ;;  %v3640_v29 = vpop.f32.mrb[30].mxu1  ;;  %v2249_v25 = vsel %vm2017_vm5, %v3624_v19, -inf }
 0x2fd   : > { %v3643_v31 = vpop.f32.mrb[43].mxu0  ;;  %v3645_v32 = vpop.f32.mrb[31].mxu1  ;;  %v2087_v19 = vsel %vm2017_vm5, %v3638_v28, -inf }
 0x300   : > { %2046 = vmax.xlane.f32.xlu0 %v2045_v33  ;;  %2061 = vmax.xlane.f32.xlu1 %v2060_v30 }
 0x302   : > { %v3649_v35 = vpop.f32.mrb[44].mxu0  ;;  %v3651_v36 = vpop.f32.mrb[32].mxu1 }
 0x303   : > { %v3654_v38 = vpop.f32.mrb[45].mxu0  ;;  %v3656_v39 = vpop.f32.mrb[33].mxu1 }
 0x304   : > { %2226 = vmax.xlane.f32.xlu0 %v2225_v37  ;;  %2241 = vmax.xlane.f32.xlu1 %v2240_v34  ;;  %v3658_v40 = vpop.f32.mrb[46].mxu0  ;;  %v3660_v41 = vpop.f32.mrb[34].mxu1  ;;  %v2078_v37 = vsel %vm2017_vm5, %v3634_v26, -inf }
 0x305   : > { %v3662_v42 = vpop.f32.mrb[47].mxu0  ;;  %v3664_v43 = vpop.f32.mrb[35].mxu1 }
 0x308   : > { %2055 = vmax.xlane.f32.xlu1 %v2054_v44  ;;  %2064 = vmax.xlane.f32.xlu0 %v2063_v45 }
 0x30a   : > { %v3668_v46 = vpop.f32.mrb[48].mxu0  ;;  %v3670_v47 = vpop.f32.mrb[36].mxu1 }
 0x30b   : > { %v3674_v50 = vpop.f32.mrb[49].mxu0  ;;  %v3676_v51 = vpop.f32.mrb[37].mxu1 }
 0x30c   : > { %2235 = vmax.xlane.f32.xlu1 %v2234_v48  ;;  %2244 = vmax.xlane.f32.xlu0 %v2243_v49  ;;  %v3678_v52 = vpop.f32.mrb[50].mxu0  ;;  %v3680_v53 = vpop.f32.mrb[38].mxu1  ;;  %v2258_v48 = vsel %vm2017_vm5, %v3636_v27, -inf  ;;  %v2267_v49 = vsel %vm2017_vm5, %v3640_v29, -inf  ;;  %v2081_v27 = vsel %vm2017_vm5, %v3643_v31, -inf  ;;  %v2276_v29 = vsel %vm2017_vm5, %v3651_v36, -inf }
 0x30d   : > { %v3683_v55 = vpop.f32.mrb[51].mxu0  ;;  %v3685_v56 = vpop.f32.mrb[39].mxu1 }
 0x310   : > { %2058 = vmax.xlane.f32.xlu0 %v2057_v57  ;;  %2073 = vmax.xlane.f32.xlu1 %v2072_v54 }
 0x312   : > { %v3690_v59 = vpop.f32.mrb[52].mxu0  ;;  %v3692_v60 = vpop.f32.mrb[40].mxu1 }
 0x313   : > { %v3696_v62 = vpop.f32.mrb[53].mxu0  ;;  %v3698_v63 = vpop.f32.mrb[41].mxu1 }
 0x314   : > { %2238 = vmax.xlane.f32.xlu0 %v2237_v61  ;;  %2253 = vmax.xlane.f32.xlu1 %v2252_v58  ;;  %v3700_v0 = vpop.f32.mrb[54].mxu0  ;;  %v3702_v1 = vpop.f32.mrb[42].mxu1  ;;  %v2096_v58 = vsel %vm2017_vm5, %v3649_v35, -inf }
 0x315   : > { %v3704_v2 = vpop.f32.mrb[55].mxu0  ;;  %v3706_v3 = vpop.f32.mrb[43].mxu1 }
 0x318   : > { %2067 = vmax.xlane.f32.xlu1 %v2066_v4  ;;  %2076 = vmax.xlane.f32.xlu0 %v2075_v5 }
 0x31a   : > { %v3712_v6 = vpop.f32.mrb[56].mxu0  ;;  %v3714_v7 = vpop.f32.mrb[44].mxu1 }
 0x31b   : > { %v3720_v10 = vpop.f32.mrb[57].mxu0  ;;  %v3722_v11 = vpop.f32.mrb[45].mxu1 }
 0x31c   : > { %2247 = vmax.xlane.f32.xlu1 %v2246_v8  ;;  %2256 = vmax.xlane.f32.xlu0 %v2255_v9  ;;  %v3724_v12 = vpop.f32.mrb[58].mxu0  ;;  %v3726_v13 = vpop.f32.mrb[46].mxu1  ;;  %v2261_v9 = vsel %vm2017_vm5, %v3645_v32, -inf  ;;  %v2099_v32 = vsel %vm2017_vm5, %v3658_v40, -inf }
 0x31d   : > { %v3730_v16 = vpop.f32.mrb[59].mxu0  ;;  %v3732_v20 = vpop.f32.mrb[47].mxu1 }
 0x320   : > { %2070 = vmax.xlane.f32.xlu0 %v2069_v15  ;;  %2085 = vmax.xlane.f32.xlu1 %v2084_v14 }
 0x322   : > { %v3738_v21 = vpop.f32.mrb[60].mxu0  ;;  %v3740_v24 = vpop.f32.mrb[48].mxu1 }
 0x323   : > { %v3744_v22 = vpop.f32.mrb[61].mxu0  ;;  %v3746_v30 = vpop.f32.mrb[49].mxu1 }
 0x324   : > { %2250 = vmax.xlane.f32.xlu0 %v2249_v25  ;;  %2265 = vmax.xlane.f32.xlu1 %v2264_v17  ;;  %v3748_v33 = vpop.f32.mrb[62].mxu0  ;;  %v3750_v18 = vpop.f32.mrb[50].mxu1  ;;  %v2090_v25 = vsel %vm2017_vm5, %v3654_v38, -inf }
 0x325   : > { %v3752_v34 = vpop.f32.mrb[63].mxu0  ;;  %v3754_v23 = vpop.f32.mrb[51].mxu1 }
 0x328   : > { %2079 = vmax.xlane.f32.xlu1 %v2078_v37  ;;  %2088 = vmax.xlane.f32.xlu0 %v2087_v19 }
 0x32a   : > { %v3760_v44 = vpop.f32.mrb[64].mxu0  ;;  %v3762_v45 = vpop.f32.mrb[52].mxu1 }
 0x32b   : > { %v3768_v54 = vpop.f32.mrb[65].mxu0  ;;  %v3770_v57 = vpop.f32.mrb[53].mxu1 }
 0x32c   : > { %2259 = vmax.xlane.f32.xlu1 %v2258_v48  ;;  %2268 = vmax.xlane.f32.xlu0 %v2267_v49  ;;  %v3772_v26 = vpop.f32.mrb[66].mxu0  ;;  %v3774_v28 = vpop.f32.mrb[54].mxu1  ;;  %v2270_v48 = vsel %vm2017_vm5, %v3656_v39, -inf  ;;  %v2279_v49 = vsel %vm2017_vm5, %v3660_v41, -inf  ;;  %v2093_v39 = vsel %vm2017_vm5, %v3662_v42, -inf  ;;  %v2288_v41 = vsel %vm2017_vm5, %v3670_v47, -inf }
 0x32d   : > { %v3778_v61 = vpop.f32.mrb[67].mxu0  ;;  %v3780_v4 = vpop.f32.mrb[55].mxu1 }
 0x330   : > { %2082 = vmax.xlane.f32.xlu0 %v2081_v27  ;;  %2097 = vmax.xlane.f32.xlu1 %v2096_v58 }
 0x332   : > { %v3786_v5 = vpop.f32.mrb[68].mxu0  ;;  %v3788_v8 = vpop.f32.mrb[56].mxu1 }
 0x333   : > { %v3792_v35 = vpop.f32.mrb[69].mxu0  ;;  %v3794_v14 = vpop.f32.mrb[57].mxu1 }
 0x334   : > { %2262 = vmax.xlane.f32.xlu0 %v2261_v9  ;;  %2277 = vmax.xlane.f32.xlu1 %v2276_v29  ;;  %v3796_v15 = vpop.f32.mrb[70].mxu0  ;;  %v3798_v31 = vpop.f32.mrb[58].mxu1  ;;  %v2108_v29 = vsel %vm2017_vm5, %v3668_v46, -inf }
 0x335   : > { %v3800_v17 = vpop.f32.mrb[71].mxu0  ;;  %v3802_v36 = vpop.f32.mrb[59].mxu1 }
 0x338   : > { %2091 = vmax.xlane.f32.xlu1 %v2090_v25  ;;  %2100 = vmax.xlane.f32.xlu0 %v2099_v32 }
 0x33a   : > { %v3808_v37 = vpop.f32.mrb[72].mxu0  ;;  %v3810_v19 = vpop.f32.mrb[60].mxu1 }
 0x33b   : > { %v3816_v58 = vpop.f32.mrb[73].mxu0  ;;  %v3818_v27 = vpop.f32.mrb[61].mxu1 }
 0x33c   : > { %2271 = vmax.xlane.f32.xlu1 %v2270_v48  ;;  %2280 = vmax.xlane.f32.xlu0 %v2279_v49  ;;  %v3820_v38 = vpop.f32.mrb[74].mxu0  ;;  %v3822_v40 = vpop.f32.mrb[62].mxu1  ;;  %v2273_v49 = vsel %vm2017_vm5, %v3664_v43, -inf  ;;  %v2111_v43 = vsel %vm2017_vm5, %v3678_v52, -inf }
 0x33d   : > { %v3826_v9 = vpop.f32.mrb[75].mxu0  ;;  %v3828_v25 = vpop.f32.mrb[63].mxu1 }
 0x33e   : > { %4288 = vst [vmem:[#allocation3_spill] sm:$0xff] %v3826_v9  ;;  %4289 = vst [vmem:[#allocation4_spill] sm:$0xff] %v3828_v25 }
 0x340   : > { %2094 = vmax.xlane.f32.xlu0 %v2093_v39  ;;  %2109 = vmax.xlane.f32.xlu1 %v2108_v29  ;;  %v2102_v39 = vsel %vm2017_vm5, %v3674_v50, -inf  ;;  %v2120_v50 = vsel %vm2017_vm5, %v3690_v59, -inf }
 0x342   : > { %v3834_v32 = vpop.f32.mrb[76].mxu0  ;;  %v3836_v48 = vpop.f32.mrb[64].mxu1 }
 0x343   : > { %v3840_v46 = vpop.f32.mrb[77].mxu0  ;;  %v3842_v9 = vpop.f32.mrb[65].mxu1 }
 0x344   : > { %4290 = vst [vmem:[#allocation5_spill] sm:$0xff] %v3840_v46  ;;  %2274 = vmax.xlane.f32.xlu0 %v2273_v49  ;;  %2289 = vmax.xlane.f32.xlu1 %v2288_v41  ;;  %v3844_v25 = vpop.f32.mrb[78].mxu0  ;;  %v3846_v42 = vpop.f32.mrb[66].mxu1  ;;  %v2282_v41 = vsel %vm2017_vm5, %v3676_v51, -inf  ;;  %v2291_v49 = vsel %vm2017_vm5, %v3680_v53, -inf  ;;  %v2300_v51 = vsel %vm2017_vm5, %v3692_v60, -inf }
 0x345   : > { %4291 = vst [vmem:[#allocation6_spill] sm:$0xff] %v3846_v42  ;;  %v3848_v29 = vpop.f32.mrb[79].mxu0  ;;  %v3850_v47 = vpop.f32.mrb[67].mxu1  ;;  %v2294_v60 = vsel %vm2017_vm5, %v3698_v63, -inf }
 0x346   : > { %4292 = vst [vmem:[#allocation7_spill] sm:$0xff] %v3850_v47 }
 0x348   : > { %2103 = vmax.xlane.f32.xlu1 %v2102_v39  ;;  %2112 = vmax.xlane.f32.xlu0 %v2111_v43  ;;  %v2105_v39 = vsel %vm2017_vm5, %v3683_v55, -inf  ;;  %v2285_v43 = vsel %vm2017_vm5, %v3685_v56, -inf  ;;  %v2114_v55 = vsel %vm2017_vm5, %v3696_v62, -inf  ;;  %v2303_v56 = vsel %vm2017_vm5, %v3702_v1, -inf }
 0x349   : > { %v2117_v62 = vsel %vm2017_vm5, %v3704_v2, -inf  ;;  %v2312_v1 = vsel %vm2017_vm5, %v3714_v7, -inf  ;;  %v2126_v7 = vsel %vm2017_vm5, %v3720_v10, -inf  ;;  %v2315_v10 = vsel %vm2017_vm5, %v3726_v13, -inf }
 0x34a   : > { %v3856_v46 = vpop.f32.mrb[68].mxu1 }
 0x34b   : > { %v3862_v42 = vpop.f32.mrb[69].mxu1 }
 0x34c   : > { %2283 = vmax.xlane.f32.xlu1 %v2282_v41  ;;  %2292 = vmax.xlane.f32.xlu0 %v2291_v49  ;;  %v3864_v47 = vpop.f32.mrb[70].mxu1 }
 0x34d   : > { %v3868_v52 = vpop.f32.mrb[71].mxu1 }
 0x350   : > { %2106 = vmax.xlane.f32.xlu0 %v2105_v39  ;;  %2121 = vmax.xlane.f32.xlu1 %v2120_v50  ;;  %v2123_v50 = vsel %vm2017_vm5, %v3700_v0, -inf  ;;  %v2132_v39 = vsel %vm2017_vm5, %v3712_v6, -inf  ;;  %v2297_v6 = vsel %vm2017_vm5, %v3706_v3, -inf }
 0x352   : > { %v3874_v53 = vpop.f32.mrb[72].mxu1 }
 0x353   : > { %v3878_v41 = vpop.f32.mrb[73].mxu1 }
 0x354   : > { %2286 = vmax.xlane.f32.xlu0 %v2285_v43  ;;  %2301 = vmax.xlane.f32.xlu1 %v2300_v51  ;;  %v3880_v59 = vpop.f32.mrb[74].mxu1  ;;  %v2135_v43 = vsel %vm2017_vm5, %v3724_v12, -inf }
 0x355   : > { %v3882_v49 = vpop.f32.mrb[75].mxu1 }
 0x358   : > { %2115 = vmax.xlane.f32.xlu1 %v2114_v55  ;;  %2124 = vmax.xlane.f32.xlu0 %v2123_v50  ;;  %v2306_v50 = vsel %vm2017_vm5, %v3722_v11, -inf  ;;  %v2129_v11 = vsel %vm2017_vm5, %v3730_v16, -inf }
 0x35c   : > { %2295 = vmax.xlane.f32.xlu1 %v2294_v60  ;;  %2304 = vmax.xlane.f32.xlu0 %v2303_v56  ;;  %v2144_v56 = vsel %vm2017_vm5, %v3738_v21, -inf  ;;  %v2309_v21 = vsel %vm2017_vm5, %v3732_v20, -inf }
 0x360   : > { %2118 = vmax.xlane.f32.xlu0 %v2117_v62  ;;  %2133 = vmax.xlane.f32.xlu1 %v2132_v39  ;;  %v2324_v62 = vsel %vm2017_vm5, %v3740_v24, -inf  ;;  %v2138_v24 = vsel %vm2017_vm5, %v3744_v22, -inf  ;;  %v2327_v22 = vsel %vm2017_vm5, %v3750_v18, -inf }
 0x361   : > { %v2206_v63 = vpop.xlane.xlu1 %2205  ;;  %v2026_v0 = vpop.xlane.xlu0 %2025 }
 0x362   : > { %2465 = vst.msk [vmem:[%s3898_s23 + $0x1f0] sm:$0xff] %vm2402_vm6, %v2206_v63  ;;  %2405 = vst.msk [vmem:[%s3898_s23 + $0x10] sm:$0xff] %vm2402_vm6, %v2026_v0  ;;  %v2147_v0 = vsel %vm2017_vm5, %v3748_v33, -inf }
 0x364   : > { %2298 = vmax.xlane.f32.xlu0 %v2297_v6  ;;  %2313 = vmax.xlane.f32.xlu1 %v2312_v1  ;;  %v2318_v6 = vsel %vm2017_vm5, %v3746_v30, -inf  ;;  %v2141_v30 = vsel %vm2017_vm5, %v3752_v34, -inf }
 0x365   : > { %v2200_v2 = vpop.xlane.xlu1 %2199  ;;  %v2020_v51 = vpop.xlane.xlu0 %2019 }
 0x366   : > { %2463 = vst.msk [vmem:[%s3898_s23 + $0x1e0] sm:$0xff] %vm2402_vm6, %v2200_v2  ;;  %2403 = vst.msk [vmem:[%s3898_s23] sm:$0xff] %vm2402_vm6, %v2020_v51  ;;  %v2156_v51 = vsel %vm2017_vm5, %v3760_v44, -inf  ;;  %v2321_v44 = vsel %vm2017_vm5, %v3754_v23, -inf }
 0x368   : > { %2127 = vmax.xlane.f32.xlu1 %v2126_v7  ;;  %2136 = vmax.xlane.f32.xlu0 %v2135_v43  ;;  %v2336_v43 = vsel %vm2017_vm5, %v3762_v45, -inf  ;;  %v2150_v45 = vsel %vm2017_vm5, %v3768_v54, -inf  ;;  %v2339_v54 = vsel %vm2017_vm5, %v3774_v28, -inf }
 0x369   : > { %v2029_v55 = vpop.xlane.xlu0 %2028  ;;  %v2023_v3 = vpop.xlane.xlu1 %2022 }
 0x36a   : > { %2406 = vst.msk [vmem:[%s3898_s23 + $0x18] sm:$0xff] %vm2402_vm6, %v2029_v55  ;;  %2404 = vst.msk [vmem:[%s3898_s23 + $0x8] sm:$0xff] %vm2402_vm6, %v2023_v3  ;;  %v2159_v3 = vsel %vm2017_vm5, %v3772_v26, -inf }
 0x36c   : > { %2307 = vmax.xlane.f32.xlu1 %v2306_v50  ;;  %2316 = vmax.xlane.f32.xlu0 %v2315_v10  ;;  %v2330_v10 = vsel %vm2017_vm5, %v3770_v57, -inf  ;;  %v2153_v57 = vsel %vm2017_vm5, %v3778_v61, -inf }
 0x36d   : > { %v2209_v60 = vpop.xlane.xlu0 %2208  ;;  %v2038_v12 = vpop.xlane.xlu1 %2037 }
 0x36e   : > { %2466 = vst.msk [vmem:[%s3898_s23 + $0x1f8] sm:$0xff] %vm2402_vm6, %v2209_v60  ;;  %2409 = vst.msk [vmem:[%s3898_s23 + $0x30] sm:$0xff] %vm2402_vm6, %v2038_v12  ;;  %v2168_v12 = vsel %vm2017_vm5, %v3786_v5, -inf  ;;  %v2333_v5 = vsel %vm2017_vm5, %v3780_v4, -inf }
 0x370   : > { %2130 = vmax.xlane.f32.xlu0 %v2129_v11  ;;  %2145 = vmax.xlane.f32.xlu1 %v2144_v56  ;;  %v2348_v11 = vsel %vm2017_vm5, %v3788_v8, -inf  ;;  %v2162_v8 = vsel %vm2017_vm5, %v3792_v35, -inf  ;;  %v2351_v35 = vsel %vm2017_vm5, %v3798_v31, -inf }
 0x371   : > { %v2203_v39 = vpop.xlane.xlu0 %2202  ;;  %v2218_v13 = vpop.xlane.xlu1 %2217 }
 0x372   : > { %2464 = vst.msk [vmem:[%s3898_s23 + $0x1e8] sm:$0xff] %vm2402_vm6, %v2203_v39  ;;  %2469 = vst.msk [vmem:[%s3898_s23 + $0x210] sm:$0xff] %vm2402_vm6, %v2218_v13  ;;  %v2171_v13 = vsel %vm2017_vm5, %v3796_v15, -inf }
 0x374   : > { %2310 = vmax.xlane.f32.xlu0 %v2309_v21  ;;  %2325 = vmax.xlane.f32.xlu1 %v2324_v62  ;;  %v2342_v21 = vsel %vm2017_vm5, %v3794_v14, -inf  ;;  %v2165_v14 = vsel %vm2017_vm5, %v3800_v17, -inf }
 0x375   : > { %v2032_v63 = vpop.xlane.xlu1 %2031  ;;  %v2041_v16 = vpop.xlane.xlu0 %2040 }
 0x376   : > { %2407 = vst.msk [vmem:[%s3898_s23 + $0x20] sm:$0xff] %vm2402_vm6, %v2032_v63  ;;  %2410 = vst.msk [vmem:[%s3898_s23 + $0x38] sm:$0xff] %vm2402_vm6, %v2041_v16  ;;  %v2180_v16 = vsel %vm2017_vm5, %v3808_v37, -inf  ;;  %v2345_v37 = vsel %vm2017_vm5, %v3802_v36, -inf }
 0x378   : > { %2139 = vmax.xlane.f32.xlu1 %v2138_v24  ;;  %2148 = vmax.xlane.f32.xlu0 %v2147_v0  ;;  %v2360_v0 = vsel %vm2017_vm5, %v3810_v19, -inf  ;;  %v2174_v19 = vsel %vm2017_vm5, %v3816_v58, -inf  ;;  %v2363_v58 = vsel %vm2017_vm5, %v3822_v40, -inf }
 0x379   : > { %v2212_v1 = vpop.xlane.xlu1 %2211  ;;  %v2221_v20 = vpop.xlane.xlu0 %2220 }
 0x37a   : > { %2467 = vst.msk [vmem:[%s3898_s23 + $0x200] sm:$0xff] %vm2402_vm6, %v2212_v1  ;;  %2470 = vst.msk [vmem:[%s3898_s23 + $0x218] sm:$0xff] %vm2402_vm6, %v2221_v20  ;;  %v2183_v20 = vsel %vm2017_vm5, %v3820_v38, -inf }
 0x37c   : > { %2319 = vmax.xlane.f32.xlu1 %v2318_v6  ;;  %2328 = vmax.xlane.f32.xlu0 %v2327_v22  ;;  %v2354_v22 = vsel %vm2017_vm5, %v3818_v27, -inf }
 0x37d   : > { %v2035_v2 = vpop.xlane.xlu0 %2034  ;;  %v2050_v33 = vpop.xlane.xlu1 %2049 }
 0x37e   : > { %2408 = vst.msk [vmem:[%s3898_s23 + $0x28] sm:$0xff] %vm2402_vm6, %v2035_v2  ;;  %2413 = vst.msk [vmem:[%s3898_s23 + $0x50] sm:$0xff] %vm2402_vm6, %v2050_v33  ;;  %v2192_v33 = vsel %vm2017_vm5, %v3834_v32, -inf  ;;  %v4294_v32 = vld [vmem:[#allocation4_spill] sm:$0xff] }
 0x380   : > { %2142 = vmax.xlane.f32.xlu0 %v2141_v30  ;;  %2157 = vmax.xlane.f32.xlu1 %v2156_v51  ;;  %v4293_v51 = vld [vmem:[#allocation3_spill] sm:$0xff] }
 0x381   : > { %v2215_v7 = vpop.xlane.xlu0 %2214  ;;  %v2230_v18 = vpop.xlane.xlu1 %2229  ;;  %v2177_v27 = vsel %vm2017_vm5, %v4293_v51, -inf }
 0x382   : > { %2468 = vst.msk [vmem:[%s3898_s23 + $0x208] sm:$0xff] %vm2402_vm6, %v2215_v7  ;;  %2473 = vst.msk [vmem:[%s3898_s23 + $0x230] sm:$0xff] %vm2402_vm6, %v2230_v18  ;;  %v2372_v7 = vsel %vm2017_vm5, %v3836_v48, -inf  ;;  %v2357_v18 = vsel %vm2017_vm5, %v4294_v32, -inf }
 0x384   : > { %2322 = vmax.xlane.f32.xlu0 %v2321_v44  ;;  %2337 = vmax.xlane.f32.xlu1 %v2336_v43 }
 0x385   : > { %v2044_v55 = vpop.xlane.xlu1 %2043  ;;  %v2053_v34 = vpop.xlane.xlu0 %2052 }
 0x386   : > { %2411 = vst.msk [vmem:[%s3898_s23 + $0x40] sm:$0xff] %vm2402_vm6, %v2044_v55  ;;  %2414 = vst.msk [vmem:[%s3898_s23 + $0x58] sm:$0xff] %vm2402_vm6, %v2053_v34  ;;  %v4295_v55 = vld [vmem:[#allocation5_spill] sm:$0xff]  ;;  %v2195_v34 = vsel %vm2017_vm5, %v3844_v25, -inf }
 0x387   : > { %v2186_v48 = vsel %vm2017_vm5, %v4295_v55, -inf }
 0x388   : > { %2151 = vmax.xlane.f32.xlu1 %v2150_v45  ;;  %2160 = vmax.xlane.f32.xlu0 %v2159_v3 }
 0x389   : > { %v2224_v50 = vpop.xlane.xlu1 %2223  ;;  %v2233_v23 = vpop.xlane.xlu0 %2232 }
 0x38a   : > { %2471 = vst.msk [vmem:[%s3898_s23 + $0x220] sm:$0xff] %vm2402_vm6, %v2224_v50  ;;  %2474 = vst.msk [vmem:[%s3898_s23 + $0x238] sm:$0xff] %vm2402_vm6, %v2233_v23  ;;  %v2366_v50 = vsel %vm2017_vm5, %v3842_v9, -inf  ;;  %v4296_v23 = vld [vmem:[#allocation6_spill] sm:$0xff]  ;;  %v2189_v9 = vsel %vm2017_vm5, %v3848_v29, -inf }
 0x38c   : > { %2331 = vmax.xlane.f32.xlu1 %v2330_v10  ;;  %2340 = vmax.xlane.f32.xlu0 %v2339_v54  ;;  %v2375_v10 = vsel %vm2017_vm5, %v4296_v23, -inf }
 0x38d   : > { %v2047_v60 = vpop.xlane.xlu0 %2046  ;;  %v2062_v26 = vpop.xlane.xlu1 %2061 }
 0x38e   : > { %2412 = vst.msk [vmem:[%s3898_s23 + $0x48] sm:$0xff] %vm2402_vm6, %v2047_v60  ;;  %2417 = vst.msk [vmem:[%s3898_s23 + $0x70] sm:$0xff] %vm2402_vm6, %v2062_v26  ;;  %v2384_v60 = vsel %vm2017_vm5, %v3856_v46, -inf  ;;  %v4297_v46 = vld [vmem:[#allocation7_spill] sm:$0xff] }
 0x390   : > { %2154 = vmax.xlane.f32.xlu0 %v2153_v57  ;;  %2169 = vmax.xlane.f32.xlu1 %v2168_v12  ;;  %v2378_v57 = vsel %vm2017_vm5, %v3862_v42, -inf  ;;  %v2387_v42 = vsel %vm2017_vm5, %v3864_v47, -inf }
 0x391   : > { %v2227_v56 = vpop.xlane.xlu0 %2226  ;;  %v2242_v28 = vpop.xlane.xlu1 %2241 }
 0x392   : > { %2472 = vst.msk [vmem:[%s3898_s23 + $0x228] sm:$0xff] %vm2402_vm6, %v2227_v56  ;;  %2477 = vst.msk [vmem:[%s3898_s23 + $0x250] sm:$0xff] %vm2402_vm6, %v2242_v28  ;;  %v2369_v56 = vsel %vm2017_vm5, %v4297_v46, -inf }
 0x394   : > { %2334 = vmax.xlane.f32.xlu0 %v2333_v5  ;;  %2349 = vmax.xlane.f32.xlu1 %v2348_v11  ;;  %v2390_v11 = vsel %vm2017_vm5, %v3878_v41, -inf  ;;  %v2396_v5 = vsel %vm2017_vm5, %v3874_v53, -inf  ;;  %v2381_v41 = vsel %vm2017_vm5, %v3868_v52, -inf  ;;  %v2393_v53 = vsel %vm2017_vm5, %v3882_v49, -inf }
 0x395   : > { %v2056_v39 = vpop.xlane.xlu1 %2055  ;;  %v2065_v61 = vpop.xlane.xlu0 %2064  ;;  %v2399_v52 = vsel %vm2017_vm5, %v3880_v59, -inf }
 0x396   : > { %2415 = vst.msk [vmem:[%s3898_s23 + $0x60] sm:$0xff] %vm2402_vm6, %v2056_v39  ;;  %2418 = vst.msk [vmem:[%s3898_s23 + $0x78] sm:$0xff] %vm2402_vm6, %v2065_v61 }
 0x398   : > { %2163 = vmax.xlane.f32.xlu1 %v2162_v8  ;;  %2172 = vmax.xlane.f32.xlu0 %v2171_v13 }
 0x399   : > { %v2236_v62 = vpop.xlane.xlu1 %2235  ;;  %v2245_v4 = vpop.xlane.xlu0 %2244 }
 0x39a   : > { %2475 = vst.msk [vmem:[%s3898_s23 + $0x240] sm:$0xff] %vm2402_vm6, %v2236_v62  ;;  %2478 = vst.msk [vmem:[%s3898_s23 + $0x258] sm:$0xff] %vm2402_vm6, %v2245_v4 }
 0x39c   : > { %2343 = vmax.xlane.f32.xlu1 %v2342_v21  ;;  %2352 = vmax.xlane.f32.xlu0 %v2351_v35 }
 0x39d   : > { %v2059_v63 = vpop.xlane.xlu0 %2058  ;;  %v2074_v15 = vpop.xlane.xlu1 %2073 }
 0x39e   : > { %2416 = vst.msk [vmem:[%s3898_s23 + $0x68] sm:$0xff] %vm2402_vm6, %v2059_v63  ;;  %2421 = vst.msk [vmem:[%s3898_s23 + $0x90] sm:$0xff] %vm2402_vm6, %v2074_v15 }
 0x3a0   : > { %2166 = vmax.xlane.f32.xlu0 %v2165_v14  ;;  %2181 = vmax.xlane.f32.xlu1 %v2180_v16 }
 0x3a1   : > { %v2239_v24 = vpop.xlane.xlu0 %2238  ;;  %v2254_v31 = vpop.xlane.xlu1 %2253 }
 0x3a2   : > { %2476 = vst.msk [vmem:[%s3898_s23 + $0x248] sm:$0xff] %vm2402_vm6, %v2239_v24  ;;  %2481 = vst.msk [vmem:[%s3898_s23 + $0x270] sm:$0xff] %vm2402_vm6, %v2254_v31 }
 0x3a4   : > { %2346 = vmax.xlane.f32.xlu0 %v2345_v37  ;;  %2361 = vmax.xlane.f32.xlu1 %v2360_v0 }
 0x3a5   : > { %v2068_v1 = vpop.xlane.xlu1 %2067  ;;  %v2077_v17 = vpop.xlane.xlu0 %2076 }
 0x3a6   : > { %2419 = vst.msk [vmem:[%s3898_s23 + $0x80] sm:$0xff] %vm2402_vm6, %v2068_v1  ;;  %2422 = vst.msk [vmem:[%s3898_s23 + $0x98] sm:$0xff] %vm2402_vm6, %v2077_v17 }
 0x3a8   : > { %2175 = vmax.xlane.f32.xlu1 %v2174_v19  ;;  %2184 = vmax.xlane.f32.xlu0 %v2183_v20 }
 0x3a9   : > { %v2248_v6 = vpop.xlane.xlu1 %2247  ;;  %v2257_v36 = vpop.xlane.xlu0 %2256 }
 0x3aa   : > { %2479 = vst.msk [vmem:[%s3898_s23 + $0x260] sm:$0xff] %vm2402_vm6, %v2248_v6  ;;  %2482 = vst.msk [vmem:[%s3898_s23 + $0x278] sm:$0xff] %vm2402_vm6, %v2257_v36 }
 0x3ac   : > { %2355 = vmax.xlane.f32.xlu1 %v2354_v22  ;;  %2364 = vmax.xlane.f32.xlu0 %v2363_v58 }
 0x3ad   : > { %v2071_v2 = vpop.xlane.xlu0 %2070  ;;  %v2086_v38 = vpop.xlane.xlu1 %2085 }
 0x3ae   : > { %2420 = vst.msk [vmem:[%s3898_s23 + $0x88] sm:$0xff] %vm2402_vm6, %v2071_v2  ;;  %2425 = vst.msk [vmem:[%s3898_s23 + $0xb0] sm:$0xff] %vm2402_vm6, %v2086_v38 }
 0x3b0   : > { %2178 = vmax.xlane.f32.xlu0 %v2177_v27  ;;  %2193 = vmax.xlane.f32.xlu1 %v2192_v33 }
 0x3b1   : > { %v2251_v30 = vpop.xlane.xlu0 %2250  ;;  %v2266_v40 = vpop.xlane.xlu1 %2265 }
 0x3b2   : > { %2480 = vst.msk [vmem:[%s3898_s23 + $0x268] sm:$0xff] %vm2402_vm6, %v2251_v30  ;;  %2485 = vst.msk [vmem:[%s3898_s23 + $0x290] sm:$0xff] %vm2402_vm6, %v2266_v40 }
 0x3b4   : > { %2358 = vmax.xlane.f32.xlu0 %v2357_v18  ;;  %2373 = vmax.xlane.f32.xlu1 %v2372_v7 }
 0x3b5   : > { %v2080_v43 = vpop.xlane.xlu1 %2079  ;;  %v2089_v44 = vpop.xlane.xlu0 %2088 }
 0x3b6   : > { %2423 = vst.msk [vmem:[%s3898_s23 + $0xa0] sm:$0xff] %vm2402_vm6, %v2080_v43  ;;  %2426 = vst.msk [vmem:[%s3898_s23 + $0xb8] sm:$0xff] %vm2402_vm6, %v2089_v44 }
 0x3b8   : > { %2187 = vmax.xlane.f32.xlu1 %v2186_v48  ;;  %2196 = vmax.xlane.f32.xlu0 %v2195_v34 }
 0x3b9   : > { %v2260_v45 = vpop.xlane.xlu1 %2259  ;;  %v2269_v3 = vpop.xlane.xlu0 %2268 }
 0x3ba   : > { %2483 = vst.msk [vmem:[%s3898_s23 + $0x280] sm:$0xff] %vm2402_vm6, %v2260_v45  ;;  %2486 = vst.msk [vmem:[%s3898_s23 + $0x298] sm:$0xff] %vm2402_vm6, %v2269_v3 }
 0x3bc   : > { %2367 = vmax.xlane.f32.xlu1 %v2366_v50  ;;  %2376 = vmax.xlane.f32.xlu0 %v2375_v10 }
 0x3bd   : > { %v2083_v54 = vpop.xlane.xlu0 %2082  ;;  %v2098_v25 = vpop.xlane.xlu1 %2097 }
 0x3be   : > { %2424 = vst.msk [vmem:[%s3898_s23 + $0xa8] sm:$0xff] %vm2402_vm6, %v2083_v54  ;;  %2429 = vst.msk [vmem:[%s3898_s23 + $0xd0] sm:$0xff] %vm2402_vm6, %v2098_v25 }
 0x3c0   : > { %2190 = vmax.xlane.f32.xlu0 %v2189_v9  ;;  %2385 = vmax.xlane.f32.xlu1 %v2384_v60 }
 0x3c1   : > { %v2263_v26 = vpop.xlane.xlu0 %2262  ;;  %v2278_v12 = vpop.xlane.xlu1 %2277 }
 0x3c2   : > { %2484 = vst.msk [vmem:[%s3898_s23 + $0x288] sm:$0xff] %vm2402_vm6, %v2263_v26  ;;  %2489 = vst.msk [vmem:[%s3898_s23 + $0x2b0] sm:$0xff] %vm2402_vm6, %v2278_v12 }
 0x3c4   : > { %2370 = vmax.xlane.f32.xlu0 %v2369_v56  ;;  %2379 = vmax.xlane.f32.xlu1 %v2378_v57 }
 0x3c5   : > { %v2092_v28 = vpop.xlane.xlu1 %2091  ;;  %v2101_v29 = vpop.xlane.xlu0 %2100 }
 0x3c6   : > { %2427 = vst.msk [vmem:[%s3898_s23 + $0xc0] sm:$0xff] %vm2402_vm6, %v2092_v28  ;;  %2430 = vst.msk [vmem:[%s3898_s23 + $0xd8] sm:$0xff] %vm2402_vm6, %v2101_v29 }
 0x3c8   : > { %2388 = vmax.xlane.f32.xlu0 %v2387_v42  ;;  %2391 = vmax.xlane.f32.xlu1 %v2390_v11 }
 0x3c9   : > { %v2272_v39 = vpop.xlane.xlu1 %2271  ;;  %v2281_v61 = vpop.xlane.xlu0 %2280 }
 0x3ca   : > { %2487 = vst.msk [vmem:[%s3898_s23 + $0x2a0] sm:$0xff] %vm2402_vm6, %v2272_v39  ;;  %2490 = vst.msk [vmem:[%s3898_s23 + $0x2b8] sm:$0xff] %vm2402_vm6, %v2281_v61 }
 0x3cc   : > { %2382 = vmax.xlane.f32.xlu0 %v2381_v41  ;;  %2397 = vmax.xlane.f32.xlu1 %v2396_v5 }
 0x3cd   : > { %v2095_v47 = vpop.xlane.xlu0 %2094  ;;  %v2110_v8 = vpop.xlane.xlu1 %2109 }
 0x3ce   : > { %2428 = vst.msk [vmem:[%s3898_s23 + $0xc8] sm:$0xff] %vm2402_vm6, %v2095_v47  ;;  %2433 = vst.msk [vmem:[%s3898_s23 + $0xf0] sm:$0xff] %vm2402_vm6, %v2110_v8 }
 0x3d0   : > { %2394 = vmax.xlane.f32.xlu0 %v2393_v53 }
 0x3d1   : > { %v2275_v13 = vpop.xlane.xlu0 %2274  ;;  %v2290_v62 = vpop.xlane.xlu1 %2289 }
 0x3d2   : > { %2488 = vst.msk [vmem:[%s3898_s23 + $0x2a8] sm:$0xff] %vm2402_vm6, %v2275_v13  ;;  %2493 = vst.msk [vmem:[%s3898_s23 + $0x2d0] sm:$0xff] %vm2402_vm6, %v2290_v62 }
 0x3d4   : > { %2400 = vmax.xlane.f32.xlu0 %v2399_v52 }
 0x3d5   : > { %v2104_v4 = vpop.xlane.xlu1 %2103  ;;  %v2113_v21 = vpop.xlane.xlu0 %2112 }
 0x3d6   : > { %2431 = vst.msk [vmem:[%s3898_s23 + $0xe0] sm:$0xff] %vm2402_vm6, %v2104_v4  ;;  %2434 = vst.msk [vmem:[%s3898_s23 + $0xf8] sm:$0xff] %vm2402_vm6, %v2113_v21 }
 0x3d9   : > { %v2284_v49 = vpop.xlane.xlu1 %2283  ;;  %v2293_v35 = vpop.xlane.xlu0 %2292 }
 0x3da   : > { %2491 = vst.msk [vmem:[%s3898_s23 + $0x2c0] sm:$0xff] %vm2402_vm6, %v2284_v49  ;;  %2494 = vst.msk [vmem:[%s3898_s23 + $0x2d8] sm:$0xff] %vm2402_vm6, %v2293_v35 }
 0x3dd   : > { %v2107_v59 = vpop.xlane.xlu0 %2106  ;;  %v2122_v63 = vpop.xlane.xlu1 %2121 }
 0x3de   : > { %2432 = vst.msk [vmem:[%s3898_s23 + $0xe8] sm:$0xff] %vm2402_vm6, %v2107_v59  ;;  %2437 = vst.msk [vmem:[%s3898_s23 + $0x110] sm:$0xff] %vm2402_vm6, %v2122_v63 }
 0x3e1   : > { %v2287_v15 = vpop.xlane.xlu0 %2286  ;;  %v2302_v16 = vpop.xlane.xlu1 %2301 }
 0x3e2   : > { %2492 = vst.msk [vmem:[%s3898_s23 + $0x2c8] sm:$0xff] %vm2402_vm6, %v2287_v15  ;;  %2497 = vst.msk [vmem:[%s3898_s23 + $0x2f0] sm:$0xff] %vm2402_vm6, %v2302_v16 }
 0x3e5   : > { %v2116_v14 = vpop.xlane.xlu1 %2115  ;;  %v2125_v24 = vpop.xlane.xlu0 %2124 }
 0x3e6   : > { %2435 = vst.msk [vmem:[%s3898_s23 + $0x100] sm:$0xff] %vm2402_vm6, %v2116_v14  ;;  %2438 = vst.msk [vmem:[%s3898_s23 + $0x118] sm:$0xff] %vm2402_vm6, %v2125_v24 }
 0x3e9   : > { %v2296_v31 = vpop.xlane.xlu1 %2295  ;;  %v2305_v0 = vpop.xlane.xlu0 %2304 }
 0x3ea   : > { %2495 = vst.msk [vmem:[%s3898_s23 + $0x2e0] sm:$0xff] %vm2402_vm6, %v2296_v31  ;;  %2498 = vst.msk [vmem:[%s3898_s23 + $0x2f8] sm:$0xff] %vm2402_vm6, %v2305_v0 }
 0x3ed   : > { %v2119_v37 = vpop.xlane.xlu0 %2118  ;;  %v2134_v1 = vpop.xlane.xlu1 %2133 }
 0x3ee   : > { %2436 = vst.msk [vmem:[%s3898_s23 + $0x108] sm:$0xff] %vm2402_vm6, %v2119_v37  ;;  %2441 = vst.msk [vmem:[%s3898_s23 + $0x130] sm:$0xff] %vm2402_vm6, %v2134_v1 }
 0x3f1   : > { %v2299_v17 = vpop.xlane.xlu0 %2298  ;;  %v2314_v19 = vpop.xlane.xlu1 %2313 }
 0x3f2   : > { %2496 = vst.msk [vmem:[%s3898_s23 + $0x2e8] sm:$0xff] %vm2402_vm6, %v2299_v17  ;;  %2501 = vst.msk [vmem:[%s3898_s23 + $0x310] sm:$0xff] %vm2402_vm6, %v2314_v19 }
 0x3f5   : > { %v2128_v20 = vpop.xlane.xlu1 %2127  ;;  %v2137_v6 = vpop.xlane.xlu0 %2136 }
 0x3f6   : > { %2439 = vst.msk [vmem:[%s3898_s23 + $0x120] sm:$0xff] %vm2402_vm6, %v2128_v20  ;;  %2442 = vst.msk [vmem:[%s3898_s23 + $0x138] sm:$0xff] %vm2402_vm6, %v2137_v6 }
 0x3f9   : > { %v2308_v36 = vpop.xlane.xlu1 %2307  ;;  %v2317_v22 = vpop.xlane.xlu0 %2316 }
 0x3fa   : > { %2499 = vst.msk [vmem:[%s3898_s23 + $0x300] sm:$0xff] %vm2402_vm6, %v2308_v36  ;;  %2502 = vst.msk [vmem:[%s3898_s23 + $0x318] sm:$0xff] %vm2402_vm6, %v2317_v22 }
 0x3fd   : > { %v2131_v58 = vpop.xlane.xlu0 %2130  ;;  %v2146_v2 = vpop.xlane.xlu1 %2145 }
 0x3fe   : > { %2440 = vst.msk [vmem:[%s3898_s23 + $0x128] sm:$0xff] %vm2402_vm6, %v2131_v58  ;;  %2445 = vst.msk [vmem:[%s3898_s23 + $0x150] sm:$0xff] %vm2402_vm6, %v2146_v2 }
 0x401   : > { %v2311_v38 = vpop.xlane.xlu0 %2310  ;;  %v2326_v33 = vpop.xlane.xlu1 %2325 }
 0x402   : > { %2500 = vst.msk [vmem:[%s3898_s23 + $0x308] sm:$0xff] %vm2402_vm6, %v2311_v38  ;;  %2505 = vst.msk [vmem:[%s3898_s23 + $0x330] sm:$0xff] %vm2402_vm6, %v2326_v33 }
 0x405   : > { %v2140_v51 = vpop.xlane.xlu1 %2139  ;;  %v2149_v27 = vpop.xlane.xlu0 %2148 }
 0x406   : > { %2443 = vst.msk [vmem:[%s3898_s23 + $0x140] sm:$0xff] %vm2402_vm6, %v2140_v51  ;;  %2446 = vst.msk [vmem:[%s3898_s23 + $0x158] sm:$0xff] %vm2402_vm6, %v2149_v27 }
 0x409   : > { %v2320_v30 = vpop.xlane.xlu1 %2319  ;;  %v2329_v40 = vpop.xlane.xlu0 %2328 }
 0x40a   : > { %2503 = vst.msk [vmem:[%s3898_s23 + $0x320] sm:$0xff] %vm2402_vm6, %v2320_v30  ;;  %2506 = vst.msk [vmem:[%s3898_s23 + $0x338] sm:$0xff] %vm2402_vm6, %v2329_v40 }
 0x40d   : > { %v2143_v7 = vpop.xlane.xlu0 %2142  ;;  %v2158_v32 = vpop.xlane.xlu1 %2157 }
 0x40e   : > { %2444 = vst.msk [vmem:[%s3898_s23 + $0x148] sm:$0xff] %vm2402_vm6, %v2143_v7  ;;  %2449 = vst.msk [vmem:[%s3898_s23 + $0x170] sm:$0xff] %vm2402_vm6, %v2158_v32 }
 0x411   : > { %v2323_v18 = vpop.xlane.xlu0 %2322  ;;  %v2338_v43 = vpop.xlane.xlu1 %2337 }
 0x412   : > { %2504 = vst.msk [vmem:[%s3898_s23 + $0x328] sm:$0xff] %vm2402_vm6, %v2323_v18  ;;  %2509 = vst.msk [vmem:[%s3898_s23 + $0x350] sm:$0xff] %vm2402_vm6, %v2338_v43 }
 0x415   : > { %v2152_v44 = vpop.xlane.xlu1 %2151  ;;  %v2161_v55 = vpop.xlane.xlu0 %2160 }
 0x416   : > { %2447 = vst.msk [vmem:[%s3898_s23 + $0x160] sm:$0xff] %vm2402_vm6, %v2152_v44  ;;  %2450 = vst.msk [vmem:[%s3898_s23 + $0x178] sm:$0xff] %vm2402_vm6, %v2161_v55 }
 0x419   : > { %v2332_v48 = vpop.xlane.xlu1 %2331  ;;  %v2341_v34 = vpop.xlane.xlu0 %2340 }
 0x41a   : > { %2507 = vst.msk [vmem:[%s3898_s23 + $0x340] sm:$0xff] %vm2402_vm6, %v2332_v48  ;;  %2510 = vst.msk [vmem:[%s3898_s23 + $0x358] sm:$0xff] %vm2402_vm6, %v2341_v34 }
 0x41d   : > { %v2155_v45 = vpop.xlane.xlu0 %2154  ;;  %v2170_v3 = vpop.xlane.xlu1 %2169 }
 0x41e   : > { %2448 = vst.msk [vmem:[%s3898_s23 + $0x168] sm:$0xff] %vm2402_vm6, %v2155_v45  ;;  %2453 = vst.msk [vmem:[%s3898_s23 + $0x190] sm:$0xff] %vm2402_vm6, %v2170_v3 }
 0x421   : > { %v2335_v50 = vpop.xlane.xlu0 %2334  ;;  %v2350_v23 = vpop.xlane.xlu1 %2349 }
 0x422   : > { %2508 = vst.msk [vmem:[%s3898_s23 + $0x348] sm:$0xff] %vm2402_vm6, %v2335_v50  ;;  %2513 = vst.msk [vmem:[%s3898_s23 + $0x370] sm:$0xff] %vm2402_vm6, %v2350_v23 }
 0x425   : > { %v2164_v10 = vpop.xlane.xlu1 %2163  ;;  %v2173_v54 = vpop.xlane.xlu0 %2172 }
 0x426   : > { %2451 = vst.msk [vmem:[%s3898_s23 + $0x180] sm:$0xff] %vm2402_vm6, %v2164_v10  ;;  %2454 = vst.msk [vmem:[%s3898_s23 + $0x198] sm:$0xff] %vm2402_vm6, %v2173_v54 }
 0x429   : > { %v2344_v25 = vpop.xlane.xlu1 %2343  ;;  %v2353_v60 = vpop.xlane.xlu0 %2352 }
 0x42a   : > { %2511 = vst.msk [vmem:[%s3898_s23 + $0x360] sm:$0xff] %vm2402_vm6, %v2344_v25  ;;  %2514 = vst.msk [vmem:[%s3898_s23 + $0x378] sm:$0xff] %vm2402_vm6, %v2353_v60 }
 0x42d   : > { %v2167_v9 = vpop.xlane.xlu0 %2166  ;;  %v2182_v26 = vpop.xlane.xlu1 %2181 }
 0x42e   : > { %2452 = vst.msk [vmem:[%s3898_s23 + $0x188] sm:$0xff] %vm2402_vm6, %v2167_v9  ;;  %2457 = vst.msk [vmem:[%s3898_s23 + $0x1b0] sm:$0xff] %vm2402_vm6, %v2182_v26 }
 0x431   : > { %v2347_v12 = vpop.xlane.xlu0 %2346  ;;  %v2362_v57 = vpop.xlane.xlu1 %2361 }
 0x432   : > { %2512 = vst.msk [vmem:[%s3898_s23 + $0x368] sm:$0xff] %vm2402_vm6, %v2347_v12  ;;  %2517 = vst.msk [vmem:[%s3898_s23 + $0x390] sm:$0xff] %vm2402_vm6, %v2362_v57 }
 0x435   : > { %v2176_v46 = vpop.xlane.xlu1 %2175  ;;  %v2185_v56 = vpop.xlane.xlu0 %2184 }
 0x436   : > { %2455 = vst.msk [vmem:[%s3898_s23 + $0x1a0] sm:$0xff] %vm2402_vm6, %v2176_v46  ;;  %2458 = vst.msk [vmem:[%s3898_s23 + $0x1b8] sm:$0xff] %vm2402_vm6, %v2185_v56 }
 0x439   : > { %v2356_v28 = vpop.xlane.xlu1 %2355  ;;  %v2365_v29 = vpop.xlane.xlu0 %2364 }
 0x43a   : > { %2515 = vst.msk [vmem:[%s3898_s23 + $0x380] sm:$0xff] %vm2402_vm6, %v2356_v28  ;;  %2518 = vst.msk [vmem:[%s3898_s23 + $0x398] sm:$0xff] %vm2402_vm6, %v2365_v29 }
 0x43d   : > { %v2179_v11 = vpop.xlane.xlu0 %2178  ;;  %v2194_v42 = vpop.xlane.xlu1 %2193 }
 0x43e   : > { %2456 = vst.msk [vmem:[%s3898_s23 + $0x1a8] sm:$0xff] %vm2402_vm6, %v2179_v11  ;;  %2461 = vst.msk [vmem:[%s3898_s23 + $0x1d0] sm:$0xff] %vm2402_vm6, %v2194_v42 }
 0x441   : > { %v2359_v5 = vpop.xlane.xlu0 %2358  ;;  %v2374_v39 = vpop.xlane.xlu1 %2373 }
 0x442   : > { %2516 = vst.msk [vmem:[%s3898_s23 + $0x388] sm:$0xff] %vm2402_vm6, %v2359_v5  ;;  %2521 = vst.msk [vmem:[%s3898_s23 + $0x3b0] sm:$0xff] %vm2402_vm6, %v2374_v39 }
 0x445   : > { %v2188_v61 = vpop.xlane.xlu1 %2187  ;;  %v2197_v41 = vpop.xlane.xlu0 %2196 }
 0x446   : > { %2459 = vst.msk [vmem:[%s3898_s23 + $0x1c0] sm:$0xff] %vm2402_vm6, %v2188_v61  ;;  %2462 = vst.msk [vmem:[%s3898_s23 + $0x1d8] sm:$0xff] %vm2402_vm6, %v2197_v41 }
 0x449   : > { %v2368_v47 = vpop.xlane.xlu1 %2367  ;;  %v2377_v8 = vpop.xlane.xlu0 %2376 }
 0x44a   : > { %2519 = vst.msk [vmem:[%s3898_s23 + $0x3a0] sm:$0xff] %vm2402_vm6, %v2368_v47  ;;  %2522 = vst.msk [vmem:[%s3898_s23 + $0x3b8] sm:$0xff] %vm2402_vm6, %v2377_v8 }
 0x44d   : > { %v2191_v53 = vpop.xlane.xlu0 %2190  ;;  %v2386_v13 = vpop.xlane.xlu1 %2385 }
 0x44e   : > { %2460 = vst.msk [vmem:[%s3898_s23 + $0x1c8] sm:$0xff] %vm2402_vm6, %v2191_v53  ;;  %2525 = vst.msk [vmem:[%s3898_s23 + $0x3d0] sm:$0xff] %vm2402_vm6, %v2386_v13 }
 0x451   : > { %v2371_v62 = vpop.xlane.xlu0 %2370  ;;  %v2380_v52 = vpop.xlane.xlu1 %2379 }
 0x452   : > { %2520 = vst.msk [vmem:[%s3898_s23 + $0x3a8] sm:$0xff] %vm2402_vm6, %v2371_v62  ;;  %2523 = vst.msk [vmem:[%s3898_s23 + $0x3c0] sm:$0xff] %vm2402_vm6, %v2380_v52 }
 0x455   : > { %v2389_v4 = vpop.xlane.xlu0 %2388  ;;  %v2392_v21 = vpop.xlane.xlu1 %2391 }
 0x456   : > { %2526 = vst.msk [vmem:[%s3898_s23 + $0x3d8] sm:$0xff] %vm2402_vm6, %v2389_v4  ;;  %2527 = vst.msk [vmem:[%s3898_s23 + $0x3e0] sm:$0xff] %vm2402_vm6, %v2392_v21 }
 0x459   : > { %v2383_v49 = vpop.xlane.xlu0 %2382  ;;  %v2398_v35 = vpop.xlane.xlu1 %2397 }
 0x45a   : > { %2524 = vst.msk [vmem:[%s3898_s23 + $0x3c8] sm:$0xff] %vm2402_vm6, %v2383_v49  ;;  %2529 = vst.msk [vmem:[%s3898_s23 + $0x3f0] sm:$0xff] %vm2402_vm6, %v2398_v35 }
 0x45d   : > { %v2395_v59 = vpop.xlane.xlu0 %2394 }
 0x45e   : > { %2528 = vst.msk [vmem:[%s3898_s23 + $0x3e8] sm:$0xff] %vm2402_vm6, %v2395_v59 }
 0x461   : > { %v2401_v63 = vpop.xlane.xlu0 %2400 }
 0x462   : > { %2530 = vst.msk [vmem:[%s3898_s23 + $0x3f8] sm:$0xff] %vm2402_vm6, %v2401_v63 }
 0x463 PF: > { %s19_s29 = sadd.s32 1, %s3190_s29   ;;  %s4298_s27 = smov %s3186_s28 }
 0x464   : > { %p16_p5 = scmp.ge.s32.totalorder %s19_s29, 4   ;;  %s4299_s28 = smov %s4301_s30 }
 0x466   :  { %18 = sbr.rel (!%p16_p5) target bundleno = 2 (0x2), region = 96 }

</bundles_post_ra>
